<compile_context>
chip_gen: v5e
topology: v5e:2x2
jax: 0.10.0
libtpu: 0.0.40
codegen_flags: <defaults>
</compile_context>

<pallas_src>
import numpy as np
import jax
import jax.numpy as jnp
from jax.experimental import pallas as pl
from jax.experimental.pallas import tpu as pltpu

NEG_SLOPE = 0.2       # GATConv default negative_slope
MASK_VALUE = -1e30    # additive softmax mask for non-edges (finite, bf16-representable)


def _make_gat_kernel(heads: int, c_head: int):
    def gat_kernel(adjb_ref, h_ref, asrc_ref, adst_ref, bias_ref, out_ref,
                   m_sc, l_sc, acc_sc):
        # adjb: [TD, TS] bf16, h: [TS, H*C], asrc: [H, TS], adst: [TD, H],
        # bias: [1, H*C], out: [TD, H*C]; scratch: m/l [TD, H], acc [TD, H*C].
        j = pl.program_id(1)

        @pl.when(j == 0)
        def _():
            m_sc[...] = jnp.full(m_sc.shape, -jnp.inf, jnp.float32)
            l_sc[...] = jnp.zeros(l_sc.shape, jnp.float32)
            acc_sc[...] = jnp.zeros(acc_sc.shape, jnp.float32)

        adjb = adjb_ref[...].astype(jnp.float32)        # upcast before arithmetic
        a_dst = adst_ref[...]                           # [TD, H]
        a_src = asrc_ref[...]                           # [H, TS] (transposed once, outside)
        h_src = h_ref[...]                              # [TS, H*C]

        for hd in range(heads):
            sl = slice(hd * c_head, (hd + 1) * c_head)
            # score[i, j] for edge j -> i within this (dst, src) tile
            s = a_dst[:, hd:hd + 1] + a_src[hd:hd + 1, :]          # [TD, TS]
            s = jnp.where(s >= 0.0, s, NEG_SLOPE * s)              # leaky_relu
            s = s + adjb                                           # + log(w) / mask

            # online (flash-style) softmax over src tiles
            m_prev = m_sc[:, hd:hd + 1]                            # [TD, 1]
            m_new = jnp.maximum(m_prev, jnp.max(s, axis=-1, keepdims=True))
            rescale = jnp.exp(m_prev - m_new)                      # [TD, 1]
            p = jnp.exp(s - m_new)                                 # [TD, TS]
            l_sc[:, hd:hd + 1] = (rescale * l_sc[:, hd:hd + 1]
                                  + jnp.sum(p, axis=-1, keepdims=True))
            acc_sc[:, sl] = rescale * acc_sc[:, sl] + jnp.dot(
                p, h_src[:, sl], preferred_element_type=jnp.float32)
            m_sc[:, hd:hd + 1] = m_new

        @pl.when(j == pl.num_programs(1) - 1)
        def _():
            # fold the softmax normalization into a per-row reciprocal scale (EUP)
            inv_l = pl.reciprocal(l_sc[...], approx=True)          # [TD, H]
            for hd in range(heads):
                sl = slice(hd * c_head, (hd + 1) * c_head)
                out_ref[:, sl] = (acc_sc[:, sl] * inv_l[:, hd:hd + 1]
                                  + bias_ref[:, sl])
    return gat_kernel


def weighted_gat_pallas(x, lin_w, att_src, att_dst, bias, adj_bias, heads,
                        tile_dst=256, tile_src=512):
    """lin_w: [H*C, Din] (PyG Linear weight), att_*: [H, C], bias: [H*C],
    adj_bias: [N, N] additive log-weight / -1e30 mask (f32)."""
    n = x.shape[0]
    hc = lin_w.shape[0]
    c = hc // heads

    x = x.astype(jnp.float32)
    w_t = jnp.asarray(lin_w, jnp.float32).T                    # [Din, H*C]
    att_src = jnp.asarray(att_src, jnp.float32)
    att_dst = jnp.asarray(att_dst, jnp.float32)
    bias2d = jnp.asarray(bias, jnp.float32).reshape(1, hc)

    # Hoisted projections: computed once with XLA, not recomputed per dst tile.
    h = x @ w_t                                                # [N, H*C]
    hr = h.reshape(n, heads, c)
    a_src_t = jnp.einsum('nhc,hc->hn', hr, att_src)            # [H, N]
    a_dst = jnp.einsum('nhc,hc->nh', hr, att_dst)              # [N, H]

    # --- tile sizes: block dims must be (8,128)-aligned or span the full (padded) dim ---
    if n <= tile_dst:
        td = n
    else:
        assert tile_dst % 8 == 0
        td = tile_dst
    if n <= tile_src:
        ts = n
    else:
        assert tile_src % 128 == 0
        ts = tile_src
    n_dst = -(-n // td) * td
    n_src = -(-n // ts) * ts
    pad_d, pad_s = n_dst - n, n_src - n

    adjb = jnp.pad(adj_bias.astype(jnp.float32), ((0, pad_d), (0, pad_s)),
                   constant_values=MASK_VALUE)
    # bf16 halves the only O(N^2) HBM stream and its double-buffer VMEM footprint
    # (doubly valuable on v7x's 64 MiB VMEM); upcast to f32 inside the kernel.
    adjb = adjb.astype(jnp.bfloat16)
    h_p = jnp.pad(h, ((0, pad_s), (0, 0)))
    asrc_p = jnp.pad(a_src_t, ((0, 0), (0, pad_s)))
    adst_p = jnp.pad(a_dst, ((0, pad_d), (0, 0)))

    grid = (n_dst // td, n_src // ts)

    # Explicit VMEM budget from the actual (double-buffered, lane-padded) tiles.
    def _lp(d):
        return max(d, 128)
    est = (2 * td * ts * 2                      # adj_bias blocks (bf16)
           + 2 * ts * _lp(hc) * 4               # h blocks
           + 2 * 8 * _lp(ts) * 4                # a_src_t blocks
           + 2 * td * _lp(heads) * 4            # a_dst blocks
           + 2 * td * _lp(hc) * 4               # out blocks
           + td * (2 * _lp(heads) + _lp(hc)) * 4)  # m/l/acc scratch
    vmem_limit = int(min(max(2 * est + (8 << 20), 32 << 20), 64 << 20))

    kernel = _make_gat_kernel(heads, c)
    out = pl.pallas_call(
        kernel,
        out_shape=jax.ShapeDtypeStruct((n_dst, hc), jnp.float32),
        grid_spec=pltpu.PrefetchScalarGridSpec(
            num_scalar_prefetch=0,
            grid=grid,
            in_specs=[
                pl.BlockSpec((td, ts), lambda i, j: (i, j)),      # adj_bias (bf16)
                pl.BlockSpec((ts, hc), lambda i, j: (j, 0)),      # h (source rows)
                pl.BlockSpec((heads, ts), lambda i, j: (0, j)),   # a_src_t
                pl.BlockSpec((td, heads), lambda i, j: (i, 0)),   # a_dst
                pl.BlockSpec((1, hc), lambda i, j: (0, 0)),       # bias
            ],
            out_specs=pl.BlockSpec((td, hc), lambda i, j: (i, 0)),
            scratch_shapes=[
                pltpu.VMEM((td, heads), jnp.float32),   # running max
                pltpu.VMEM((td, heads), jnp.float32),   # running denominator
                pltpu.VMEM((td, hc), jnp.float32),      # running numerator
            ]),
        compiler_params=pltpu.CompilerParams(
            dimension_semantics=("parallel", "arbitrary"),
            vmem_limit_bytes=vmem_limit),
    )(adjb, h_p, asrc_p, adst_p, bias2d)
    return out[:n]


def build_dense_bias(src, dst, w, n):
    """adj_bias[dst, src] = log(sum of parallel-edge weights), -1e30 elsewhere.
    Summing duplicate-edge weights before the log is exactly equivalent to PyG's
    per-edge softmax contributions: exp(a+log w1)+exp(a+log w2) = exp(a+log(w1+w2))."""
    wmat = jnp.zeros((n, n), jnp.float32).at[dst, src].add(w)
    return jnp.where(wmat > 0.0, jnp.log(jnp.maximum(wmat, 1e-38)), MASK_VALUE)


def add_self_loops_mean(src, dst, w, n):
    """PyG add_self_loops(..., fill_value='mean'): self-loop weight = mean of the
    incoming edge weights of that destination node."""
    deg = jax.ops.segment_sum(jnp.ones_like(w), dst, num_segments=n)
    wsum = jax.ops.segment_sum(w, dst, num_segments=n)
    loop_w = wsum / jnp.maximum(deg, 1.0)
    src_all = jnp.concatenate([src, jnp.arange(n)])
    dst_all = jnp.concatenate([dst, jnp.arange(n)])
    w_all = jnp.concatenate([w, loop_w])
    return src_all, dst_all, w_all


def reference_gat(x, lin_w, att_src, att_dst, bias, src, dst, w, n, heads):
    """Pure-JAX sparse reference mirroring PyG GATConv + WeightedGATConvLayer.edge_update.
    log(edge_weight) is rounded through bf16 to mirror the kernel's bf16 adj_bias storage
    (a precision-only difference, not a semantics change)."""
    hc = lin_w.shape[0]
    c = hc // heads
    h = (x @ lin_w.T).reshape(n, heads, c)
    a_src = (h * att_src[None]).sum(-1)   # [N, H]
    a_dst = (h * att_dst[None]).sum(-1)   # [N, H]
    alpha = a_src[src] + a_dst[dst]       # [E, H]
    alpha = jnp.where(alpha >= 0.0, alpha, NEG_SLOPE * alpha)
    logw = jnp.log(w).astype(jnp.bfloat16).astype(jnp.float32)
    alpha = alpha + logw[:, None]
    amax = jax.ops.segment_max(alpha, dst, num_segments=n)
    ea = jnp.exp(alpha - amax[dst])
    denom = jax.ops.segment_sum(ea, dst, num_segments=n)
    alpha = ea / denom[dst]
    msg = h[src] * alpha[:, :, None]      # [E, H, C]
    out = jax.ops.segment_sum(msg, dst, num_segments=n)
    return out.reshape(n, hc) + bias[None]


if __name__ == "__main__":
    # Shapes implied by the module: dim_in=32, dim_out=32, heads=4 -> C=8.
    # N=256 nodes with small tiles so the 2-D grid (4 dst tiles x 2 src tiles) and the
    # online-softmax accumulation across src tiles are actually exercised.
    N, DIN, HEADS = 256, 32, 4
    DOUT = 32
    C = DOUT // HEADS
    TILE_DST, TILE_SRC = 64, 128

    key = jax.random.PRNGKey(0)
    k1, k2, k3, k4, k5, k6 = jax.random.split(key, 6)

    # Node features.
    x = jax.random.normal(k1, (N, DIN), jnp.float32)

    # Parameters: Linear(dim_in, heads*C, bias=False), att_src/att_dst, output bias.
    lin_w = jax.random.normal(k2, (HEADS * C, DIN), jnp.float32) * 0.1
    att_src = jax.random.normal(k3, (HEADS, C), jnp.float32) * 0.1
    att_dst = jax.random.normal(k4, (HEADS, C), jnp.float32) * 0.1
    bias = jax.random.normal(k5, (HEADS * C,), jnp.float32) * 0.05

    # Graph: bidirectional ring + one-directional chords (i -> i+7), positive weights.
    fwd = np.arange(N)
    src_np = np.concatenate([fwd, (fwd + 1) % N, fwd])
    dst_np = np.concatenate([(fwd + 1) % N, fwd, (fwd + 7) % N])
    src = jnp.asarray(src_np, jnp.int32)
    dst = jnp.asarray(dst_np, jnp.int32)
    edge_attr = jax.random.uniform(k6, (src.shape[0],), jnp.float32, 0.5, 1.5)

    # GATConv default: add self loops (fill_value='mean' for the scalar edge weight).
    src_a, dst_a, w_a = add_self_loops_mean(src, dst, edge_attr, N)
    adj_bias = build_dense_bias(src_a, dst_a, w_a, N)

    out = weighted_gat_pallas(x, lin_w, att_src, att_dst, bias, adj_bias, HEADS,
                              tile_dst=TILE_DST, tile_src=TILE_SRC)
    out = jax.block_until_ready(out)

    ref = reference_gat(x, lin_w, att_src, att_dst, bias, src_a, dst_a, w_a, N, HEADS)
    np.testing.assert_allclose(np.asarray(out), np.asarray(ref), rtol=2e-3, atol=2e-3)

    print("KERNEL_OK")
</pallas_src>

<mosaic_0001>
module attributes {stable_mosaic.version = 11 : i64} {
  func.func @gat_kernel(%arg0: i32, %arg1: i32, %arg2: memref<64x128xbf16, #tpu.memory_space<vmem>>, %arg3: memref<128x32xf32, #tpu.memory_space<vmem>>, %arg4: memref<4x128xf32, #tpu.memory_space<vmem>>, %arg5: memref<64x4xf32, #tpu.memory_space<vmem>>, %arg6: memref<1x32xf32, #tpu.memory_space<vmem>>, %arg7: memref<64x32xf32, #tpu.memory_space<vmem>>, %arg8: memref<64x4xf32, #tpu.memory_space<vmem>>, %arg9: memref<64x4xf32, #tpu.memory_space<vmem>>, %arg10: memref<64x32xf32, #tpu.memory_space<vmem>>) attributes {dimension_semantics = [#tpu.dimension_semantics<parallel>, #tpu.dimension_semantics<arbitrary>], iteration_bounds = array<i64: 4, 2>, scalar_prefetch = 0 : i64, scratch_operands = 3 : i64, tpu.core_type = #tpu.core_type<tc>, window_params = [{transform_indices = @transform_0, window_bounds = array<i64: 64, 128>}, {transform_indices = @transform_1, window_bounds = array<i64: 128, 32>}, {transform_indices = @transform_2, window_bounds = array<i64: 4, 128>}, {transform_indices = @transform_3, window_bounds = array<i64: 64, 4>}, {pipeline_mode = #tpu.pipeline_mode<synchronous>, transform_indices = @transform_4, window_bounds = array<i64: 1, 32>}, {transform_indices = @transform_5, window_bounds = array<i64: 64, 32>}]} {
    %c0_i32 = arith.constant 0 : i32
    %0 = arith.cmpi eq, %arg1, %c0_i32 : i32
    %1 = arith.extui %0 : i1 to i32
    %c0_i32_0 = arith.constant 0 : i32
    %2 = arith.cmpi ne, %1, %c0_i32_0 : i32
    scf.if %2 {
      %cst_70 = arith.constant 0xFF800000 : f32
      %147 = vector.broadcast %cst_70 : f32 to vector<64x4xf32>
      %c0_71 = arith.constant 0 : index
      %c0_72 = arith.constant 0 : index
      %148 = vector.load %arg8[%c0_71, %c0_72] : memref<64x4xf32, #tpu.memory_space<vmem>>, vector<64x4xf32>
      tpu.vector_store %arg8[%c0_71, %c0_72], %147 {strides = array<i32>} : memref<64x4xf32, #tpu.memory_space<vmem>>, vector<64x4xf32>,
      %cst_73 = arith.constant 0.000000e+00 : f32
      %149 = vector.broadcast %cst_73 : f32 to vector<64x4xf32>
      %c0_74 = arith.constant 0 : index
      %c0_75 = arith.constant 0 : index
      %150 = vector.load %arg9[%c0_74, %c0_75] : memref<64x4xf32, #tpu.memory_space<vmem>>, vector<64x4xf32>
      tpu.vector_store %arg9[%c0_74, %c0_75], %149 {strides = array<i32>} : memref<64x4xf32, #tpu.memory_space<vmem>>, vector<64x4xf32>,
      %cst_76 = arith.constant 0.000000e+00 : f32
      %151 = vector.broadcast %cst_76 : f32 to vector<64x32xf32>
      %c0_77 = arith.constant 0 : index
      %c0_78 = arith.constant 0 : index
      %152 = vector.load %arg10[%c0_77, %c0_78] : memref<64x32xf32, #tpu.memory_space<vmem>>, vector<64x32xf32>
      tpu.vector_store %arg10[%c0_77, %c0_78], %151 {strides = array<i32>} : memref<64x32xf32, #tpu.memory_space<vmem>>, vector<64x32xf32>,
    } else {
    }
    %c0 = arith.constant 0 : index
    %c0_1 = arith.constant 0 : index
    %3 = vector.load %arg2[%c0, %c0_1] : memref<64x128xbf16, #tpu.memory_space<vmem>>, vector<64x128xbf16>
    %4 = arith.extf %3 : vector<64x128xbf16> to vector<64x128xf32>
    %c0_2 = arith.constant 0 : index
    %c0_3 = arith.constant 0 : index
    %5 = vector.load %arg5[%c0_2, %c0_3] : memref<64x4xf32, #tpu.memory_space<vmem>>, vector<64x4xf32>
    %c0_4 = arith.constant 0 : index
    %c0_5 = arith.constant 0 : index
    %6 = vector.load %arg4[%c0_4, %c0_5] : memref<4x128xf32, #tpu.memory_space<vmem>>, vector<4x128xf32>
    %c0_6 = arith.constant 0 : index
    %c0_7 = arith.constant 0 : index
    %7 = vector.load %arg3[%c0_6, %c0_7] : memref<128x32xf32, #tpu.memory_space<vmem>>, vector<128x32xf32>
    %8 = vector.extract_strided_slice %5 {offsets = [0, 0], sizes = [64, 1], strides = [1, 1]} : vector<64x4xf32> to vector<64x1xf32>
    %9 = vector.extract_strided_slice %6 {offsets = [0, 0], sizes = [1, 128], strides = [1, 1]} : vector<4x128xf32> to vector<1x128xf32>
    %10 = vector.broadcast %8 : vector<64x1xf32> to vector<64x128xf32>
    %11 = vector.broadcast %9 : vector<1x128xf32> to vector<64x128xf32>
    %12 = arith.addf %10, %11 : vector<64x128xf32>
    %cst = arith.constant 0.000000e+00 : f32
    %13 = vector.broadcast %cst : f32 to vector<64x128xf32>
    %14 = arith.cmpf oge, %12, %13 : vector<64x128xf32>
    %cst_8 = arith.constant 2.000000e-01 : f32
    %15 = vector.broadcast %cst_8 : f32 to vector<64x128xf32>
    %16 = arith.mulf %15, %12 : vector<64x128xf32>
    %17 = arith.select %14, %12, %16 : vector<64x128xi1>, vector<64x128xf32>
    %18 = arith.addf %17, %4 : vector<64x128xf32>
    %c0_9 = arith.constant 0 : index
    %c0_10 = arith.constant 0 : index
    %19 = vector.load %arg8[%c0_9, %c0_10] : memref<64x4xf32, #tpu.memory_space<vmem>>, vector<64x1xf32>
    %cst_11 = arith.constant dense<0xFF800000> : vector<64xf32>
    %20 = vector.multi_reduction <maximumf>, %18, %cst_11 [1] : vector<64x128xf32> to vector<64xf32>
    %21 = vector.shape_cast %20 : vector<64xf32> to vector<64x1xf32>
    %22 = arith.maximumf %19, %21 : vector<64x1xf32>
    %23 = arith.subf %19, %22 : vector<64x1xf32>
    %24 = math.exp %23 : vector<64x1xf32>
    %25 = vector.broadcast %22 : vector<64x1xf32> to vector<64x128xf32>
    %26 = arith.subf %18, %25 : vector<64x128xf32>
    %27 = math.exp %26 : vector<64x128xf32>
    %c0_12 = arith.constant 0 : index
    %c0_13 = arith.constant 0 : index
    %28 = vector.load %arg9[%c0_12, %c0_13] : memref<64x4xf32, #tpu.memory_space<vmem>>, vector<64x1xf32>
    %29 = arith.mulf %24, %28 : vector<64x1xf32>
    %cst_14 = arith.constant dense<0.000000e+00> : vector<64xf32>
    %30 = vector.multi_reduction <add>, %27, %cst_14 [1] : vector<64x128xf32> to vector<64xf32>
    %31 = vector.shape_cast %30 : vector<64xf32> to vector<64x1xf32>
    %32 = arith.addf %29, %31 : vector<64x1xf32>
    %c0_15 = arith.constant 0 : index
    %c0_16 = arith.constant 0 : index
    %33 = vector.load %arg9[%c0_15, %c0_16] : memref<64x4xf32, #tpu.memory_space<vmem>>, vector<64x1xf32>
    tpu.vector_store %arg9[%c0_15, %c0_16], %32 {strides = array<i32>} : memref<64x4xf32, #tpu.memory_space<vmem>>, vector<64x1xf32>,
    %c0_17 = arith.constant 0 : index
    %c0_18 = arith.constant 0 : index
    %34 = vector.load %arg10[%c0_17, %c0_18] : memref<64x32xf32, #tpu.memory_space<vmem>>, vector<64x8xf32>
    %35 = vector.broadcast %24 : vector<64x1xf32> to vector<64x8xf32>
    %36 = arith.mulf %35, %34 : vector<64x8xf32>
    %37 = vector.extract_strided_slice %7 {offsets = [0, 0], sizes = [128, 8], strides = [1, 1]} : vector<128x32xf32> to vector<128x8xf32>
    %cst_19 = arith.constant dense<0.000000e+00> : vector<64x8xf32>
    %38 = tpu.matmul %27, %37, %cst_19 {dimension_numbers = #tpu.dot_dimension_numbers<[1], [0], [0], [1], [0, 0, 1, 1], [], []>} : vector<64x128xf32>, vector<128x8xf32>, vector<64x8xf32> -> vector<64x8xf32>
    %39 = arith.addf %36, %38 : vector<64x8xf32>
    %c0_20 = arith.constant 0 : index
    %c0_21 = arith.constant 0 : index
    %40 = vector.load %arg10[%c0_20, %c0_21] : memref<64x32xf32, #tpu.memory_space<vmem>>, vector<64x8xf32>
    tpu.vector_store %arg10[%c0_20, %c0_21], %39 {strides = array<i32>} : memref<64x32xf32, #tpu.memory_space<vmem>>, vector<64x8xf32>,
    %c0_22 = arith.constant 0 : index
    %c0_23 = arith.constant 0 : index
    %41 = vector.load %arg8[%c0_22, %c0_23] : memref<64x4xf32, #tpu.memory_space<vmem>>, vector<64x1xf32>
    tpu.vector_store %arg8[%c0_22, %c0_23], %22 {strides = array<i32>} : memref<64x4xf32, #tpu.memory_space<vmem>>, vector<64x1xf32>,
    %42 = vector.extract_strided_slice %5 {offsets = [0, 1], sizes = [64, 1], strides = [1, 1]} : vector<64x4xf32> to vector<64x1xf32>
    %43 = vector.extract_strided_slice %6 {offsets = [1, 0], sizes = [1, 128], strides = [1, 1]} : vector<4x128xf32> to vector<1x128xf32>
    %44 = vector.broadcast %42 : vector<64x1xf32> to vector<64x128xf32>
    %45 = vector.broadcast %43 : vector<1x128xf32> to vector<64x128xf32>
    %46 = arith.addf %44, %45 : vector<64x128xf32>
    %cst_24 = arith.constant 0.000000e+00 : f32
    %47 = vector.broadcast %cst_24 : f32 to vector<64x128xf32>
    %48 = arith.cmpf oge, %46, %47 : vector<64x128xf32>
    %cst_25 = arith.constant 2.000000e-01 : f32
    %49 = vector.broadcast %cst_25 : f32 to vector<64x128xf32>
    %50 = arith.mulf %49, %46 : vector<64x128xf32>
    %51 = arith.select %48, %46, %50 : vector<64x128xi1>, vector<64x128xf32>
    %52 = arith.addf %51, %4 : vector<64x128xf32>
    %c0_26 = arith.constant 0 : index
    %c1 = arith.constant 1 : index
    %53 = vector.load %arg8[%c0_26, %c1] : memref<64x4xf32, #tpu.memory_space<vmem>>, vector<64x1xf32>
    %cst_27 = arith.constant dense<0xFF800000> : vector<64xf32>
    %54 = vector.multi_reduction <maximumf>, %52, %cst_27 [1] : vector<64x128xf32> to vector<64xf32>
    %55 = vector.shape_cast %54 : vector<64xf32> to vector<64x1xf32>
    %56 = arith.maximumf %53, %55 : vector<64x1xf32>
    %57 = arith.subf %53, %56 : vector<64x1xf32>
    %58 = math.exp %57 : vector<64x1xf32>
    %59 = vector.broadcast %56 : vector<64x1xf32> to vector<64x128xf32>
    %60 = arith.subf %52, %59 : vector<64x128xf32>
    %61 = math.exp %60 : vector<64x128xf32>
    %c0_28 = arith.constant 0 : index
    %c1_29 = arith.constant 1 : index
    %62 = vector.load %arg9[%c0_28, %c1_29] : memref<64x4xf32, #tpu.memory_space<vmem>>, vector<64x1xf32>
    %63 = arith.mulf %58, %62 : vector<64x1xf32>
    %cst_30 = arith.constant dense<0.000000e+00> : vector<64xf32>
    %64 = vector.multi_reduction <add>, %61, %cst_30 [1] : vector<64x128xf32> to vector<64xf32>
    %65 = vector.shape_cast %64 : vector<64xf32> to vector<64x1xf32>
    %66 = arith.addf %63, %65 : vector<64x1xf32>
    %c0_31 = arith.constant 0 : index
    %c1_32 = arith.constant 1 : index
    %67 = vector.load %arg9[%c0_31, %c1_32] : memref<64x4xf32, #tpu.memory_space<vmem>>, vector<64x1xf32>
    tpu.vector_store %arg9[%c0_31, %c1_32], %66 {strides = array<i32>} : memref<64x4xf32, #tpu.memory_space<vmem>>, vector<64x1xf32>,
    %c0_33 = arith.constant 0 : index
    %c8 = arith.constant 8 : index
    %68 = vector.load %arg10[%c0_33, %c8] : memref<64x32xf32, #tpu.memory_space<vmem>>, vector<64x8xf32>
    %69 = vector.broadcast %58 : vector<64x1xf32> to vector<64x8xf32>
    %70 = arith.mulf %69, %68 : vector<64x8xf32>
    %71 = vector.extract_strided_slice %7 {offsets = [0, 8], sizes = [128, 8], strides = [1, 1]} : vector<128x32xf32> to vector<128x8xf32>
    %cst_34 = arith.constant dense<0.000000e+00> : vector<64x8xf32>
    %72 = tpu.matmul %61, %71, %cst_34 {dimension_numbers = #tpu.dot_dimension_numbers<[1], [0], [0], [1], [0, 0, 1, 1], [], []>} : vector<64x128xf32>, vector<128x8xf32>, vector<64x8xf32> -> vector<64x8xf32>
    %73 = arith.addf %70, %72 : vector<64x8xf32>
    %c0_35 = arith.constant 0 : index
    %c8_36 = arith.constant 8 : index
    %74 = vector.load %arg10[%c0_35, %c8_36] : memref<64x32xf32, #tpu.memory_space<vmem>>, vector<64x8xf32>
    tpu.vector_store %arg10[%c0_35, %c8_36], %73 {strides = array<i32>} : memref<64x32xf32, #tpu.memory_space<vmem>>, vector<64x8xf32>,
    %c0_37 = arith.constant 0 : index
    %c1_38 = arith.constant 1 : index
    %75 = vector.load %arg8[%c0_37, %c1_38] : memref<64x4xf32, #tpu.memory_space<vmem>>, vector<64x1xf32>
    tpu.vector_store %arg8[%c0_37, %c1_38], %56 {strides = array<i32>} : memref<64x4xf32, #tpu.memory_space<vmem>>, vector<64x1xf32>,
    %76 = vector.extract_strided_slice %5 {offsets = [0, 2], sizes = [64, 1], strides = [1, 1]} : vector<64x4xf32> to vector<64x1xf32>
    %77 = vector.extract_strided_slice %6 {offsets = [2, 0], sizes = [1, 128], strides = [1, 1]} : vector<4x128xf32> to vector<1x128xf32>
    %78 = vector.broadcast %76 : vector<64x1xf32> to vector<64x128xf32>
    %79 = vector.broadcast %77 : vector<1x128xf32> to vector<64x128xf32>
    %80 = arith.addf %78, %79 : vector<64x128xf32>
    %cst_39 = arith.constant 0.000000e+00 : f32
    %81 = vector.broadcast %cst_39 : f32 to vector<64x128xf32>
    %82 = arith.cmpf oge, %80, %81 : vector<64x128xf32>
    %cst_40 = arith.constant 2.000000e-01 : f32
    %83 = vector.broadcast %cst_40 : f32 to vector<64x128xf32>
    %84 = arith.mulf %83, %80 : vector<64x128xf32>
    %85 = arith.select %82, %80, %84 : vector<64x128xi1>, vector<64x128xf32>
    %86 = arith.addf %85, %4 : vector<64x128xf32>
    %c0_41 = arith.constant 0 : index
    %c2 = arith.constant 2 : index
    %87 = vector.load %arg8[%c0_41, %c2] : memref<64x4xf32, #tpu.memory_space<vmem>>, vector<64x1xf32>
    %cst_42 = arith.constant dense<0xFF800000> : vector<64xf32>
    %88 = vector.multi_reduction <maximumf>, %86, %cst_42 [1] : vector<64x128xf32> to vector<64xf32>
    %89 = vector.shape_cast %88 : vector<64xf32> to vector<64x1xf32>
    %90 = arith.maximumf %87, %89 : vector<64x1xf32>
    %91 = arith.subf %87, %90 : vector<64x1xf32>
    %92 = math.exp %91 : vector<64x1xf32>
    %93 = vector.broadcast %90 : vector<64x1xf32> to vector<64x128xf32>
    %94 = arith.subf %86, %93 : vector<64x128xf32>
    %95 = math.exp %94 : vector<64x128xf32>
    %c0_43 = arith.constant 0 : index
    %c2_44 = arith.constant 2 : index
    %96 = vector.load %arg9[%c0_43, %c2_44] : memref<64x4xf32, #tpu.memory_space<vmem>>, vector<64x1xf32>
    %97 = arith.mulf %92, %96 : vector<64x1xf32>
    %cst_45 = arith.constant dense<0.000000e+00> : vector<64xf32>
    %98 = vector.multi_reduction <add>, %95, %cst_45 [1] : vector<64x128xf32> to vector<64xf32>
    %99 = vector.shape_cast %98 : vector<64xf32> to vector<64x1xf32>
    %100 = arith.addf %97, %99 : vector<64x1xf32>
    %c0_46 = arith.constant 0 : index
    %c2_47 = arith.constant 2 : index
    %101 = vector.load %arg9[%c0_46, %c2_47] : memref<64x4xf32, #tpu.memory_space<vmem>>, vector<64x1xf32>
    tpu.vector_store %arg9[%c0_46, %c2_47], %100 {strides = array<i32>} : memref<64x4xf32, #tpu.memory_space<vmem>>, vector<64x1xf32>,
    %c0_48 = arith.constant 0 : index
    %c16 = arith.constant 16 : index
    %102 = vector.load %arg10[%c0_48, %c16] : memref<64x32xf32, #tpu.memory_space<vmem>>, vector<64x8xf32>
    %103 = vector.broadcast %92 : vector<64x1xf32> to vector<64x8xf32>
    %104 = arith.mulf %103, %102 : vector<64x8xf32>
    %105 = vector.extract_strided_slice %7 {offsets = [0, 16], sizes = [128, 8], strides = [1, 1]} : vector<128x32xf32> to vector<128x8xf32>
    %cst_49 = arith.constant dense<0.000000e+00> : vector<64x8xf32>
    %106 = tpu.matmul %95, %105, %cst_49 {dimension_numbers = #tpu.dot_dimension_numbers<[1], [0], [0], [1], [0, 0, 1, 1], [], []>} : vector<64x128xf32>, vector<128x8xf32>, vector<64x8xf32> -> vector<64x8xf32>
    %107 = arith.addf %104, %106 : vector<64x8xf32>
    %c0_50 = arith.constant 0 : index
    %c16_51 = arith.constant 16 : index
    %108 = vector.load %arg10[%c0_50, %c16_51] : memref<64x32xf32, #tpu.memory_space<vmem>>, vector<64x8xf32>
    tpu.vector_store %arg10[%c0_50, %c16_51], %107 {strides = array<i32>} : memref<64x32xf32, #tpu.memory_space<vmem>>, vector<64x8xf32>,
    %c0_52 = arith.constant 0 : index
    %c2_53 = arith.constant 2 : index
    %109 = vector.load %arg8[%c0_52, %c2_53] : memref<64x4xf32, #tpu.memory_space<vmem>>, vector<64x1xf32>
    tpu.vector_store %arg8[%c0_52, %c2_53], %90 {strides = array<i32>} : memref<64x4xf32, #tpu.memory_space<vmem>>, vector<64x1xf32>,
    %110 = vector.extract_strided_slice %5 {offsets = [0, 3], sizes = [64, 1], strides = [1, 1]} : vector<64x4xf32> to vector<64x1xf32>
    %111 = vector.extract_strided_slice %6 {offsets = [3, 0], sizes = [1, 128], strides = [1, 1]} : vector<4x128xf32> to vector<1x128xf32>
    %112 = vector.broadcast %110 : vector<64x1xf32> to vector<64x128xf32>
    %113 = vector.broadcast %111 : vector<1x128xf32> to vector<64x128xf32>
    %114 = arith.addf %112, %113 : vector<64x128xf32>
    %cst_54 = arith.constant 0.000000e+00 : f32
    %115 = vector.broadcast %cst_54 : f32 to vector<64x128xf32>
    %116 = arith.cmpf oge, %114, %115 : vector<64x128xf32>
    %cst_55 = arith.constant 2.000000e-01 : f32
    %117 = vector.broadcast %cst_55 : f32 to vector<64x128xf32>
    %118 = arith.mulf %117, %114 : vector<64x128xf32>
    %119 = arith.select %116, %114, %118 : vector<64x128xi1>, vector<64x128xf32>
    %120 = arith.addf %119, %4 : vector<64x128xf32>
    %c0_56 = arith.constant 0 : index
    %c3 = arith.constant 3 : index
    %121 = vector.load %arg8[%c0_56, %c3] : memref<64x4xf32, #tpu.memory_space<vmem>>, vector<64x1xf32>
    %cst_57 = arith.constant dense<0xFF800000> : vector<64xf32>
    %122 = vector.multi_reduction <maximumf>, %120, %cst_57 [1] : vector<64x128xf32> to vector<64xf32>
    %123 = vector.shape_cast %122 : vector<64xf32> to vector<64x1xf32>
    %124 = arith.maximumf %121, %123 : vector<64x1xf32>
    %125 = arith.subf %121, %124 : vector<64x1xf32>
    %126 = math.exp %125 : vector<64x1xf32>
    %127 = vector.broadcast %124 : vector<64x1xf32> to vector<64x128xf32>
    %128 = arith.subf %120, %127 : vector<64x128xf32>
    %129 = math.exp %128 : vector<64x128xf32>
    %c0_58 = arith.constant 0 : index
    %c3_59 = arith.constant 3 : index
    %130 = vector.load %arg9[%c0_58, %c3_59] : memref<64x4xf32, #tpu.memory_space<vmem>>, vector<64x1xf32>
    %131 = arith.mulf %126, %130 : vector<64x1xf32>
    %cst_60 = arith.constant dense<0.000000e+00> : vector<64xf32>
    %132 = vector.multi_reduction <add>, %129, %cst_60 [1] : vector<64x128xf32> to vector<64xf32>
    %133 = vector.shape_cast %132 : vector<64xf32> to vector<64x1xf32>
    %134 = arith.addf %131, %133 : vector<64x1xf32>
    %c0_61 = arith.constant 0 : index
    %c3_62 = arith.constant 3 : index
    %135 = vector.load %arg9[%c0_61, %c3_62] : memref<64x4xf32, #tpu.memory_space<vmem>>, vector<64x1xf32>
    tpu.vector_store %arg9[%c0_61, %c3_62], %134 {strides = array<i32>} : memref<64x4xf32, #tpu.memory_space<vmem>>, vector<64x1xf32>,
    %c0_63 = arith.constant 0 : index
    %c24 = arith.constant 24 : index
    %136 = vector.load %arg10[%c0_63, %c24] : memref<64x32xf32, #tpu.memory_space<vmem>>, vector<64x8xf32>
    %137 = vector.broadcast %126 : vector<64x1xf32> to vector<64x8xf32>
    %138 = arith.mulf %137, %136 : vector<64x8xf32>
    %139 = vector.extract_strided_slice %7 {offsets = [0, 24], sizes = [128, 8], strides = [1, 1]} : vector<128x32xf32> to vector<128x8xf32>
    %cst_64 = arith.constant dense<0.000000e+00> : vector<64x8xf32>
    %140 = tpu.matmul %129, %139, %cst_64 {dimension_numbers = #tpu.dot_dimension_numbers<[1], [0], [0], [1], [0, 0, 1, 1], [], []>} : vector<64x128xf32>, vector<128x8xf32>, vector<64x8xf32> -> vector<64x8xf32>
    %141 = arith.addf %138, %140 : vector<64x8xf32>
    %c0_65 = arith.constant 0 : index
    %c24_66 = arith.constant 24 : index
    %142 = vector.load %arg10[%c0_65, %c24_66] : memref<64x32xf32, #tpu.memory_space<vmem>>, vector<64x8xf32>
    tpu.vector_store %arg10[%c0_65, %c24_66], %141 {strides = array<i32>} : memref<64x32xf32, #tpu.memory_space<vmem>>, vector<64x8xf32>,
    %c0_67 = arith.constant 0 : index
    %c3_68 = arith.constant 3 : index
    %143 = vector.load %arg8[%c0_67, %c3_68] : memref<64x4xf32, #tpu.memory_space<vmem>>, vector<64x1xf32>
    tpu.vector_store %arg8[%c0_67, %c3_68], %124 {strides = array<i32>} : memref<64x4xf32, #tpu.memory_space<vmem>>, vector<64x1xf32>,
    %c1_i32 = arith.constant 1 : i32
    %144 = arith.cmpi eq, %arg1, %c1_i32 : i32
    %145 = arith.extui %144 : i1 to i32
    %c0_i32_69 = arith.constant 0 : i32
    %146 = arith.cmpi ne, %145, %c0_i32_69 : i32
    scf.if %146 {
      %c0_70 = arith.constant 0 : index
      %c0_71 = arith.constant 0 : index
      %147 = vector.load %arg9[%c0_70, %c0_71] : memref<64x4xf32, #tpu.memory_space<vmem>>, vector<64x4xf32>
      %148 = tpu.reciprocal %147 {approx = true} : vector<64x4xf32> -> vector<64x4xf32>
      %c0_72 = arith.constant 0 : index
      %c0_73 = arith.constant 0 : index
      %149 = vector.load %arg10[%c0_72, %c0_73] : memref<64x32xf32, #tpu.memory_space<vmem>>, vector<64x8xf32>
      %150 = vector.extract_strided_slice %148 {offsets = [0, 0], sizes = [64, 1], strides = [1, 1]} : vector<64x4xf32> to vector<64x1xf32>
      %151 = vector.broadcast %150 : vector<64x1xf32> to vector<64x8xf32>
      %152 = arith.mulf %149, %151 : vector<64x8xf32>
      %c0_74 = arith.constant 0 : index
      %c0_75 = arith.constant 0 : index
      %153 = vector.load %arg6[%c0_74, %c0_75] : memref<1x32xf32, #tpu.memory_space<vmem>>, vector<1x8xf32>
      %154 = vector.broadcast %153 : vector<1x8xf32> to vector<64x8xf32>
      %155 = arith.addf %152, %154 : vector<64x8xf32>
      %c0_76 = arith.constant 0 : index
      %c0_77 = arith.constant 0 : index
      %156 = vector.load %arg7[%c0_76, %c0_77] : memref<64x32xf32, #tpu.memory_space<vmem>>, vector<64x8xf32>
      tpu.vector_store %arg7[%c0_76, %c0_77], %155 {strides = array<i32>} : memref<64x32xf32, #tpu.memory_space<vmem>>, vector<64x8xf32>,
      %c0_78 = arith.constant 0 : index
      %c8_79 = arith.constant 8 : index
      %157 = vector.load %arg10[%c0_78, %c8_79] : memref<64x32xf32, #tpu.memory_space<vmem>>, vector<64x8xf32>
      %158 = vector.extract_strided_slice %148 {offsets = [0, 1], sizes = [64, 1], strides = [1, 1]} : vector<64x4xf32> to vector<64x1xf32>
      %159 = vector.broadcast %158 : vector<64x1xf32> to vector<64x8xf32>
      %160 = arith.mulf %157, %159 : vector<64x8xf32>
      %c0_80 = arith.constant 0 : index
      %c8_81 = arith.constant 8 : index
      %161 = vector.load %arg6[%c0_80, %c8_81] : memref<1x32xf32, #tpu.memory_space<vmem>>, vector<1x8xf32>
      %162 = vector.broadcast %161 : vector<1x8xf32> to vector<64x8xf32>
      %163 = arith.addf %160, %162 : vector<64x8xf32>
      %c0_82 = arith.constant 0 : index
      %c8_83 = arith.constant 8 : index
      %164 = vector.load %arg7[%c0_82, %c8_83] : memref<64x32xf32, #tpu.memory_space<vmem>>, vector<64x8xf32>
      tpu.vector_store %arg7[%c0_82, %c8_83], %163 {strides = array<i32>} : memref<64x32xf32, #tpu.memory_space<vmem>>, vector<64x8xf32>,
      %c0_84 = arith.constant 0 : index
      %c16_85 = arith.constant 16 : index
      %165 = vector.load %arg10[%c0_84, %c16_85] : memref<64x32xf32, #tpu.memory_space<vmem>>, vector<64x8xf32>
      %166 = vector.extract_strided_slice %148 {offsets = [0, 2], sizes = [64, 1], strides = [1, 1]} : vector<64x4xf32> to vector<64x1xf32>
      %167 = vector.broadcast %166 : vector<64x1xf32> to vector<64x8xf32>
      %168 = arith.mulf %165, %167 : vector<64x8xf32>
      %c0_86 = arith.constant 0 : index
      %c16_87 = arith.constant 16 : index
      %169 = vector.load %arg6[%c0_86, %c16_87] : memref<1x32xf32, #tpu.memory_space<vmem>>, vector<1x8xf32>
      %170 = vector.broadcast %169 : vector<1x8xf32> to vector<64x8xf32>
      %171 = arith.addf %168, %170 : vector<64x8xf32>
      %c0_88 = arith.constant 0 : index
      %c16_89 = arith.constant 16 : index
      %172 = vector.load %arg7[%c0_88, %c16_89] : memref<64x32xf32, #tpu.memory_space<vmem>>, vector<64x8xf32>
      tpu.vector_store %arg7[%c0_88, %c16_89], %171 {strides = array<i32>} : memref<64x32xf32, #tpu.memory_space<vmem>>, vector<64x8xf32>,
      %c0_90 = arith.constant 0 : index
      %c24_91 = arith.constant 24 : index
      %173 = vector.load %arg10[%c0_90, %c24_91] : memref<64x32xf32, #tpu.memory_space<vmem>>, vector<64x8xf32>
      %174 = vector.extract_strided_slice %148 {offsets = [0, 3], sizes = [64, 1], strides = [1, 1]} : vector<64x4xf32> to vector<64x1xf32>
      %175 = vector.broadcast %174 : vector<64x1xf32> to vector<64x8xf32>
      %176 = arith.mulf %173, %175 : vector<64x8xf32>
      %c0_92 = arith.constant 0 : index
      %c24_93 = arith.constant 24 : index
      %177 = vector.load %arg6[%c0_92, %c24_93] : memref<1x32xf32, #tpu.memory_space<vmem>>, vector<1x8xf32>
      %178 = vector.broadcast %177 : vector<1x8xf32> to vector<64x8xf32>
      %179 = arith.addf %176, %178 : vector<64x8xf32>
      %c0_94 = arith.constant 0 : index
      %c24_95 = arith.constant 24 : index
      %180 = vector.load %arg7[%c0_94, %c24_95] : memref<64x32xf32, #tpu.memory_space<vmem>>, vector<64x8xf32>
      tpu.vector_store %arg7[%c0_94, %c24_95], %179 {strides = array<i32>} : memref<64x32xf32, #tpu.memory_space<vmem>>, vector<64x8xf32>,
    } else {
    }
    return
  }
  func.func @transform_0(%arg0: i32, %arg1: i32) -> (i32, i32) {
    %c0_i32 = arith.constant 0 : i32
    return %arg0, %arg1 : i32, i32
  }
  func.func @transform_1(%arg0: i32, %arg1: i32) -> (i32, i32) {
    %c0_i32 = arith.constant 0 : i32
    %c0_i32_0 = arith.constant 0 : i32
    return %arg1, %c0_i32 : i32, i32
  }
  func.func @transform_2(%arg0: i32, %arg1: i32) -> (i32, i32) {
    %c0_i32 = arith.constant 0 : i32
    %c0_i32_0 = arith.constant 0 : i32
    return %c0_i32, %arg1 : i32, i32
  }
  func.func @transform_3(%arg0: i32, %arg1: i32) -> (i32, i32) {
    %c0_i32 = arith.constant 0 : i32
    %c0_i32_0 = arith.constant 0 : i32
    return %arg0, %c0_i32 : i32, i32
  }
  func.func @transform_4(%arg0: i32, %arg1: i32) -> (i32, i32) {
    %c0_i32 = arith.constant 0 : i32
    %c0_i32_0 = arith.constant 0 : i32
    %c0_i32_1 = arith.constant 0 : i32
    return %c0_i32, %c0_i32_0 : i32, i32
  }
  func.func @transform_5(%arg0: i32, %arg1: i32) -> (i32, i32) {
    %c0_i32 = arith.constant 0 : i32
    %c0_i32_0 = arith.constant 0 : i32
    return %arg0, %c0_i32 : i32, i32
  }
}

</mosaic_0001>

<bundles_post_ra>
// kernel: tpu_custom_call.1
= control target key start
LH: loop header
LB: loop body
LE: loop exit
PB: predicated region body
PF: predicated region fallthrough
CT: control target
= control target key end

     0   :  { %s3122_s18 = smov 0   ;;  %s3124_s19 = smov 0   ;;  %s4517_s0 = inlined_call_operand.vmem [shape: bf16[256,256], index: 0, kind: input, shape index: {}]   ;;  %s4518_s1 = inlined_call_operand.vmem [shape: f32[256,32], index: 1, kind: input, shape index: {}]   ;;  %s4519_s2 = inlined_call_operand.vmem [shape: f32[4,256], index: 2, kind: input, shape index: {}]   ;;  %s4520_s3 = inlined_call_operand.vmem [shape: f32[256,4], index: 3, kind: input, shape index: {}]   ;;  %s4521_s4 = inlined_call_operand.vmem [shape: f32[1,32], index: 4, kind: input, shape index: {}]   ;;  %s4522_s5 = inlined_call_operand.vmem [shape: f32[256,32], index: 5, kind: output, shape index: {}]  }
   0x1   :  { %s3126_s20 = smov 0   ;;  %s3128_s21 = smov 0  }
   0x2   :  { %s3130_s22 = smov 0   ;;  %s3132_s23 = smov 0  }
   0x3   :  { %s3134_s24 = smov 0  }
   0x4 LB: > { %s24_s25 = sadd.s32 1, %s3066_s22  ;;  %s27_s26 = sadd.s32 1, %s3070_s23  ;;  %s3074_s24 = sphi %s3134_s24, %s15_s24   ;;  %s3070_s23 = sphi %s3132_s23, %s4592_s23   ;;  %s3066_s22 = sphi %s3130_s22, %s4591_s22   ;;  %s3062_s21 = sphi %s3128_s21, %s4590_s21   ;;  %s3058_s20 = sphi %s3126_s20, %s4589_s20   ;;  %s3054_s19 = sphi %s3124_s19, %s4588_s19   ;;  %s3050_s18 = sphi %s3122_s18, %s4587_s18  }
   0x5   : > { %p25_p0 = scmp.ge.s32.totalorder %s24_s25, 2  ;;  %p43_p1 = scmp.ne.s32.totalorder %s3054_s19, %s3050_s18 }
   0x6   : > { %p44_p2 = scmp.eq.s32.totalorder %s3074_s24, 0  ;;  %s36_s30 = sadd.s32 1, %s3054_s19 }
   0x7   : > { %s4594_s25 = smov (%p25_p0, %s24_s25), 0  ;;  %s4596_s26 = smov (!%p25_p0, %s27_s26), %s3070_s23 }
   0x8   : > { %p45_p3 = por %p44_p2, %p43_p1  ;;  %p29_p4 = scmp.ge.s32.totalorder %s4596_s26, 4 }
   0x9   : > { %s32_s27 = ssub.s32 %s3066_s22, %s4594_s25  ;;  %p2582_p6 = scmp.ge.s32.totalorder %s3074_s24, 8 }
   0xa   : > { %s4598_s26 = smov (%p29_p4, %s4596_s26), 0 }
   0xb   : > { %s31_s28 = ssub.s32 %s3070_s23, %s4598_s26  ;;  %197 = sbr.rel (%p2582_p6) target bundleno = 30 (0x1e), region = 20 }
   0xc   : > { %s33_s29 = sor.u32 %s32_s27, %s31_s28 }
   0xd   : > { %p34_p5 = scmp.eq.s32.totalorder %s33_s29, 0 }
   0xf   : > { %s3173_s6 = scalar_select %p34_p5, %s3054_s19, %s36_s30  }
  0x10   : > { %200 = sbr.rel (!%p45_p3) target bundleno = 30 (0x1e), region = 24  ;;  %s202_s7 = sand.u32 (%p45_p3), 1, %s3054_s19  }
  0x11   : > { %s2600_s8 = sshll.u32 (%p45_p3), %s3070_s23, 4  ;;  %s2583_s9 = sshll.u32 (%p45_p3), %s202_s7, 5 }
  0x12   : > { %s207_s10 = sadd.s32 (%p45_p3), %s3066_s22, %s2600_s8  ;;  %s204_s15 = scalar_lea.vmem (%p45_p3), [#allocation5], %s2583_s9 }
  0x13   : > { %s2586_s11 = sshll.u32 (%p45_p3), %s207_s10, 2 }
  0x14   : > { %s209_s14 = scalar_lea.vmem (%p45_p3), %s4517_s0, %s2586_s11 }
  0x15   : > { %v226_v0 = vld [vmem:[%s209_s14] sm:$0xf]  ;;  %v228_v1 = vld [vmem:[%s209_s14 + $0x8] sm:$0xf]  ;;  %v230_v2 = vld [vmem:[%s209_s14 + $0x10] sm:$0xf] }
  0x16   : > { %227 = vst [vmem:[%s204_s15] sm:$0xf] %v226_v0  ;;  %v232_v3 = vld [vmem:[%s209_s14 + $0x18] sm:$0xf]  ;;  %v234_v4 = vld [vmem:[%s209_s14 + $0x20] sm:$0xf] }
  0x17   : > { %229 = vst [vmem:[%s204_s15 + $0x4] sm:$0xf] %v228_v1  ;;  %v236_v5 = vld [vmem:[%s209_s14 + $0x28] sm:$0xf]  ;;  %v238_v6 = vld [vmem:[%s209_s14 + $0x30] sm:$0xf] }
  0x18   : > { %231 = vst [vmem:[%s204_s15 + $0x8] sm:$0xf] %v230_v2  ;;  %v240_v7 = vld [vmem:[%s209_s14 + $0x38] sm:$0xf] }
  0x19   : > { %233 = vst [vmem:[%s204_s15 + $0xc] sm:$0xf] %v232_v3 }
  0x1a   : > { %235 = vst [vmem:[%s204_s15 + $0x10] sm:$0xf] %v234_v4 }
  0x1b   : > { %237 = vst [vmem:[%s204_s15 + $0x14] sm:$0xf] %v236_v5 }
  0x1c   : > { %239 = vst [vmem:[%s204_s15 + $0x18] sm:$0xf] %v238_v6 }
  0x1d   : > { %241 = vst [vmem:[%s204_s15 + $0x1c] sm:$0xf] %v240_v7 }
  0x1e PF: > { %p2587_p7 = scmp.ge.s32.totalorder %s3074_s24, 1  ;;  %p305_p8 = scmp.lt.s32.totalorder %s3074_s24, 9 }
  0x20   : > { %p306_p9 = pnand %p2587_p7, %p305_p8 }
  0x22   : > { %309 = sbr.rel (%p306_p9) target bundleno = 2251 (0x8cb), region = 77 }
  0x27   : > { %s312_s16 = sand.u32 1, %s3050_s18   ;;  %s2589_s17 = sshll.u32 %s3058_s20, 4 }
  0x28   : > { %s2588_s27 = sshll.u32 %s312_s16, 5  ;;  %p355_p10 = scmp.lt.s32.totalorder %s2589_s17, 31 }
  0x29   : > { %p360_p11 = scmp.lt.s32.totalorder %s3058_s20, 1  ;;  %s2592_s30 = sshll.u32 %s3062_s21, 3 }
  0x2a   : > { %s4600_s17 = smov (!%p355_p10, %s2589_s17), 31  ;;  %p365_p12 = scmp.lt.s32.totalorder %s2592_s30, 31 }
  0x2b   : > { %s361_s28 = scalar_select %p360_p11, %s3058_s20, 1 }
  0x2c   : > { %s2590_s29 = sshll.u32 %s4600_s17, 3  ;;  %s4602_s30 = smov (!%p365_p12, %s2592_s30), 31 }
  0x2d   : > { %s3192_s9 = scalar_lea.vmem %s4518_s1, %s2590_s29  ;;  %s2591_s10 = sshll.u32 %s361_s28, 2 }
  0x2e   : > { %s3197_s13 = scalar_lea.vmem %s4519_s2, %s2591_s10  ;;  %s2593_s18 = sshll.u32 %s4602_s30, 3 }
  0x2f   : > { %s3202_s16 = scalar_lea.vmem %s4520_s3, %s2593_s18  ;;  %s3207_s7 = scalar_lea.vmem %s4522_s5, %s2593_s18 }
  0x30   : > { %s3209_s29 = scalar_lea.vmem [#allocation5], %s2588_s27  ;;  %p2596_p13 = scmp.ne.s32.totalorder %s3058_s20, 0 }
  0x32   : > { %379 = sbr.rel (%p2596_p13) target bundleno = 80 (0x50), region = 85 }
  0x37   : > { %vm380_vm0 = vcmask 31744   ;;  %v3076_v8 = vmov -inf   ;;  %v3077_v9 = vmov 0.0   ;;  %vm397_vm1 = vcmask 261120  }
  0x38   : > { %381 = vst.msk [vmem:[#allocation2] sm:$0xff] %vm380_vm0, %v3076_v8 }
  0x39   : > { %382 = vst.msk [vmem:[#allocation2 + $0x8] sm:$0xff] %vm380_vm0, %v3076_v8 }
  0x3a   : > { %383 = vst.msk [vmem:[#allocation2 + $0x10] sm:$0xff] %vm380_vm0, %v3076_v8 }
  0x3b   : > { %384 = vst.msk [vmem:[#allocation2 + $0x18] sm:$0xff] %vm380_vm0, %v3076_v8 }
  0x3c   : > { %385 = vst.msk [vmem:[#allocation2 + $0x20] sm:$0xff] %vm380_vm0, %v3076_v8 }
  0x3d   : > { %386 = vst.msk [vmem:[#allocation2 + $0x28] sm:$0xff] %vm380_vm0, %v3076_v8 }
  0x3e   : > { %387 = vst.msk [vmem:[#allocation2 + $0x30] sm:$0xff] %vm380_vm0, %v3076_v8 }
  0x3f   : > { %388 = vst.msk [vmem:[#allocation2 + $0x38] sm:$0xff] %vm380_vm0, %v3076_v8 }
  0x40   : > { %389 = vst.msk [vmem:[#allocation3] sm:$0xff] %vm380_vm0, %v3077_v9 }
  0x41   : > { %390 = vst.msk [vmem:[#allocation3 + $0x8] sm:$0xff] %vm380_vm0, %v3077_v9 }
  0x42   : > { %391 = vst.msk [vmem:[#allocation3 + $0x10] sm:$0xff] %vm380_vm0, %v3077_v9 }
  0x43   : > { %392 = vst.msk [vmem:[#allocation3 + $0x18] sm:$0xff] %vm380_vm0, %v3077_v9 }
  0x44   : > { %393 = vst.msk [vmem:[#allocation3 + $0x20] sm:$0xff] %vm380_vm0, %v3077_v9 }
  0x45   : > { %394 = vst.msk [vmem:[#allocation3 + $0x28] sm:$0xff] %vm380_vm0, %v3077_v9 }
  0x46   : > { %395 = vst.msk [vmem:[#allocation3 + $0x30] sm:$0xff] %vm380_vm0, %v3077_v9 }
  0x47   : > { %396 = vst.msk [vmem:[#allocation3 + $0x38] sm:$0xff] %vm380_vm0, %v3077_v9 }
  0x48   : > { %398 = vst.msk [vmem:[#allocation4] sm:$0xff] %vm397_vm1, %v3077_v9 }
  0x49   : > { %399 = vst.msk [vmem:[#allocation4 + $0x8] sm:$0xff] %vm397_vm1, %v3077_v9 }
  0x4a   : > { %400 = vst.msk [vmem:[#allocation4 + $0x10] sm:$0xff] %vm397_vm1, %v3077_v9 }
  0x4b   : > { %401 = vst.msk [vmem:[#allocation4 + $0x18] sm:$0xff] %vm397_vm1, %v3077_v9 }
  0x4c   : > { %402 = vst.msk [vmem:[#allocation4 + $0x20] sm:$0xff] %vm397_vm1, %v3077_v9 }
  0x4d   : > { %403 = vst.msk [vmem:[#allocation4 + $0x28] sm:$0xff] %vm397_vm1, %v3077_v9 }
  0x4e   : > { %404 = vst.msk [vmem:[#allocation4 + $0x30] sm:$0xff] %vm397_vm1, %v3077_v9 }
  0x4f   : > { %405 = vst.msk [vmem:[#allocation4 + $0x38] sm:$0xff] %vm397_vm1, %v3077_v9 }
  0x50 PF: > { %v3229_v10 = vld [vmem:[%s3202_s16 + $0x10] sm:$0xff]  ;;  %v423_v11 = vld [vmem:[%s3202_s16 + $0x8] sm:$0xff]  ;;  %v3078_v12 = vmov 1   ;;  %v3079_v13 = vmov 0   ;;  %v426_v14 = vld [vmem:[%s3202_s16 + $0x20] sm:$0xff]  ;;  %s3080_s27 = smov 120  }
  0x51   : > { %2695 = vset.pattern.permute.xlu0 %v3078_v12  ;;  %2692 = vset.pattern.permute.xlu1 %v3079_v13  ;;  %v425_v15 = vld [vmem:[%s3202_s16 + $0x18] sm:$0xff]  ;;  %v428_v16 = vld [vmem:[%s3202_s16 + $0x30] sm:$0xff]  ;;  %v427_v17 = vld [vmem:[%s3202_s16 + $0x28] sm:$0xff]  ;;  %s3082_s28 = smov 8   ;;  %s3084_s30 = smov 112  }
  0x52   : > { %459 = vperm.xlu1 %2692, %v3229_v10   ;;  %824 = vperm.xlu0 %2695, %v423_v11   ;;  %v429_v18 = vld [vmem:[%s3202_s16 + $0x38] sm:$0xff]  ;;  %v422_v19 = vld [vmem:[%s3202_s16] sm:$0xff]  ;;  %v2617_v22 = vld [vmem:[%s3209_s29 + $0x8] sm:$0xff]   ;;  %s3085_s8 = smov 104   ;;  %s3087_s10 = smov 24  }
  0x53   : > { %2693 = vset.pattern.permute.xlu2 %v3079_v13  ;;  %v430_v20 = vld [vmem:[%s3197_s13] sm:$0xf]  ;;  %v3250_v27 = vunpack.c.l.bf16 %v2617_v22  ;;  %v3265_v47 = vunpack.c.h.bf16 %v2617_v22  ;;  %v2618_v60 = vld [vmem:[%s3209_s29 + $0x10] sm:$0xff]   ;;  %v2619_v1 = vld [vmem:[%s3209_s29 + $0x18] sm:$0xff]   ;;  %p2597_p0 = scmp.ne.s32.totalorder %s3058_s20, 1 }
  0x54   : > { %469 = vperm.xlu2 %2693, %v426_v14   ;;  %v487_v21 = vperm.slane %v430_v20, 0  ;;  %v2602_v36 = vld [vmem:[%s3209_s29] sm:$0xff]   ;;  %v3275_v58 = vperm.slane %v430_v20, 1  ;;  %v3282_v2 = vunpack.c.h.bf16 %v2618_v60  ;;  %v3284_v3 = vunpack.c.l.bf16 %v2618_v60 }
  0x55   : > { %4547 = vst [vmem:[#allocation6_spill] sm:$0xff] %v3250_v27  ;;  %v3259_v38 = vunpack.c.l.bf16 %v2602_v36  ;;  %v3267_v53 = vunpack.c.h.bf16 %v2602_v36  ;;  %v3287_v8 = vunpack.c.l.bf16 %v2619_v1 }
  0x56   : > { %4549 = vst [vmem:[#allocation8_spill] sm:$0xff] %v3265_v47 }
  0x57   : > { %4548 = vst [vmem:[#allocation7_spill] sm:$0xff] %v3259_v38 }
  0x58   : > { %4550 = vst [vmem:[#allocation9_spill] sm:$0xff] %v3267_v53 }
  0x59   : > { %4551 = vst [vmem:[#allocation10_spill] sm:$0xff] %v3282_v2 }
  0x5a   : > { %464 = vperm.xlu1 %2692, %v425_v15   ;;  %844 = vperm.xlu0 %2695, %v428_v16   ;;  %4552 = vst [vmem:[#allocation11_spill] sm:$0xff] %v3284_v3 }
  0x5b   : > { %4553 = vst [vmem:[#allocation12_spill] sm:$0xff] %v3287_v8 }
  0x5c   : > { %474 = vperm.xlu2 %2693, %v427_v17  }
  0x62   : > { %484 = vperm.xlu1 %2692, %v429_v18   ;;  %2697 = vset.pattern.permute.xlu0 %v3079_v13 }
  0x63   : > { %449 = vperm.xlu0 %2697, %v422_v19  }
  0x64   : > { %2694 = vset.pattern.permute.xlu2 %v3078_v12 }
  0x65   : > { %820 = vperm.xlu2 %2694, %v422_v19  }
  0x6a   : > { %2696 = vset.pattern.permute.xlu1 %v3078_v12 }
  0x6b   : > { %828 = vperm.xlu1 %2696, %v3229_v10   ;;  %454 = vperm.xlu0 %2697, %v423_v11  }
  0x6d   : > { %832 = vperm.xlu2 %2694, %v425_v15  }
  0x73   : > { %836 = vperm.xlu1 %2696, %v426_v14   ;;  %479 = vperm.xlu0 %2697, %v428_v16  }
  0x75   : > { %840 = vperm.xlu2 %2694, %v427_v17  }
  0x7b   : > { %848 = vperm.xlu1 %2696, %v429_v18  }
  0x7d   : > { %2699 = vset.pattern.permute.xlu2 %v3079_v13 }
  0x83   : > { %2698 = vset.pattern.permute.xlu1 %v3079_v13 }
  0xae   : > { %v470_v26 = vpop.permute.xlu2 %469 }
  0xaf   : > { %v492_v51 = vadd.f32 %v487_v21, %v470_v26 }
  0xb1   : > { %v508_v61 = vmul.f32 0.2, %v492_v51  ;;  %vm500_vm7 = vcmp.ge.f32.partialorder %v492_v51, 0.0 }
  0xb3   : > { %v516_v9 = vsel %vm500_vm7, %v492_v51, %v508_v61 }
  0xb4   : > { %v3296_v20 = vadd.f32 %v3284_v3, %v516_v9 }
  0xb6   : > { %v475_v33 = vpop.permute.xlu2 %474 }
  0xb7   : > { %v493_v48 = vadd.f32 %v487_v21, %v475_v33 }
  0xb9   : > { %v509_v59 = vmul.f32 0.2, %v493_v48  ;;  %vm501_vm6 = vcmp.ge.f32.partialorder %v493_v48, 0.0 }
  0xbb   : > { %v517_v6 = vsel %vm501_vm6, %v493_v48, %v509_v59 }
  0xbc   : > { %v3293_v17 = vadd.f32 %v3282_v2, %v517_v6  ;;  %v529_v6 = vld [vmem:[#allocation2 + $0x8] sm:$0xff] }
  0xbf   : > { %v821_v39 = vpop.permute.xlu2 %820 }
  0xc4   : > { %v460_v23 = vpop.permute.xlu1 %459  ;;  %v825_v24 = vpop.permute.xlu0 %824 }
  0xc5   : > { %v490_v25 = vadd.f32 %v487_v21, %v460_v23  ;;  %v853_v4 = vadd.f32 %v3275_v58, %v825_v24  ;;  %v852_v24 = vadd.f32 %v3275_v58, %v821_v39 }
  0xc7   : > { %v506_v28 = vmul.f32 0.2, %v490_v25  ;;  %vm498_vm2 = vcmp.ge.f32.partialorder %v490_v25, 0.0  ;;  %v833_v54 = vpop.permute.xlu2 %832  ;;  %v869_v19 = vmul.f32 0.2, %v853_v4  ;;  %vm861_vm10 = vcmp.ge.f32.partialorder %v853_v4, 0.0 }
  0xc8   : > { %vm860_vm13 = vcmp.ge.f32.partialorder %v852_v24, 0.0 }
  0xc9   : > { %v514_v29 = vsel %vm498_vm2, %v490_v25, %v506_v28  ;;  %v877_v26 = vsel %vm861_vm10, %v853_v4, %v869_v19  ;;  %v3304_v28 = vunpack.c.h.bf16 %v2619_v1  ;;  %vm688_vm2 = vcmask 7168   ;;  %v3347_v1 = vld [vmem:[#allocation2] sm:$0xff]  ;;  %v533_v19 = vld [vmem:[#allocation2 + $0x28] sm:$0xff] }
  0xca   : > { %v3253_v30 = vadd.f32 %v3250_v27, %v514_v29  ;;  %vm1512_vm10 = vcmask 23568  }
  0xcb   : > { %4554 = vst [vmem:[#allocation13_spill] sm:$0xff] %v3304_v28 }
  0xcc   : > { %v3255_v31 = vpop.permute.xlu0 %844  ;;  %540 = vmax.xlane.f32.xlu1 %v3253_v30  ;;  %v465_v32 = vpop.permute.xlu1 %464 }
  0xcd   : > { %v491_v40 = vadd.f32 %v487_v21, %v465_v32 }
  0xcf   : > { %v507_v44 = vmul.f32 0.2, %v491_v40  ;;  %vm499_vm4 = vcmp.ge.f32.partialorder %v491_v40, 0.0  ;;  %v841_v18 = vpop.permute.xlu2 %840 }
  0xd1   : > { %v515_v50 = vsel %vm499_vm4, %v491_v40, %v507_v44  ;;  %vm802_vm4 = vcmask 64512  }
  0xd2   : > { %v3273_v57 = vadd.f32 %v3265_v47, %v515_v50 }
  0xd4   : > { %v485_v37 = vpop.permute.xlu1 %484 }
  0xd5   : > { %v450_v34 = vpop.permute.xlu0 %449  ;;  %v495_v7 = vadd.f32 %v487_v21, %v485_v37 }
  0xd6   : > { %v488_v35 = vadd.f32 %v487_v21, %v450_v34  ;;  %v868_v34 = vmul.f32 0.2, %v852_v24 }
  0xd7   : > { %v511_v22 = vmul.f32 0.2, %v495_v7  ;;  %vm503_vm11 = vcmp.ge.f32.partialorder %v495_v7, 0.0 }
  0xd8   : > { %v504_v41 = vmul.f32 0.2, %v488_v35  ;;  %vm496_vm3 = vcmp.ge.f32.partialorder %v488_v35, 0.0 }
  0xd9   : > { %v519_v32 = vsel %vm503_vm11, %v495_v7, %v511_v22  ;;  %v531_v7 = vld [vmem:[#allocation2 + $0x18] sm:$0xff]  ;;  %v3359_v22 = vld [vmem:[#allocation2 + $0x20] sm:$0xff] }
  0xda   : > { %v512_v42 = vsel %vm496_vm3, %v488_v35, %v504_v41  ;;  %v3310_v35 = vadd.f32 %v3267_v53, %v877_v26  ;;  %v3313_v37 = vadd.f32 %v3304_v28, %v519_v32  ;;  %v855_v41 = vadd.f32 %v3275_v58, %v833_v54 }
  0xdb   : > { %v3262_v43 = vadd.f32 %v3259_v38, %v512_v42  ;;  %v876_v42 = vsel %vm860_vm13, %v852_v24, %v868_v34  ;;  %vm1052_vm3 = vcmask 15368  }
  0xdc   : > { %v3324_v48 = vadd.f32 %v3259_v38, %v876_v42  ;;  %vm863_vm15 = vcmp.ge.f32.partialorder %v855_v41, 0.0 }
  0xdd   : > { %v455_v45 = vpop.permute.xlu0 %454  ;;  %536 = vmax.xlane.f32.xlu2 %v3262_v43  ;;  %v829_v52 = vpop.permute.xlu1 %828 }
  0xde   : > { %v489_v46 = vadd.f32 %v487_v21, %v455_v45  ;;  %v854_v63 = vadd.f32 %v3275_v58, %v829_v52 }
  0xe0   : > { %v505_v49 = vmul.f32 0.2, %v489_v46  ;;  %vm497_vm5 = vcmp.ge.f32.partialorder %v489_v46, 0.0  ;;  %v870_v11 = vmul.f32 0.2, %v854_v63  ;;  %vm862_vm9 = vcmp.ge.f32.partialorder %v854_v63, 0.0 }
  0xe2   : > { %v513_v55 = vsel %vm497_vm5, %v489_v46, %v505_v49  ;;  %v878_v23 = vsel %vm862_vm9, %v854_v63, %v870_v11  ;;  %v871_v49 = vmul.f32 0.2, %v855_v41 }
  0xe3   : > { %v3270_v56 = vadd.f32 %v3267_v53, %v513_v55  ;;  %v3307_v29 = vadd.f32 %v3250_v27, %v878_v23  ;;  %v858_v55 = vadd.f32 %v3275_v58, %v3255_v31 }
  0xe4   : > { %v879_v52 = vsel %vm863_vm15, %v855_v41, %v871_v49 }
  0xe5   : > { %v480_v62 = vpop.permute.xlu0 %479  ;;  %538 = vmax.xlane.f32.xlu0 %v3270_v56  ;;  %542 = vmax.xlane.f32.xlu2 %v3273_v57  ;;  %v837_v15 = vpop.permute.xlu1 %836  ;;  %v3335_v59 = vadd.f32 %v3265_v47, %v879_v52  ;;  %v874_v61 = vmul.f32 0.2, %v858_v55  ;;  %vm866_vm1 = vcmp.ge.f32.partialorder %v858_v55, 0.0 }
  0xe6   : > { %v494_v0 = vadd.f32 %v487_v21, %v480_v62  ;;  %v857_v21 = vadd.f32 %v3275_v58, %v841_v18  ;;  %v856_v25 = vadd.f32 %v3275_v58, %v837_v15  ;;  %v3357_v18 = vld [vmem:[#allocation2 + $0x30] sm:$0xff] }
  0xe7   : > { %v882_v62 = vsel %vm866_vm1, %v858_v55, %v874_v61  ;;  %v3544_v61 = vld [vmem:[%s3192_s9 + $0x28] sm:$0xff]  ;;  %v3548_v55 = vld [vmem:[%s3192_s9 + $0x20] sm:$0xff] }
  0xe8   : > { %v510_v5 = vmul.f32 0.2, %v494_v0  ;;  %vm502_vm8 = vcmp.ge.f32.partialorder %v494_v0, 0.0  ;;  %v873_v33 = vmul.f32 0.2, %v857_v21  ;;  %vm865_vm12 = vcmp.ge.f32.partialorder %v857_v21, 0.0 }
  0xe9   : > { %v872_v36 = vmul.f32 0.2, %v856_v25  ;;  %vm864_vm14 = vcmp.ge.f32.partialorder %v856_v25, 0.0  ;;  %v3343_v63 = vadd.f32 %v3287_v8, %v882_v62 }
  0xea   : > { %v518_v14 = vsel %vm502_vm8, %v494_v0, %v510_v5  ;;  %v881_v40 = vsel %vm865_vm12, %v857_v21, %v873_v33  ;;  %v530_v0 = vld [vmem:[#allocation2 + $0x10] sm:$0xff] }
  0xeb   : > { %v3290_v16 = vadd.f32 %v3287_v8, %v518_v14  ;;  %v880_v45 = vsel %vm864_vm14, %v856_v25, %v872_v36  ;;  %v3321_v46 = vadd.f32 %v3282_v2, %v881_v40  ;;  %v3374_v36 = vld [vmem:[#allocation2 + $0x38] sm:$0xff]  ;;  %v3564_v8 = vld [vmem:[%s3192_s9] sm:$0xff]  ;;  %vm1262_vm14 = vcmask 130112  }
  0xec   : > { %v3327_v50 = vadd.f32 %v3284_v3, %v880_v45 }
  0xed   : > { %548 = vmax.xlane.f32.xlu1 %v3290_v16  ;;  %546 = vmax.xlane.f32.xlu0 %v3293_v17  ;;  %v849_v39 = vpop.permute.xlu1 %848 }
  0xee   : > { %544 = vmax.xlane.f32.xlu2 %v3296_v20  ;;  %v859_v44 = vadd.f32 %v3275_v58, %v849_v39 }
  0xf0   : > { %v875_v51 = vmul.f32 0.2, %v859_v44  ;;  %vm867_vm0 = vcmp.ge.f32.partialorder %v859_v44, 0.0 }
  0xf2   : > { %v883_v54 = vsel %vm867_vm0, %v859_v44, %v875_v51  ;;  %vm1956_vm0 = vcmask 31768  }
  0xf3   : > { %v3338_v60 = vadd.f32 %v3304_v28, %v883_v54 }
  0xf5   : > { %904 = vmax.xlane.f32.xlu1 %v3307_v29  ;;  %902 = vmax.xlane.f32.xlu0 %v3310_v35 }
  0xf6   : > { %550 = vmax.xlane.f32.xlu2 %v3313_v37 }
  0xfd   : > { %910 = vmax.xlane.f32.xlu1 %v3321_v46  ;;  %908 = vmax.xlane.f32.xlu0 %v3327_v50 }
  0xfe   : > { %900 = vmax.xlane.f32.xlu2 %v3324_v48 }
 0x105   : > { %914 = vmax.xlane.f32.xlu0 %v3338_v60 }
 0x106   : > { %906 = vmax.xlane.f32.xlu2 %v3335_v59 }
 0x10e   : > { %912 = vmax.xlane.f32.xlu2 %v3343_v63 }
 0x13f   : > { %v541_v31 = vpop.xlane.xlu1 %540 }
 0x140   : > { %v554_v58 = vmax.f32 %v530_v0, %v541_v31 }
 0x142   : > { %813 = vst.msk [vmem:[#allocation2 + $0x10] sm:$0xff] %vm688_vm2, %v554_v58  ;;  %596 = vperm.xlu2 %2699, %v554_v58   ;;  %v562_v33 = vsub.f32 %v530_v0, %v554_v58 }
 0x144   : > { %v572_v51 = vmul.f32 1.442695, %v562_v33  ;;  %v3560_v33 = vld [vmem:[%s3192_s9 + $0x8] sm:$0xff] }
 0x146   : > { %2835 = vpow2.f32 %v572_v51 }
 0x149   : > { %v3376_v39 = vld [vmem:[#allocation2 + $0x10] sm:$0xff] }
 0x150   : > { %v537_v4 = vpop.xlane.xlu2 %536 }
 0x151   : > { %v3350_v5 = vmax.f32 %v3347_v1, %v537_v4 }
 0x153   : > { %811 = vst.msk [vmem:[#allocation2] sm:$0xff] %vm688_vm2, %v3350_v5  ;;  %586 = vperm.xlu0 %2697, %v3350_v5   ;;  %v560_v31 = vsub.f32 %v3347_v1, %v3350_v5  ;;  %v3552_v5 = vld [vmem:[%s3192_s9 + $0x18] sm:$0xff] }
 0x158   : > { %v539_v9 = vpop.xlane.xlu0 %538  ;;  %v543_v11 = vpop.xlane.xlu2 %542 }
 0x159   : > { %v553_v14 = vmax.f32 %v529_v6, %v539_v9  ;;  %v555_v15 = vmax.f32 %v531_v7, %v543_v11 }
 0x15b   : > { %812 = vst.msk [vmem:[#allocation2 + $0x8] sm:$0xff] %vm688_vm2, %v553_v14  ;;  %591 = vperm.xlu1 %2698, %v553_v14   ;;  %601 = vperm.xlu0 %2697, %v555_v15   ;;  %v561_v34 = vsub.f32 %v529_v6, %v553_v14  ;;  %v563_v62 = vsub.f32 %v531_v7, %v555_v15 }
 0x15c   : > { %814 = vst.msk [vmem:[#allocation2 + $0x18] sm:$0xff] %vm688_vm2, %v555_v15 }
 0x15d   : > { %v570_v54 = vmul.f32 1.442695, %v561_v34  ;;  %v574_v15 = vmul.f32 1.442695, %v563_v62 }
 0x15f   : > { %2837 = vpow2.f32 %v570_v54 }
 0x160   : > { %v549_v21 = vpop.xlane.xlu1 %548  ;;  %v547_v23 = vpop.xlane.xlu0 %546  ;;  %2839 = vpow2.f32 %v574_v15 }
 0x161   : > { %v3362_v24 = vmax.f32 %v3357_v18, %v549_v21  ;;  %v557_v25 = vmax.f32 %v533_v19, %v547_v23  ;;  %v545_v26 = vpop.xlane.xlu2 %544  ;;  %v3416_v21 = vld [vmem:[#allocation2] sm:$0xff] }
 0x162   : > { %v3365_v32 = vmax.f32 %v3359_v22, %v545_v26  ;;  %v3378_v41 = vld [vmem:[#allocation2 + $0x8] sm:$0xff]  ;;  %v568_v26 = vmul.f32 1.442695, %v560_v31  ;;  %v3532_v23 = vld [vmem:[%s3192_s9 + $0x40] sm:$0xff] }
 0x163   : > { %817 = vst.msk [vmem:[#allocation2 + $0x30] sm:$0xff] %vm688_vm2, %v3362_v24  ;;  %616 = vperm.xlu2 %2699, %v3362_v24   ;;  %611 = vperm.xlu0 %2697, %v557_v25   ;;  %v565_v0 = vsub.f32 %v533_v19, %v557_v25  ;;  %v3452_v62 = vld [vmem:[#allocation2 + $0x18] sm:$0xff] }
 0x164   : > { %816 = vst.msk [vmem:[#allocation2 + $0x28] sm:$0xff] %vm688_vm2, %v557_v25  ;;  %606 = vperm.xlu1 %2698, %v3365_v32   ;;  %v3427_v25 = vpop.eup %2835 }
 0x165   : > { %815 = vst.msk [vmem:[#allocation2 + $0x20] sm:$0xff] %vm688_vm2, %v3365_v32  ;;  %v578_v1 = vmul.f32 1.442695, %v565_v0  ;;  %v3435_v34 = vpop.eup %2837 }
 0x166   : > { %4555 = vst [vmem:[#allocation14_spill] sm:$0xff] %v3435_v34 }
 0x167   : > { %2841 = vpow2.f32 %v578_v1 }
 0x168   : > { %v905_v40 = vpop.xlane.xlu1 %904  ;;  %v903_v42 = vpop.xlane.xlu0 %902  ;;  %2843 = vpow2.f32 %v568_v26 }
 0x169   : > { %v3381_v44 = vmax.f32 %v3376_v39, %v905_v40  ;;  %v3384_v45 = vmax.f32 %v3378_v41, %v903_v42  ;;  %v551_v49 = vpop.xlane.xlu2 %550  ;;  %v566_v40 = vsub.f32 %v3357_v18, %v3362_v24  ;;  %v564_v42 = vsub.f32 %v3359_v22, %v3365_v32  ;;  %v3461_v22 = vpop.eup %2839  ;;  %v3555_v32 = vld [vmem:[%s3192_s9 + $0x10] sm:$0xff] }
 0x16a   : > { %v3387_v52 = vmax.f32 %v3374_v36, %v551_v49  ;;  %4556 = vst [vmem:[#allocation15_spill] sm:$0xff] %v3461_v22  ;;  %v3477_v1 = vld [vmem:[#allocation2 + $0x30] sm:$0xff] }
 0x16b   : > { %1273 = vst.msk [vmem:[#allocation2 + $0x10] sm:$0xff] %vm1052_vm3, %v3381_v44  ;;  %2701 = vset.pattern.permute.xlu2 %v3078_v12  ;;  %2702 = vset.pattern.permute.xlu0 %v3078_v12  ;;  %v3406_v4 = vld [vmem:[#allocation2 + $0x28] sm:$0xff]  ;;  %v576_v24 = vmul.f32 1.442695, %v564_v42 }
 0x16c   : > { %1272 = vst.msk [vmem:[#allocation2 + $0x8] sm:$0xff] %vm1052_vm3, %v3384_v45  ;;  %621 = vperm.xlu1 %2698, %v3387_v52   ;;  %955 = vperm.xlu2 %2701, %v3384_v45   ;;  %v3408_v9 = vld [vmem:[#allocation2 + $0x20] sm:$0xff]  ;;  %v567_v15 = vsub.f32 %v3374_v36, %v3387_v52 }
 0x16d   : > { %818 = vst.msk [vmem:[#allocation2 + $0x38] sm:$0xff] %vm688_vm2, %v3387_v52  ;;  %960 = vperm.xlu0 %2702, %v3381_v44   ;;  %v3497_v52 = vld [vmem:[%s3192_s9 + $0x68] sm:$0xff] }
 0x170   : > { %v911_v58 = vpop.xlane.xlu1 %910  ;;  %v909_v6 = vpop.xlane.xlu0 %908 }
 0x171   : > { %v3411_v11 = vmax.f32 %v3406_v4, %v911_v58  ;;  %v3414_v14 = vmax.f32 %v3408_v9, %v909_v6  ;;  %v901_v7 = vpop.xlane.xlu2 %900  ;;  %v580_v58 = vmul.f32 1.442695, %v566_v40  ;;  %v3467_v6 = vpop.eup %2841  ;;  %v3480_v40 = vld [vmem:[%s3192_s9 + $0x78] sm:$0xff] }
 0x172   : > { %v3419_v19 = vmax.f32 %v3416_v21, %v901_v7  ;;  %4557 = vst [vmem:[#allocation16_spill] sm:$0xff] %v3467_v6  ;;  %v3470_v7 = vpop.eup %2843  ;;  %753 = vmatpush.msra.mxu0 %v3480_v40 }
 0x173   : > { %1276 = vst.msk [vmem:[#allocation2 + $0x28] sm:$0xff] %vm1052_vm3, %v3411_v11  ;;  %2845 = vpow2.f32 %v580_v58 }
 0x174   : > { %1275 = vst.msk [vmem:[#allocation2 + $0x20] sm:$0xff] %vm1052_vm3, %v3414_v14  ;;  %2700 = vset.pattern.permute.xlu1 %v3078_v12  ;;  %2705 = vset.pattern.permute.xlu2 %v3079_v13  ;;  %v3447_v51 = vld [vmem:[#allocation2 + $0x38] sm:$0xff]  ;;  %2847 = vpow2.f32 %v576_v24  ;;  %v3506_v24 = vld [vmem:[%s3192_s9 + $0x60] sm:$0xff] }
 0x175   : > { %1271 = vst.msk [vmem:[#allocation2] sm:$0xff] %vm1052_vm3, %v3419_v19  ;;  %2704 = vset.pattern.permute.xlu0 %v3079_v13  ;;  %950 = vperm.xlu1 %2700, %v3419_v19  }
 0x176   : > { %717 = vperm.xlu2 %2705, %v3427_v25   ;;  %712 = vperm.xlu0 %2704, %v3435_v34  }
 0x178   : > { %v915_v49 = vpop.xlane.xlu0 %914 }
 0x179   : > { %v3450_v54 = vmax.f32 %v3447_v51, %v915_v49  ;;  %v907_v0 = vpop.xlane.xlu2 %906  ;;  %v582_v49 = vmul.f32 1.442695, %v567_v15  ;;  %v3494_v36 = vpop.eup %2845  ;;  %v3510_v15 = vld [vmem:[%s3192_s9 + $0x58] sm:$0xff] }
 0x17a   : > { %v3455_v31 = vmax.f32 %v3452_v62, %v907_v0  ;;  %4558 = vst [vmem:[#allocation17_spill] sm:$0xff] %v3494_v36  ;;  %v3499_v58 = vpop.eup %2847  ;;  %v3536_v0 = vld [vmem:[%s3192_s9 + $0x38] sm:$0xff] }
 0x17b   : > { %1278 = vst.msk [vmem:[#allocation2 + $0x38] sm:$0xff] %vm1052_vm3, %v3450_v54  ;;  %2849 = vpow2.f32 %v582_v49  ;;  %v3527_v49 = vld [vmem:[%s3192_s9 + $0x48] sm:$0xff] }
 0x17c   : > { %1274 = vst.msk [vmem:[#allocation2 + $0x18] sm:$0xff] %vm1052_vm3, %v3455_v31 }
 0x17d   : > { %2703 = vset.pattern.permute.xlu1 %v3079_v13  ;;  %v3483_v13 = vld [vmem:[%s3192_s9 + $0x70] sm:$0xff]  ;;  %4559 = vst [vmem:[#allocation18_spill] sm:$0xff] %v3499_v58 }
 0x17e   : > { %732 = vperm.xlu2 %2705, %v3467_v6   ;;  %722 = vperm.xlu0 %2704, %v3461_v22   ;;  %4560 = vst [vmem:[#allocation19_spill] sm:$0xff] %v3510_v15 }
 0x17f   : > { %707 = vperm.xlu1 %2703, %v3470_v7   ;;  %754 = vmatpush.msra.mxu0 %v3483_v13 }
 0x181   : > { %v913_v26 = vpop.xlane.xlu2 %912  ;;  %755 = vmatpush.msra.mxu0 %v3497_v52  ;;  %v3517_v18 = vpop.eup %2849 }
 0x182   : > { %v3486_v42 = vmax.f32 %v3477_v1, %v913_v26  ;;  %v3514_v26 = vld [vmem:[%s3192_s9 + $0x50] sm:$0xff]  ;;  %4562 = vst [vmem:[#allocation21_spill] sm:$0xff] %v3517_v18 }
 0x183   : > { %756 = vmatpush.msra.mxu0 %v3506_v24  ;;  %4561 = vst [vmem:[#allocation20_spill] sm:$0xff] %v3514_v26 }
 0x184   : > { %1277 = vst.msk [vmem:[#allocation2 + $0x30] sm:$0xff] %vm1052_vm3, %v3486_v42 }
 0x185   : > { %757 = vmatpush.msra.mxu0 %v3510_v15 }
 0x186   : > { %2708 = vset.pattern.permute.xlu2 %v3078_v12  ;;  %737 = vperm.xlu0 %2704, %v3494_v36  }
 0x187   : > { %727 = vperm.xlu1 %2703, %v3499_v58   ;;  %975 = vperm.xlu2 %2708, %v3411_v11  }
 0x188   : > { %758 = vmatpush.msra.mxu0 %v3514_v26 }
 0x18a   : > { %759 = vmatpush.msra.mxu0 %v3527_v49 }
 0x18c   : > { %760 = vmatpush.msra.mxu0 %v3532_v23 }
 0x18e   : > { %2707 = vset.pattern.permute.xlu0 %v3078_v12  ;;  %761 = vmatpush.msra.mxu0 %v3536_v0 }
 0x18f   : > { %742 = vperm.xlu1 %2703, %v3517_v18   ;;  %970 = vperm.xlu0 %2707, %v3414_v14  }
 0x197   : > { %2706 = vset.pattern.permute.xlu1 %v3078_v12  ;;  %985 = vperm.xlu0 %2707, %v3450_v54   ;;  %v3539_v12 = vld [vmem:[%s3192_s9 + $0x30] sm:$0xff] }
 0x198   : > { %965 = vperm.xlu1 %2706, %v3455_v31   ;;  %762 = vmatpush.msra.mxu0 %v3539_v12 }
 0x19a   : > { %763 = vmatpush.msra.mxu0 %v3544_v61 }
 0x19c   : > { %764 = vmatpush.msra.mxu0 %v3548_v55  ;;  %v597_v28 = vpop.permute.xlu2 %596 }
 0x19d   : > { %v626_v3 = vsub.f32 %v3253_v30, %v597_v28 }
 0x19e   : > { %765 = vmatpush.msra.mxu0 %v3552_v5 }
 0x19f   : > { %v636_v47 = vmul.f32 1.442695, %v626_v3 }
 0x1a0   : > { %980 = vperm.xlu1 %2706, %v3486_v42   ;;  %766 = vmatpush.msra.mxu0 %v3555_v32 }
 0x1a1   : > { %2851 = vpow2.f32 %v636_v47 }
 0x1a2   : > { %767 = vmatpush.msra.mxu0 %v3560_v33 }
 0x1a4   : > { %768 = vmatpush.msra.mxu0 %v3564_v8 }
 0x1a7   : > { %v2852_v58 = vpop.eup %2851 }
 0x1bd   : > { %v617_v2 = vpop.permute.xlu2 %616 }
 0x1be   : > { %v630_v47 = vsub.f32 %v3290_v16, %v617_v2 }
 0x1c5   : > { %v587_v38 = vpop.permute.xlu0 %586 }
 0x1c6   : > { %v624_v53 = vsub.f32 %v3262_v43, %v587_v38  ;;  %v956_v27 = vpop.permute.xlu2 %955  ;;  %v644_v38 = vmul.f32 1.442695, %v630_v47 }
 0x1c7   : > { %v989_v2 = vsub.f32 %v3310_v35, %v956_v27 }
 0x1c8   : > { %v632_v18 = vmul.f32 1.442695, %v624_v53 }
 0x1c9   : > { %v998_v16 = vmul.f32 1.442695, %v989_v2 }
 0x1ca   : > { %2853 = vpow2.f32 %v632_v18  ;;  %668 = vadd.xlane.f32.xlu1 %v2852_v58 }
 0x1cd   : > { %v592_v36 = vpop.permute.xlu1 %591  ;;  %v602_v6 = vpop.permute.xlu0 %601 }
 0x1ce   : > { %v625_v15 = vsub.f32 %v3270_v56, %v592_v36  ;;  %v627_v26 = vsub.f32 %v3273_v57, %v602_v6 }
 0x1d0   : > { %v2854_v22 = vpop.eup %2853  ;;  %v634_v34 = vmul.f32 1.442695, %v625_v15  ;;  %v638_v30 = vmul.f32 1.442695, %v627_v26  ;;  %v3571_v28 = vpop.permute.xlu2 %717 }
 0x1d1   : > { %769 = vmatmul.f32.vlgmr.msra.gmra.mxu0 %v2854_v22  ;;  %664 = vadd.xlane.f32.xlu0 %v2854_v22 }
 0x1d2   : > { %2855 = vpow2.f32 %v634_v34 }
 0x1d3   : > { %2857 = vpow2.f32 %v638_v30 }
 0x1d4   : > { %2859 = vpow2.f32 %v644_v38 }
 0x1d5   : > { %v612_v43 = vpop.permute.xlu0 %611 }
 0x1d6   : > { %v629_v53 = vsub.f32 %v3293_v17, %v612_v43  ;;  %v607_v3 = vpop.permute.xlu1 %606 }
 0x1d7   : > { %v628_v56 = vsub.f32 %v3296_v20, %v607_v3 }
 0x1d8   : > { %v2856_v18 = vpop.eup %2855  ;;  %v642_v57 = vmul.f32 1.442695, %v629_v53  ;;  %v3576_v6 = vpop.permute.xlu2 %732 }
 0x1d9   : > { %v2858_v36 = vpop.eup %2857  ;;  %v640_v15 = vmul.f32 1.442695, %v628_v56  ;;  %666 = vadd.xlane.f32.xlu2 %v2856_v18  ;;  %772 = vmatmul.f32.gmra.mxu0 %v2856_v18 }
 0x1da   : > { %2861 = vpow2.f32 %v642_v57  ;;  %670 = vadd.xlane.f32.xlu0 %v2858_v36  ;;  %v2860_v17 = vpop.eup %2859 }
 0x1db   : > { %2863 = vpow2.f32 %v640_v15 }
 0x1dc   : > { %2865 = vpow2.f32 %v998_v16 }
 0x1de   : > { %v622_v34 = vpop.permute.xlu1 %621 }
 0x1df   : > { %v631_v22 = vsub.f32 %v3313_v37, %v622_v34  ;;  %v961_v20 = vpop.permute.xlu0 %960  ;;  %v4563_v34 = vsub.f32 %v3416_v21, %v3419_v19 }
 0x1e0   : > { %v2862_v26 = vpop.eup %2861  ;;  %v990_v30 = vsub.f32 %v3307_v29, %v961_v20 }
 0x1e1   : > { %v2864_v47 = vpop.eup %2863  ;;  %v646_v43 = vmul.f32 1.442695, %v631_v22  ;;  %v976_v38 = vpop.permute.xlu2 %975  ;;  %674 = vadd.xlane.f32.xlu1 %v2862_v26  ;;  %775 = vmatmul.f32.gmra.mxu0 %v2852_v58  ;;  %v932_v22 = vmul.f32 1.442695, %v4563_v34  ;;  %v2709_v34 = vpack.i.bf16 %v3560_v33, %v3564_v8  ;;  %v4567_v8 = vsub.f32 %v3378_v41, %v3384_v45 }
 0x1e2   : > { %v1000_v53 = vmul.f32 1.442695, %v990_v30  ;;  %672 = vadd.xlane.f32.xlu2 %v2864_v47  ;;  %676 = vadd.xlane.f32.xlu0 %v2860_v17  ;;  %v993_v27 = vsub.f32 %v3321_v46, %v976_v38  ;;  %v3582_v37 = vpop.eup %2865 }
 0x1e3   : > { %2867 = vpow2.f32 %v646_v43  ;;  %v4564_v43 = vsub.f32 %v3452_v62, %v3455_v31  ;;  %v934_v33 = vmul.f32 1.442695, %v4567_v8  ;;  %v4574_v8 = vld [vmem:[#allocation19_spill] sm:$0xff] }
 0x1e4   : > { %2869 = vpow2.f32 %v1000_v53  ;;  %v1006_v35 = vmul.f32 1.442695, %v993_v27 }
 0x1e5   : > { %v938_v38 = vmul.f32 1.442695, %v4564_v43  ;;  %v2724_v43 = vpack.i.bf16 %v3536_v0, %v3539_v12  ;;  %v4570_v0 = vsub.f32 %v3447_v51, %v3450_v54 }
 0x1e6   : > { %2871 = vpow2.f32 %v1006_v35 }
 0x1e7   : > { %v951_v3 = vpop.permute.xlu1 %950 }
 0x1e8   : > { %v988_v56 = vsub.f32 %v3324_v48, %v951_v3  ;;  %v3585_v29 = vpop.permute.xlu0 %712 }
 0x1e9   : > { %v2868_v18 = vpop.eup %2867  ;;  %778 = vmatmul.f32.gmra.mxu0 %v2858_v36  ;;  %1030 = vadd.xlane.f32.xlu1 %v3582_v37 }
 0x1ea   : > { %v3588_v58 = vpop.eup %2869  ;;  %v996_v57 = vmul.f32 1.442695, %v988_v56  ;;  %678 = vadd.xlane.f32.xlu2 %v2868_v18 }
 0x1eb   : > { %1032 = vadd.xlane.f32.xlu0 %v3588_v58 }
 0x1ec   : > { %2873 = vpow2.f32 %v996_v57  ;;  %v3593_v15 = vpop.eup %2871 }
 0x1ed   : > { %2875 = vpow2.f32 %v932_v22 }
 0x1f0   : > { %v3591_v46 = vpop.permute.xlu0 %722 }
 0x1f1   : > { %v3595_v2 = vpop.permute.xlu1 %707  ;;  %781 = vmatmul.f32.gmra.mxu0 %v2864_v47 }
 0x1f2   : > { %v3597_v48 = vpop.eup %2873 }
 0x1f3   : > { %1028 = vadd.xlane.f32.xlu2 %v3597_v48  ;;  %1038 = vadd.xlane.f32.xlu0 %v3593_v15  ;;  %v3614_v27 = vpop.eup %2875 }
 0x1f8   : > { %v3601_v36 = vpop.permute.xlu0 %737 }
 0x1f9   : > { %v3603_v16 = vpop.permute.xlu1 %727  ;;  %784 = vmatmul.f32.gmra.mxu0 %v2862_v26 }
 0x201   : > { %v3608_v20 = vpop.permute.xlu1 %742  ;;  %v971_v30 = vpop.permute.xlu0 %970  ;;  %787 = vmatmul.f32.gmra.mxu0 %v2860_v17 }
 0x202   : > { %v992_v47 = vsub.f32 %v3327_v50, %v971_v30  ;;  %v4565_v50 = vsub.f32 %v3406_v4, %v3411_v11  ;;  %v4566_v30 = vsub.f32 %v3376_v39, %v3381_v44  ;;  %v4569_v39 = vsub.f32 %v3408_v9, %v3414_v14 }
 0x203   : > { %v946_v9 = vmul.f32 1.442695, %v4570_v0 }
 0x204   : > { %v1004_v53 = vmul.f32 1.442695, %v992_v47  ;;  %v942_v62 = vmul.f32 1.442695, %v4565_v50  ;;  %v936_v47 = vmul.f32 1.442695, %v4566_v30 }
 0x205   : > { %v940_v41 = vmul.f32 1.442695, %v4569_v39  ;;  %v697_v50 = vld [vmem:[#allocation4] sm:$0xff]  ;;  %v4576_v39 = vld [vmem:[#allocation17_spill] sm:$0xff] }
 0x206   : > { %2877 = vpow2.f32 %v1004_v53 }
 0x207   : > { %1071 = vperm.xlu0 %2707, %v3614_v27   ;;  %2879 = vpow2.f32 %v938_v38  ;;  %v4568_v38 = vsub.f32 %v3477_v1, %v3486_v42  ;;  %v650_v1 = vld [vmem:[#allocation3 + $0x10] sm:$0xff]  ;;  %v2714_v42 = vpack.i.bf16 %v3552_v5, %v3555_v32  ;;  %v2729_v5 = vpack.i.bf16 %v3527_v49, %v3532_v23 }
 0x208   : > { %v658_v14 = vmul.f32 %v3427_v25, %v650_v1  ;;  %v2719_v23 = vpack.i.bf16 %v3544_v61, %v3548_v55  ;;  %v653_v55 = vld [vmem:[#allocation3 + $0x28] sm:$0xff]  ;;  %v654_v61 = vld [vmem:[#allocation3 + $0x30] sm:$0xff]  ;;  %v4577_v1 = vld [vmem:[#allocation18_spill] sm:$0xff] }
 0x209   : > { %v986_v21 = vpop.permute.xlu0 %985  ;;  %790 = vmatmul.f32.gmra.mxu0 %v2868_v18  ;;  %v944_v53 = vmul.f32 1.442695, %v4568_v38  ;;  %v4575_v38 = vld [vmem:[#allocation16_spill] sm:$0xff] }
 0x20a   : > { %v995_v19 = vsub.f32 %v3338_v60, %v986_v21  ;;  %v966_v26 = vpop.permute.xlu1 %965  ;;  %v2739_v21 = vpack.i.bf16 %v3497_v52, %v3506_v24 }
 0x20b   : > { %v991_v17 = vsub.f32 %v3335_v59, %v966_v26  ;;  %v649_v26 = vld [vmem:[#allocation3 + $0x8] sm:$0xff] }
 0x20c   : > { %v3619_v35 = vpop.eup %2877  ;;  %v1010_v31 = vmul.f32 1.442695, %v995_v19 }
 0x20d   : > { %v1002_v3 = vmul.f32 1.442695, %v991_v17  ;;  %1036 = vadd.xlane.f32.xlu1 %v3619_v35  ;;  %v3625_v56 = vpop.eup %2879  ;;  %v651_v17 = vld [vmem:[#allocation3 + $0x18] sm:$0xff] }
 0x20e   : > { %2881 = vpow2.f32 %v1010_v31  ;;  %v4572_v31 = vld [vmem:[#allocation15_spill] sm:$0xff] }
 0x20f   : > { %2883 = vpow2.f32 %v1002_v3  ;;  %1086 = vperm.xlu0 %2707, %v3625_v56   ;;  %v659_v3 = vmul.f32 %v4572_v31, %v651_v17 }
 0x210   : > { %2885 = vpow2.f32 %v942_v62  ;;  %v2744_v62 = vpack.i.bf16 %v3480_v40, %v3483_v13  ;;  %v652_v13 = vld [vmem:[#allocation3 + $0x20] sm:$0xff] }
 0x212   : > { %v981_v60 = vpop.permute.xlu1 %980 }
 0x213   : > { %v994_v59 = vsub.f32 %v3343_v63, %v981_v60  ;;  %v3081_v63 = vmov 2  }
 0x214   : > { %v3629_v18 = vpop.eup %2881 }
 0x215   : > { %v3631_v57 = vpop.eup %2883  ;;  %v1008_v4 = vmul.f32 1.442695, %v994_v59  ;;  %1042 = vadd.xlane.f32.xlu1 %v3629_v18  ;;  %v745_v59 = vmul.f32 %v3595_v2, %v697_v50  ;;  %v698_v2 = vld [vmem:[#allocation4 + $0x8] sm:$0xff] }
 0x216   : > { %v3634_v11 = vpop.eup %2885  ;;  %1034 = vadd.xlane.f32.xlu2 %v3631_v57 }
 0x217   : > { %2887 = vpow2.f32 %v1008_v4  ;;  %1096 = vperm.xlu0 %2707, %v3634_v11  }
 0x218   : > { %2889 = vpow2.f32 %v936_v47 }
 0x219   : > { %2891 = vpow2.f32 %v934_v33 }
 0x21a   : > { %2893 = vpow2.f32 %v944_v53  ;;  %v661_v53 = vmul.f32 %v4575_v38, %v653_v55 }
 0x21b   : > { %2895 = vpow2.f32 %v940_v41  ;;  %v662_v41 = vmul.f32 %v4576_v39, %v654_v61  ;;  %v701_v39 = vld [vmem:[#allocation4 + $0x20] sm:$0xff] }
 0x21c   : > { %2897 = vpow2.f32 %v946_v9 }
 0x21d   : > { %v3640_v22 = vpop.eup %2887 }
 0x21e   : > { %1040 = vadd.xlane.f32.xlu2 %v3640_v22  ;;  %v3658_v19 = vpop.eup %2889 }
 0x21f   : > { %2710 = vrot.lane.b32.xlu0 %v2709_v34, %s3080_s27  ;;  %v3665_v44 = vpop.eup %2891 }
 0x220   : > { %2751 = vset.pattern.permute.xlu0 %v3081_v63  ;;  %v3667_v45 = vpop.eup %2893 }
 0x221   : > { %v3678_v52 = vpop.eup %2895 }
 0x222   : > { %v3686_v25 = vpop.eup %2897 }
 0x227   : > { %2725 = vrot.lane.b32.xlu0 %v2724_v43, %s3080_s27  ;;  %v4573_v43 = vld [vmem:[#allocation20_spill] sm:$0xff] }
 0x228   : > { %v2734_v33 = vpack.i.bf16 %v4574_v8, %v4573_v43 }
 0x22e   : > { %1081 = vperm.xlu1 %2706, %v3658_v19  }
 0x22f   : > { %2740 = vrot.lane.b32.xlu0 %v2739_v21, %s3080_s27 }
 0x236   : > { %1076 = vperm.xlu2 %2708, %v3665_v44   ;;  %1101 = vperm.xlu1 %2706, %v3667_v45  }
 0x237   : > { %1288 = vperm.xlu0 %2751, %v3229_v10   ;;  %v648_v10 = vld [vmem:[#allocation3] sm:$0xff] }
 0x238   : > { %v656_v51 = vmul.f32 %v3470_v7, %v648_v10  ;;  %v4571_v7 = vld [vmem:[#allocation14_spill] sm:$0xff] }
 0x239   : > { %v657_v49 = vmul.f32 %v4571_v7, %v649_v26  ;;  %v3710_v10 = vld [vmem:[%s3202_s16] sm:$0xff] }
 0x23d   : > { %v669_v24 = vpop.xlane.xlu1 %668 }
 0x23e   : > { %v682_v12 = vadd.f32 %v669_v24, %v658_v14  ;;  %1091 = vperm.xlu2 %2708, %v3678_v52   ;;  %2715 = vrot.lane.b32.xlu1 %v2714_v42, %s3080_s27  ;;  %v660_v42 = vmul.f32 %v4577_v1, %v652_v13 }
 0x23f   : > { %2749 = vset.pattern.permute.xlu1 %v3081_v63 }
 0x240   : > { %691 = vst.msk [vmem:[#allocation3 + $0x10] sm:$0xff] %vm688_vm2, %v682_v12 }
 0x244   : > { %v665_v54 = vpop.xlane.xlu0 %664 }
 0x245   : > { %v680_v32 = vadd.f32 %v665_v54, %v656_v51 }
 0x246   : > { %1106 = vperm.xlu2 %2708, %v3686_v25   ;;  %2730 = vrot.lane.b32.xlu1 %v2729_v5, %s3080_s27 }
 0x247   : > { %689 = vst.msk [vmem:[#allocation3] sm:$0xff] %vm688_vm2, %v680_v32  ;;  %v699_v32 = vld [vmem:[#allocation4 + $0x10] sm:$0xff] }
 0x248   : > { %v1014_v26 = vld [vmem:[#allocation3 + $0x10] sm:$0xff]  ;;  %v747_v7 = vmul.f32 %v3571_v28, %v699_v32 }
 0x24c   : > { %v667_v60 = vpop.xlane.xlu2 %666 }
 0x24d   : > { %v671_v4 = vpop.xlane.xlu0 %670  ;;  %v681_v34 = vadd.f32 %v667_v60, %v657_v49 }
 0x24e   : > { %v683_v30 = vadd.f32 %v671_v4, %v659_v3  ;;  %2745 = vrot.lane.b32.xlu1 %v2744_v62, %s3080_s27  ;;  %v770_v47 = vpop.f32.mrf.mxu0  ;;  %2720 = vrot.lane.b32.xlu2 %v2719_v23, %s3080_s27  ;;  %v4578_v62 = vld [vmem:[#allocation21_spill] sm:$0xff]  ;;  %v1022_v3 = vmul.f32 %v3658_v19, %v1014_v26 }
 0x24f   : > { %690 = vst.msk [vmem:[#allocation3 + $0x8] sm:$0xff] %vm688_vm2, %v681_v34  ;;  %v794_v40 = vadd.f32 %v770_v47, %v745_v59  ;;  %2750 = vset.pattern.permute.xlu2 %v3081_v63  ;;  %v746_v63 = vmul.f32 %v3585_v29, %v698_v2  ;;  %v655_v29 = vld [vmem:[#allocation3 + $0x38] sm:$0xff]  ;;  %v1012_v47 = vld [vmem:[#allocation3] sm:$0xff]  ;;  %v3738_v2 = vld [vmem:[%s3202_s16 + $0x28] sm:$0xff] }
 0x250   : > { %692 = vst.msk [vmem:[#allocation3 + $0x18] sm:$0xff] %vm688_vm2, %v683_v30  ;;  %v663_v23 = vmul.f32 %v4578_v62, %v655_v29  ;;  %v3723_v4 = vld [vmem:[%s3202_s16 + $0x18] sm:$0xff]  ;;  %v3727_v30 = vld [vmem:[%s3202_s16 + $0x8] sm:$0xff]  ;;  %v1020_v61 = vmul.f32 %v3614_v27, %v1012_v47  ;;  %v749_v27 = vmul.f32 %v3603_v16, %v701_v39 }
 0x251   : > { %803 = vst.msk [vmem:[#allocation4] sm:$0xff] %vm802_vm4, %v794_v40  ;;  %v700_v40 = vld [vmem:[#allocation4 + $0x18] sm:$0xff] }
 0x252   : > { %v748_v13 = vmul.f32 %v3591_v46, %v700_v40  ;;  %v3775_v40 = vld [vmem:[%s3197_s13] sm:$0xf] }
 0x254   : > { %v675_v21 = vpop.xlane.xlu1 %674 }
 0x255   : > { %v685_v0 = vadd.f32 %v675_v21, %v661_v53  ;;  %v677_v9 = vpop.xlane.xlu0 %676  ;;  %v673_v14 = vpop.xlane.xlu2 %672 }
 0x256   : > { %v686_v24 = vadd.f32 %v677_v9, %v662_v41  ;;  %v684_v12 = vadd.f32 %v673_v14, %v660_v42  ;;  %1280 = vperm.xlu1 %2749, %v3710_v10   ;;  %v773_v5 = vpop.f32.mrf.mxu0  ;;  %2735 = vrot.lane.b32.xlu2 %v2734_v33, %s3080_s27  ;;  %v1013_v54 = vld [vmem:[#allocation3 + $0x8] sm:$0xff]  ;;  %v703_v9 = vld [vmem:[#allocation4 + $0x30] sm:$0xff] }
 0x257   : > { %694 = vst.msk [vmem:[#allocation3 + $0x28] sm:$0xff] %vm688_vm2, %v685_v0  ;;  %v795_v51 = vadd.f32 %v773_v5, %v746_v63  ;;  %v1021_v17 = vmul.f32 %v3665_v44, %v1013_v54  ;;  %v702_v41 = vld [vmem:[#allocation4 + $0x28] sm:$0xff]  ;;  %v1015_v26 = vld [vmem:[#allocation3 + $0x18] sm:$0xff] }
 0x258   : > { %695 = vst.msk [vmem:[#allocation3 + $0x30] sm:$0xff] %vm688_vm2, %v686_v24  ;;  %v750_v1 = vmul.f32 %v3576_v6, %v702_v41  ;;  %v751_v24 = vmul.f32 %v3601_v36, %v703_v9  ;;  %v704_v6 = vld [vmem:[#allocation4 + $0x38] sm:$0xff] }
 0x259   : > { %693 = vst.msk [vmem:[#allocation3 + $0x20] sm:$0xff] %vm688_vm2, %v684_v12 }
 0x25a   : > { %804 = vst.msk [vmem:[#allocation4 + $0x8] sm:$0xff] %vm802_vm4, %v795_v51 }
 0x25c   : > { %v1031_v50 = vpop.xlane.xlu1 %1030 }
 0x25d   : > { %v1045_v49 = vadd.f32 %v1031_v50, %v1021_v17  ;;  %v679_v31 = vpop.xlane.xlu2 %678  ;;  %v752_v17 = vmul.f32 %v3608_v20, %v704_v6 }
 0x25e   : > { %v687_v60 = vadd.f32 %v679_v31, %v663_v23  ;;  %v1033_v59 = vpop.xlane.xlu0 %1032  ;;  %1292 = vperm.xlu1 %2749, %v3723_v4   ;;  %v776_v34 = vpop.f32.mrf.mxu0  ;;  %1284 = vperm.xlu2 %2750, %v3727_v30   ;;  %v1017_v19 = vld [vmem:[#allocation3 + $0x28] sm:$0xff] }
 0x25f   : > { %1054 = vst.msk [vmem:[#allocation3 + $0x8] sm:$0xff] %vm1052_vm3, %v1045_v49  ;;  %v1046_v44 = vadd.f32 %v1033_v59, %v1022_v3  ;;  %v796_v28 = vadd.f32 %v776_v34, %v747_v7  ;;  %v1025_v55 = vmul.f32 %v3634_v11, %v1017_v19  ;;  %v1018_v20 = vld [vmem:[#allocation3 + $0x30] sm:$0xff] }
 0x260   : > { %696 = vst.msk [vmem:[#allocation3 + $0x38] sm:$0xff] %vm688_vm2, %v687_v60  ;;  %v1016_v14 = vld [vmem:[#allocation3 + $0x20] sm:$0xff]  ;;  %v1026_v60 = vmul.f32 %v3667_v45, %v1018_v20 }
 0x261   : > { %1055 = vst.msk [vmem:[#allocation3 + $0x10] sm:$0xff] %vm1052_vm3, %v1046_v44  ;;  %v1024_v16 = vmul.f32 %v3678_v52, %v1016_v14  ;;  %v1023_v52 = vmul.f32 %v3625_v56, %v1015_v26 }
 0x262   : > { %805 = vst.msk [vmem:[#allocation4 + $0x10] sm:$0xff] %vm802_vm4, %v796_v28 }
 0x266   : > { %1300 = vperm.xlu1 %2749, %v3738_v2   ;;  %v1039_v43 = vpop.xlane.xlu0 %1038  ;;  %v1029_v8 = vpop.xlane.xlu2 %1028 }
 0x267   : > { %v1049_v33 = vadd.f32 %v1039_v43, %v1025_v55  ;;  %v1044_v38 = vadd.f32 %v1029_v8, %v1020_v61  ;;  %v779_v53 = vpop.f32.mrf.mxu0  ;;  %v1019_v32 = vld [vmem:[#allocation3 + $0x38] sm:$0xff]  ;;  %v3778_v55 = vperm.slane %v3775_v40, 2 }
 0x268   : > { %v797_v21 = vadd.f32 %v779_v53, %v748_v13  ;;  %v1027_v36 = vmul.f32 %v3686_v25, %v1019_v32 }
 0x269   : > { %1058 = vst.msk [vmem:[#allocation3 + $0x28] sm:$0xff] %vm1052_vm3, %v1049_v33 }
 0x26a   : > { %1053 = vst.msk [vmem:[#allocation3] sm:$0xff] %vm1052_vm3, %v1044_v38  ;;  %v4579_v38 = vld [vmem:[#allocation6_spill] sm:$0xff] }
 0x26b   : > { %806 = vst.msk [vmem:[#allocation4 + $0x18] sm:$0xff] %vm802_vm4, %v797_v21 }
 0x26f   : > { %v782_v46 = vpop.f32.mrf.mxu0 }
 0x270   : > { %v798_v11 = vadd.f32 %v782_v46, %v749_v27 }
 0x272   : > { %807 = vst.msk [vmem:[#allocation4 + $0x20] sm:$0xff] %vm802_vm4, %v798_v11 }
 0x277   : > { %v785_v42 = vpop.f32.mrf.mxu0 }
 0x278   : > { %v799_v63 = vadd.f32 %v785_v42, %v750_v1 }
 0x279   : > { %v3747_v0 = vpop.permute.xlu0 %1071 }
 0x27a   : > { %808 = vst.msk [vmem:[#allocation4 + $0x28] sm:$0xff] %vm802_vm4, %v799_v63 }
 0x27f   : > { %v788_v12 = vpop.f32.mrf.mxu0 }
 0x280   : > { %v800_v5 = vadd.f32 %v788_v12, %v751_v24  ;;  %v1037_v51 = vpop.xlane.xlu1 %1036 }
 0x281   : > { %v1048_v54 = vadd.f32 %v1037_v51, %v1024_v16  ;;  %v3752_v29 = vpop.permute.xlu0 %1086  ;;  %v4580_v16 = vld [vmem:[#allocation9_spill] sm:$0xff] }
 0x282   : > { %809 = vst.msk [vmem:[#allocation4 + $0x30] sm:$0xff] %vm802_vm4, %v800_v5 }
 0x283   : > { %1057 = vst.msk [vmem:[#allocation3 + $0x20] sm:$0xff] %vm1052_vm3, %v1048_v54 }
 0x287   : > { %v791_v50 = vpop.f32.mrf.mxu0 }
 0x288   : > { %v801_v62 = vadd.f32 %v791_v50, %v752_v17  ;;  %v1043_v23 = vpop.xlane.xlu1 %1042 }
 0x289   : > { %v1051_v7 = vadd.f32 %v1043_v23, %v1027_v36  ;;  %v1035_v49 = vpop.xlane.xlu2 %1034  ;;  %v3759_v31 = vpop.permute.xlu0 %1096  ;;  %v4581_v36 = vld [vmem:[#allocation7_spill] sm:$0xff] }
 0x28a   : > { %810 = vst.msk [vmem:[#allocation4 + $0x38] sm:$0xff] %vm802_vm4, %v801_v62  ;;  %v1047_v3 = vadd.f32 %v1035_v49, %v1023_v52 }
 0x28b   : > { %1060 = vst.msk [vmem:[#allocation3 + $0x38] sm:$0xff] %vm1052_vm3, %v1051_v7 }
 0x28c   : > { %1056 = vst.msk [vmem:[#allocation3 + $0x18] sm:$0xff] %vm1052_vm3, %v1047_v3 }
 0x291   : > { %v1041_v25 = vpop.xlane.xlu2 %1040  ;;  %v3765_v59 = vpop.permute.xlu0 %2710 }
 0x292   : > { %v1050_v34 = vadd.f32 %v1041_v25, %v1026_v60 }
 0x294   : > { %1059 = vst.msk [vmem:[#allocation3 + $0x30] sm:$0xff] %vm1052_vm3, %v1050_v34  ;;  %v4582_v34 = vld [vmem:[#allocation8_spill] sm:$0xff] }
 0x299   : > { %v3768_v56 = vpop.permute.xlu2 %1076  ;;  %v2726_v44 = vpop.permute.xlu0 %2725 }
 0x29a   : > { %v2728_v49 = vunpack.i.h.bf16 %v2726_v44  ;;  %v2727_v20 = vunpack.i.l.bf16 %v2726_v44 }
 0x2a0   : > { %v3770_v28 = vpop.permute.xlu1 %1081 }
 0x2a1   : > { %v3772_v19 = vpop.permute.xlu2 %1091  ;;  %v2741_v47 = vpop.permute.xlu0 %2740 }
 0x2a2   : > { %v2743_v9 = vunpack.i.h.bf16 %v2741_v47  ;;  %v2742_v24 = vunpack.i.l.bf16 %v2741_v47 }
 0x2a8   : > { %v3780_v45 = vpop.permute.xlu1 %1101 }
 0x2a9   : > { %v3782_v61 = vpop.permute.xlu2 %1106  ;;  %v1289_v13 = vpop.permute.xlu0 %1288 }
 0x2aa   : > { %v1314_v43 = vadd.f32 %v3778_v55, %v1289_v13 }
 0x2ac   : > { %v1330_v8 = vmul.f32 0.2, %v1314_v43  ;;  %vm1322_vm5 = vcmp.ge.f32.partialorder %v1314_v43, 0.0 }
 0x2ae   : > { %v1338_v33 = vsel %vm1322_vm5, %v1314_v43, %v1330_v8 }
 0x2af   : > { %v3786_v53 = vadd.f32 %v4579_v38, %v1338_v33 }
 0x2b0   : > { %v2716_v21 = vpop.permute.xlu1 %2715 }
 0x2b1   : > { %v2721_v39 = vpop.permute.xlu2 %2720  ;;  %1364 = vmax.xlane.f32.xlu0 %v3786_v53  ;;  %v2718_v33 = vunpack.i.h.bf16 %v2716_v21  ;;  %v2717_v44 = vunpack.i.l.bf16 %v2716_v21  ;;  %v3814_v21 = vld [vmem:[%s3202_s16 + $0x20] sm:$0xff] }
 0x2b2   : > { %v2723_v60 = vunpack.i.h.bf16 %v2721_v39  ;;  %v2722_v13 = vunpack.i.l.bf16 %v2721_v39 }
 0x2b8   : > { %v2731_v27 = vpop.permute.xlu1 %2730 }
 0x2b9   : > { %v2736_v46 = vpop.permute.xlu2 %2735  ;;  %v2733_v17 = vunpack.i.h.bf16 %v2731_v27  ;;  %v2732_v23 = vunpack.i.l.bf16 %v2731_v27 }
 0x2ba   : > { %v2738_v51 = vunpack.i.h.bf16 %v2736_v46  ;;  %v2737_v32 = vunpack.i.l.bf16 %v2736_v46  ;;  %v2713_v46 = vunpack.i.h.bf16 %v3765_v59 }
 0x2c0   : > { %v2746_v11 = vpop.permute.xlu1 %2745 }
 0x2c1   : > { %v1285_v41 = vpop.permute.xlu2 %1284  ;;  %v2748_v1 = vunpack.i.h.bf16 %v2746_v11  ;;  %v2747_v63 = vunpack.i.l.bf16 %v2746_v11 }
 0x2c2   : > { %v1313_v42 = vadd.f32 %v3778_v55, %v1285_v41  ;;  %v4583_v41 = vld [vmem:[#allocation10_spill] sm:$0xff] }
 0x2c3   : > { %1181 = vmatpush.msra.mxu1 %v2748_v1  ;;  %v2712_v1 = vunpack.i.l.bf16 %v3765_v59  ;;  %v3838_v59 = vld [vmem:[#allocation2 + $0x8] sm:$0xff] }
 0x2c4   : > { %v1329_v14 = vmul.f32 0.2, %v1313_v42  ;;  %vm1321_vm6 = vcmp.ge.f32.partialorder %v1313_v42, 0.0 }
 0x2c5   : > { %1182 = vmatpush.msra.mxu1 %v2747_v63  ;;  %v3823_v63 = vld [vmem:[%s3202_s16 + $0x30] sm:$0xff] }
 0x2c6   : > { %v1337_v12 = vsel %vm1321_vm6, %v1313_v42, %v1329_v14  ;;  %v3819_v42 = vld [vmem:[%s3202_s16 + $0x38] sm:$0xff] }
 0x2c7   : > { %1183 = vmatpush.msra.mxu1 %v2743_v9  ;;  %v3791_v5 = vadd.f32 %v4580_v16, %v1337_v12  ;;  %v3854_v14 = vld [vmem:[#allocation2 + $0x18] sm:$0xff] }
 0x2c8   : > { %v1281_v54 = vpop.permute.xlu1 %1280 }
 0x2c9   : > { %v1312_v6 = vadd.f32 %v3778_v55, %v1281_v54  ;;  %1362 = vmax.xlane.f32.xlu2 %v3791_v5  ;;  %1184 = vmatpush.msra.mxu1 %v2742_v24  ;;  %v3863_v54 = vld [vmem:[#allocation2 + $0x28] sm:$0xff] }
 0x2cb   : > { %v1328_v26 = vmul.f32 0.2, %v1312_v6  ;;  %1185 = vmatpush.msra.mxu1 %v2738_v51  ;;  %vm1320_vm7 = vcmp.ge.f32.partialorder %v1312_v6, 0.0 }
 0x2cd   : > { %1186 = vmatpush.msra.mxu1 %v2737_v32  ;;  %v1336_v50 = vsel %vm1320_vm7, %v1312_v6, %v1328_v26 }
 0x2ce   : > { %v3796_v62 = vadd.f32 %v4581_v36, %v1336_v50 }
 0x2cf   : > { %1187 = vmatpush.msra.mxu1 %v2733_v17 }
 0x2d0   : > { %1360 = vmax.xlane.f32.xlu1 %v3796_v62  ;;  %v1293_v52 = vpop.permute.xlu1 %1292 }
 0x2d1   : > { %v1315_v7 = vadd.f32 %v3778_v55, %v1293_v52  ;;  %1188 = vmatpush.msra.mxu1 %v2732_v23 }
 0x2d3   : > { %v1331_v3 = vmul.f32 0.2, %v1315_v7  ;;  %1189 = vmatpush.msra.mxu1 %v2728_v49  ;;  %vm1323_vm8 = vcmp.ge.f32.partialorder %v1315_v7, 0.0 }
 0x2d5   : > { %1190 = vmatpush.msra.mxu1 %v2727_v20  ;;  %v1339_v25 = vsel %vm1323_vm8, %v1315_v7, %v1331_v3  ;;  %v4584_v7 = vld [vmem:[#allocation11_spill] sm:$0xff] }
 0x2d6   : > { %v3801_v47 = vadd.f32 %v4582_v34, %v1339_v25 }
 0x2d7   : > { %1191 = vmatpush.msra.mxu1 %v2723_v60 }
 0x2d8   : > { %v1301_v43 = vpop.permute.xlu1 %1300  ;;  %1366 = vmax.xlane.f32.xlu2 %v3801_v47 }
 0x2d9   : > { %v1317_v8 = vadd.f32 %v3778_v55, %v1301_v43  ;;  %1192 = vmatpush.msra.mxu1 %v2722_v13 }
 0x2db   : > { %v1333_v27 = vmul.f32 0.2, %v1317_v8  ;;  %1193 = vmatpush.msra.mxu1 %v2718_v33  ;;  %vm1325_vm9 = vcmp.ge.f32.partialorder %v1317_v8, 0.0 }
 0x2dd   : > { %1194 = vmatpush.msra.mxu1 %v2717_v44  ;;  %v1341_v11 = vsel %vm1325_vm9, %v1317_v8, %v1333_v27  ;;  %v4585_v8 = vld [vmem:[#allocation13_spill] sm:$0xff]  ;;  %vm1706_vm9 = vcmask 195712  }
 0x2de   : > { %v3807_v39 = vadd.f32 %v4583_v41, %v1341_v11 }
 0x2df   : > { %1195 = vmatpush.msra.mxu1 %v2713_v46 }
 0x2e0   : > { %1370 = vmax.xlane.f32.xlu0 %v3807_v39 }
 0x2e1   : > { %1196 = vmatpush.msra.mxu1 %v2712_v1 }
 0x2e2   : > { %1197 = vmatmul.f32.vlgmr.msra.gmra.mxu1 %v3597_v48 }
 0x2ea   : > { %1200 = vmatmul.f32.gmra.mxu1 %v3582_v37  ;;  %v3831_v37 = vld [vmem:[#allocation2 + $0x10] sm:$0xff] }
 0x2f0   : > { %1296 = vperm.xlu2 %2750, %v3814_v21  }
 0x2f2   : > { %1203 = vmatmul.f32.gmra.mxu1 %v3588_v58 }
 0x2f4   : > { %1308 = vperm.xlu0 %2751, %v3819_v42  }
 0x2f8   : > { %1304 = vperm.xlu2 %2750, %v3823_v63  }
 0x2fa   : > { %1206 = vmatmul.f32.gmra.mxu1 %v3631_v57 }
 0x302   : > { %1209 = vmatmul.f32.gmra.mxu1 %v3619_v35 }
 0x30a   : > { %1212 = vmatmul.f32.gmra.mxu1 %v3593_v15  ;;  %v3845_v15 = vld [vmem:[#allocation2] sm:$0xff] }
 0x312   : > { %1215 = vmatmul.f32.gmra.mxu1 %v3640_v22 }
 0x31a   : > { %1218 = vmatmul.f32.gmra.mxu1 %v3629_v18 }
 0x324   : > { %v1365_v58 = vpop.xlane.xlu0 %1364 }
 0x325   : > { %v3834_v48 = vmax.f32 %v3831_v37, %v1365_v58 }
 0x327   : > { %1717 = vst.msk [vmem:[#allocation2 + $0x10] sm:$0xff] %vm1512_vm10, %v3834_v48 }
 0x33c   : > { %v1363_v57 = vpop.xlane.xlu2 %1362 }
 0x33d   : > { %v3841_v35 = vmax.f32 %v3838_v59, %v1363_v57 }
 0x33f   : > { %1716 = vst.msk [vmem:[#allocation2 + $0x8] sm:$0xff] %vm1512_vm10, %v3841_v35 }
 0x343   : > { %v1361_v18 = vpop.xlane.xlu1 %1360 }
 0x344   : > { %v3848_v22 = vmax.f32 %v3845_v15, %v1361_v18 }
 0x346   : > { %v1384_v9 = vsub.f32 %v3845_v15, %v3848_v22  ;;  %1715 = vst.msk [vmem:[#allocation2] sm:$0xff] %vm1512_vm10, %v3848_v22 }
 0x34b   : > { %v1367_v24 = vpop.xlane.xlu2 %1366 }
 0x34c   : > { %v3857_v12 = vmax.f32 %v3854_v14, %v1367_v24  ;;  %v4586_v24 = vld [vmem:[#allocation12_spill] sm:$0xff] }
 0x34e   : > { %v1387_v51 = vsub.f32 %v3854_v14, %v3857_v12  ;;  %1718 = vst.msk [vmem:[#allocation2 + $0x18] sm:$0xff] %vm1512_vm10, %v3857_v12  ;;  %v1385_v14 = vsub.f32 %v3838_v59, %v3841_v35 }
 0x353   : > { %v1371_v6 = vpop.xlane.xlu0 %1370  ;;  %v1297_v32 = vpop.permute.xlu2 %1296 }
 0x354   : > { %v3866_v26 = vmax.f32 %v3863_v54, %v1371_v6  ;;  %v1316_v17 = vadd.f32 %v3778_v55, %v1297_v32 }
 0x356   : > { %v1389_v50 = vsub.f32 %v3863_v54, %v3866_v26  ;;  %1720 = vst.msk [vmem:[#allocation2 + $0x28] sm:$0xff] %vm1512_vm10, %v3866_v26  ;;  %v1332_v23 = vmul.f32 0.2, %v1316_v17  ;;  %vm1324_vm11 = vcmp.ge.f32.partialorder %v1316_v17, 0.0 }
 0x358   : > { %v1340_v52 = vsel %vm1324_vm11, %v1316_v17, %v1332_v23  ;;  %v1061_v17 = vld [vmem:[#allocation4] sm:$0xff] }
 0x359   : > { %v3874_v49 = vadd.f32 %v4584_v7, %v1340_v52  ;;  %v1109_v23 = vmul.f32 %v3747_v0, %v1061_v17  ;;  %v1062_v0 = vld [vmem:[#allocation4 + $0x8] sm:$0xff] }
 0x35b   : > { %1368 = vmax.xlane.f32.xlu1 %v3874_v49  ;;  %v1305_v46 = vpop.permute.xlu2 %1304 }
 0x35c   : > { %v1318_v11 = vadd.f32 %v3778_v55, %v1305_v46  ;;  %v3914_v46 = vld [vmem:[#allocation2 + $0x38] sm:$0xff] }
 0x35e   : > { %v1334_v58 = vmul.f32 0.2, %v1318_v11  ;;  %vm1326_vm13 = vcmp.ge.f32.partialorder %v1318_v11, 0.0 }
 0x35f   : > { %v1198_v3 = vpop.f32.mrf.mxu1 }
 0x360   : > { %1230 = vrot.lane.b32.xlu2 %v1198_v3, %s3082_s28  ;;  %v1342_v57 = vsel %vm1326_vm13, %v1318_v11, %v1334_v58 }
 0x361   : > { %v3889_v6 = vadd.f32 %v4586_v24, %v1342_v57 }
 0x366   : > { %v1309_v20 = vpop.permute.xlu0 %1308 }
 0x367   : > { %v1319_v60 = vadd.f32 %v3778_v55, %v1309_v20  ;;  %v1201_v25 = vpop.f32.mrf.mxu1  ;;  %v3902_v20 = vld [vmem:[#allocation2 + $0x20] sm:$0xff] }
 0x368   : > { %1232 = vrot.lane.b32.xlu0 %v1201_v25, %s3082_s28 }
 0x369   : > { %v1335_v13 = vmul.f32 0.2, %v1319_v60  ;;  %vm1327_vm12 = vcmp.ge.f32.partialorder %v1319_v60, 0.0 }
 0x36b   : > { %v1343_v43 = vsel %vm1327_vm12, %v1319_v60, %v1335_v13 }
 0x36c   : > { %v3881_v33 = vadd.f32 %v4585_v8, %v1343_v43  ;;  %v1110_v43 = vmul.f32 %v3768_v56, %v1062_v0  ;;  %v1065_v56 = vld [vmem:[#allocation4 + $0x20] sm:$0xff] }
 0x36e   : > { %1374 = vmax.xlane.f32.xlu1 %v3881_v33 }
 0x36f   : > { %v1204_v27 = vpop.f32.mrf.mxu1 }
 0x370   : > { %1410 = vperm.xlu0 %2751, %v3848_v22  }
 0x377   : > { %v1207_v44 = vpop.f32.mrf.mxu1 }
 0x37f   : > { %v1210_v1 = vpop.f32.mrf.mxu1 }
 0x380   : > { %1238 = vrot.lane.b32.xlu0 %v1210_v1, %s3082_s28 }
 0x387   : > { %1234 = vrot.lane.b32.xlu1 %v1204_v27, %s3082_s28  ;;  %v1213_v18 = vpop.f32.mrf.mxu1 }
 0x388   : > { %1425 = vperm.xlu0 %2751, %v3857_v12   ;;  %v1394_v12 = vmul.f32 1.442695, %v1385_v14 }
 0x389   : > { %1372 = vmax.xlane.f32.xlu2 %v3889_v6 }
 0x38f   : > { %1240 = vrot.lane.b32.xlu1 %v1213_v18, %s3082_s28  ;;  %v1216_v32 = vpop.f32.mrf.mxu1 }
 0x390   : > { %1435 = vperm.xlu0 %2751, %v3866_v26  }
 0x397   : > { %1420 = vperm.xlu1 %2749, %v3834_v48   ;;  %v1219_v55 = vpop.f32.mrf.mxu1 }
 0x398   : > { %1244 = vrot.lane.b32.xlu0 %v1219_v55, %s3082_s28  ;;  %v1113_v55 = vmul.f32 %v3772_v19, %v1065_v56 }
 0x3a1   : > { %1236 = vrot.lane.b32.xlu2 %v1207_v44, %s3082_s28 }
 0x3a9   : > { %1415 = vperm.xlu2 %2750, %v3841_v35  }
 0x3b1   : > { %1242 = vrot.lane.b32.xlu2 %v1216_v32, %s3082_s28 }
 0x3ba   : > { %v1231_v52 = vpop.permute.xlu2 %1230 }
 0x3bb   : > { %v1254_v3 = vadd.f32 %v1231_v52, %v1109_v23  ;;  %v1063_v52 = vld [vmem:[#allocation4 + $0x10] sm:$0xff] }
 0x3bd   : > { %1263 = vst.msk [vmem:[#allocation4] sm:$0xff] %vm1262_vm14, %v1254_v3  ;;  %v1111_v3 = vmul.f32 %v3770_v28, %v1063_v52 }
 0x3ce   : > { %v1369_v60 = vpop.xlane.xlu1 %1368 }
 0x3cf   : > { %v3905_v25 = vmax.f32 %v3902_v20, %v1369_v60 }
 0x3d1   : > { %v1388_v13 = vsub.f32 %v3902_v20, %v3905_v25  ;;  %1719 = vst.msk [vmem:[#allocation2 + $0x20] sm:$0xff] %vm1512_vm10, %v3905_v25  ;;  %1430 = vperm.xlu2 %2750, %v3905_v25   ;;  %v1472_v20 = vld [vmem:[#allocation3] sm:$0xff] }
 0x3da   : > { %v1233_v27 = vpop.permute.xlu0 %1232 }
 0x3db   : > { %v1255_v44 = vadd.f32 %v1233_v27, %v1110_v43  ;;  %v3930_v27 = vld [vmem:[#allocation2 + $0x30] sm:$0xff] }
 0x3dd   : > { %1264 = vst.msk [vmem:[#allocation4 + $0x8] sm:$0xff] %vm1262_vm14, %v1255_v44 }
 0x3e1   : > { %v1375_v11 = vpop.xlane.xlu1 %1374 }
 0x3e2   : > { %v3917_v1 = vmax.f32 %v3914_v46, %v1375_v11  ;;  %v1411_v58 = vpop.permute.xlu0 %1410 }
 0x3e3   : > { %v1448_v57 = vsub.f32 %v3796_v62, %v1411_v58  ;;  %v1066_v58 = vld [vmem:[#allocation4 + $0x28] sm:$0xff] }
 0x3e4   : > { %1722 = vst.msk [vmem:[#allocation2 + $0x38] sm:$0xff] %vm1512_vm10, %v3917_v1  ;;  %v1114_v28 = vmul.f32 %v3759_v31, %v1066_v58 }
 0x3e5   : > { %v1456_v18 = vmul.f32 1.442695, %v1448_v57 }
 0x3e7   : > { %2899 = vpow2.f32 %v1456_v18  ;;  %v1064_v18 = vld [vmem:[#allocation4 + $0x18] sm:$0xff] }
 0x3ed   : > { %v3922_v32 = vpop.eup %2899 }
 0x3ee   : > { %1488 = vadd.xlane.f32.xlu0 %v3922_v32 }
 0x3f2   : > { %v1239_v17 = vpop.permute.xlu0 %1238 }
 0x3f3   : > { %v1258_v23 = vadd.f32 %v1239_v17, %v1113_v55  ;;  %v1112_v17 = vmul.f32 %v3752_v29, %v1064_v18 }
 0x3f5   : > { %1267 = vst.msk [vmem:[#allocation4 + $0x20] sm:$0xff] %vm1262_vm14, %v1258_v23 }
 0x3f9   : > { %v1235_v62 = vpop.permute.xlu1 %1234 }
 0x3fa   : > { %v1256_v60 = vadd.f32 %v1235_v62, %v1111_v3  ;;  %v1426_v0 = vpop.permute.xlu0 %1425  ;;  %v1068_v62 = vld [vmem:[#allocation4 + $0x38] sm:$0xff] }
 0x3fb   : > { %v1451_v43 = vsub.f32 %v3801_v47, %v1426_v0 }
 0x3fc   : > { %1265 = vst.msk [vmem:[#allocation4 + $0x10] sm:$0xff] %vm1262_vm14, %v1256_v60  ;;  %v1373_v44 = vpop.xlane.xlu2 %1372  ;;  %v1116_v60 = vmul.f32 %v3782_v61, %v1068_v62 }
 0x3fd   : > { %v1462_v11 = vmul.f32 1.442695, %v1451_v43  ;;  %v3933_v19 = vmax.f32 %v3930_v27, %v1373_v44 }
 0x3ff   : > { %2901 = vpow2.f32 %v1462_v11  ;;  %v1390_v57 = vsub.f32 %v3930_v27, %v3933_v19  ;;  %1721 = vst.msk [vmem:[#allocation2 + $0x30] sm:$0xff] %vm1512_vm10, %v3933_v19  ;;  %1440 = vperm.xlu1 %2749, %v3933_v19   ;;  %v4016_v19 = vld [vmem:[%s3192_s9 + $0x10] sm:$0xff] }
 0x401   : > { %v1241_v47 = vpop.permute.xlu1 %1240  ;;  %v1404_v35 = vmul.f32 1.442695, %v1390_v57 }
 0x402   : > { %v1259_v56 = vadd.f32 %v1241_v47, %v1114_v28  ;;  %v1436_v55 = vpop.permute.xlu0 %1435  ;;  %v1067_v28 = vld [vmem:[#allocation4 + $0x30] sm:$0xff] }
 0x403   : > { %v1453_v58 = vsub.f32 %v3807_v39, %v1436_v55  ;;  %v1115_v18 = vmul.f32 %v3780_v45, %v1067_v28  ;;  %v1386_v28 = vsub.f32 %v3831_v37, %v3834_v48  ;;  %v1402_v37 = vmul.f32 1.442695, %v1389_v50  ;;  %v1473_v50 = vld [vmem:[#allocation3 + $0x8] sm:$0xff] }
 0x404   : > { %1268 = vst.msk [vmem:[#allocation4 + $0x28] sm:$0xff] %vm1262_vm14, %v1259_v56  ;;  %v1237_v23 = vpop.permute.xlu2 %1236 }
 0x405   : > { %v3943_v52 = vpop.eup %2901  ;;  %v1257_v3 = vadd.f32 %v1237_v23, %v1112_v17  ;;  %v1466_v47 = vmul.f32 1.442695, %v1453_v58 }
 0x406   : > { %1494 = vadd.xlane.f32.xlu0 %v3943_v52 }
 0x407   : > { %1266 = vst.msk [vmem:[#allocation4 + $0x18] sm:$0xff] %vm1262_vm14, %v1257_v3 }
 0x409   : > { %v1421_v31 = vpop.permute.xlu1 %1420 }
 0x40a   : > { %v1450_v0 = vsub.f32 %v3786_v53, %v1421_v31  ;;  %v1245_v43 = vpop.permute.xlu0 %1244  ;;  %v1400_v31 = vmul.f32 1.442695, %v1388_v13 }
 0x40b   : > { %v1261_v44 = vadd.f32 %v1245_v43, %v1116_v60  ;;  %v1392_v60 = vmul.f32 1.442695, %v1384_v9  ;;  %v3083_v9 = vmov 3  }
 0x40c   : > { %v1460_v11 = vmul.f32 1.442695, %v1450_v0  ;;  %v1416_v29 = vpop.permute.xlu2 %1415 }
 0x40d   : > { %1270 = vst.msk [vmem:[#allocation4 + $0x38] sm:$0xff] %vm1262_vm14, %v1261_v44  ;;  %v1449_v53 = vsub.f32 %v3791_v5, %v1416_v29 }
 0x40e   : > { %2903 = vpow2.f32 %v1460_v11 }
 0x40f   : > { %2905 = vpow2.f32 %v1466_v47  ;;  %v1458_v39 = vmul.f32 1.442695, %v1449_v53 }
 0x411   : > { %2907 = vpow2.f32 %v1458_v39 }
 0x414   : > { %v3952_v56 = vpop.eup %2903  ;;  %v1243_v17 = vpop.permute.xlu2 %1242 }
 0x415   : > { %v1260_v61 = vadd.f32 %v1243_v17, %v1115_v18  ;;  %1492 = vadd.xlane.f32.xlu2 %v3952_v56  ;;  %v3957_v23 = vpop.eup %2905  ;;  %v1396_v17 = vmul.f32 1.442695, %v1386_v28 }
 0x417   : > { %1269 = vst.msk [vmem:[#allocation4 + $0x30] sm:$0xff] %vm1262_vm14, %v1260_v61  ;;  %v3960_v55 = vpop.eup %2907 }
 0x41d   : > { %1498 = vadd.xlane.f32.xlu2 %v3957_v23 }
 0x429   : > { %1490 = vadd.xlane.f32.xlu1 %v3960_v55 }
 0x42b   : > { %v1431_v45 = vpop.permute.xlu2 %1430 }
 0x42c   : > { %v1452_v3 = vsub.f32 %v3874_v49, %v1431_v45  ;;  %v1391_v49 = vsub.f32 %v3914_v46, %v3917_v1  ;;  %v1398_v46 = vmul.f32 1.442695, %v1387_v51  ;;  %v1474_v51 = vld [vmem:[#allocation3 + $0x10] sm:$0xff] }
 0x42e   : > { %v1464_v62 = vmul.f32 1.442695, %v1452_v3  ;;  %v1406_v43 = vmul.f32 1.442695, %v1391_v49 }
 0x430   : > { %2909 = vpow2.f32 %v1464_v62  ;;  %v1477_v62 = vld [vmem:[#allocation3 + $0x28] sm:$0xff] }
 0x431   : > { %2911 = vpow2.f32 %v1392_v60 }
 0x432   : > { %2913 = vpow2.f32 %v1400_v31 }
 0x433   : > { %2915 = vpow2.f32 %v1406_v43 }
 0x434   : > { %2917 = vpow2.f32 %v1398_v46  ;;  %v1476_v46 = vld [vmem:[#allocation3 + $0x20] sm:$0xff] }
 0x435   : > { %1445 = vperm.xlu2 %2750, %v3917_v1  }
 0x436   : > { %v3968_v5 = vpop.eup %2909 }
 0x437   : > { %1496 = vadd.xlane.f32.xlu1 %v3968_v5  ;;  %v2912_v0 = vpop.eup %2911 }
 0x438   : > { %v3976_v15 = vpop.eup %2913  ;;  %v1480_v25 = vmul.f32 %v2912_v0, %v1472_v20 }
 0x439   : > { %v3979_v22 = vpop.eup %2915 }
 0x43a   : > { %v2918_v58 = vpop.eup %2917 }
 0x43d   : > { %1531 = vperm.xlu2 %2750, %v2912_v0  }
 0x445   : > { %1551 = vperm.xlu2 %2750, %v3976_v15  }
 0x44d   : > { %1566 = vperm.xlu2 %2750, %v3979_v22  }
 0x455   : > { %2762 = vset.pattern.permute.xlu2 %v3083_v9 }
 0x456   : > { %1724 = vperm.xlu2 %2762, %v3710_v10   ;;  %v1475_v10 = vld [vmem:[#allocation3 + $0x18] sm:$0xff] }
 0x457   : > { %v1483_v47 = vmul.f32 %v2918_v58, %v1475_v10  ;;  %v4029_v10 = vperm.slane %v3775_v40, 3 }
 0x461   : > { %v1489_v13 = vpop.xlane.xlu0 %1488 }
 0x462   : > { %v1504_v44 = vadd.f32 %v1489_v13, %v1480_v25 }
 0x464   : > { %1513 = vst.msk [vmem:[#allocation3] sm:$0xff] %vm1512_vm10, %v1504_v44 }
 0x471   : > { %v1441_v1 = vpop.permute.xlu1 %1440 }
 0x472   : > { %v1454_v11 = vsub.f32 %v3889_v6, %v1441_v1  ;;  %v1484_v1 = vmul.f32 %v3976_v15, %v1476_v46 }
 0x474   : > { %v1468_v29 = vmul.f32 1.442695, %v1454_v11 }
 0x476   : > { %2919 = vpow2.f32 %v1468_v29 }
 0x477   : > { %2921 = vpow2.f32 %v1396_v17  ;;  %v4033_v17 = vld [vmem:[%s3192_s9 + $0x8] sm:$0xff] }
 0x478   : > { %2923 = vpow2.f32 %v1402_v37 }
 0x479   : > { %v1495_v18 = vpop.xlane.xlu0 %1494  ;;  %2925 = vpow2.f32 %v1394_v12  ;;  %v1478_v12 = vld [vmem:[#allocation3 + $0x30] sm:$0xff] }
 0x47a   : > { %v1507_v61 = vadd.f32 %v1495_v18, %v1483_v47  ;;  %2927 = vpow2.f32 %v1404_v35  ;;  %v2981_v35 = vld [vmem:[%s3192_s9 + $0x60] sm:$0xff] }
 0x47c   : > { %v3991_v53 = vpop.eup %2919  ;;  %1516 = vst.msk [vmem:[#allocation3 + $0x18] sm:$0xff] %vm1512_vm10, %v1507_v61  ;;  %v4036_v61 = vld [vmem:[%s3192_s9] sm:$0xff] }
 0x47d   : > { %1500 = vadd.xlane.f32.xlu0 %v3991_v53  ;;  %v2922_v48 = vpop.eup %2921  ;;  %v2752_v14 = vpack.i.bf16 %v4033_v17, %v4036_v61 }
 0x47e   : > { %v1482_v6 = vmul.f32 %v2922_v48, %v1474_v51  ;;  %v2924_v3 = vpop.eup %2923 }
 0x47f   : > { %v1485_v60 = vmul.f32 %v2924_v3, %v1477_v62  ;;  %v2926_v31 = vpop.eup %2925 }
 0x480   : > { %v1481_v43 = vmul.f32 %v2926_v31, %v1473_v50  ;;  %v2928_v13 = vpop.eup %2927 }
 0x481   : > { %v1486_v51 = vmul.f32 %v2928_v13, %v1478_v12 }
 0x488   : > { %v1493_v39 = vpop.xlane.xlu2 %1492 }
 0x489   : > { %v1506_v45 = vadd.f32 %v1493_v39, %v1482_v6 }
 0x48b   : > { %1515 = vst.msk [vmem:[#allocation3 + $0x10] sm:$0xff] %vm1512_vm10, %v1506_v45  ;;  %v4050_v45 = vld [vmem:[%s3192_s9 + $0x28] sm:$0xff] }
 0x490   : > { %v1499_v0 = vpop.xlane.xlu2 %1498 }
 0x491   : > { %v1509_v59 = vadd.f32 %v1499_v0, %v1485_v60  ;;  %1536 = vperm.xlu0 %2751, %v2926_v31   ;;  %v1479_v60 = vld [vmem:[#allocation3 + $0x38] sm:$0xff] }
 0x492   : > { %v1487_v31 = vmul.f32 %v3979_v22, %v1479_v60 }
 0x493   : > { %1518 = vst.msk [vmem:[#allocation3 + $0x28] sm:$0xff] %vm1512_vm10, %v1509_v59  ;;  %v2980_v59 = vld [vmem:[%s3192_s9 + $0x68] sm:$0xff] }
 0x498   : > { %v1446_v54 = vpop.permute.xlu2 %1445 }
 0x499   : > { %v1455_v26 = vsub.f32 %v3881_v33, %v1446_v54  ;;  %1546 = vperm.xlu0 %2751, %v2918_v58   ;;  %v4013_v33 = vld [vmem:[%s3192_s9 + $0x18] sm:$0xff]  ;;  %v2775_v54 = vpack.i.bf16 %v2981_v35, %v2980_v59 }
 0x49a   : > { %v2757_v57 = vpack.i.bf16 %v4013_v33, %v4016_v19 }
 0x49b   : > { %v1470_v49 = vmul.f32 1.442695, %v1455_v26 }
 0x49c   : > { %v1491_v20 = vpop.xlane.xlu1 %1490 }
 0x49d   : > { %2929 = vpow2.f32 %v1470_v49  ;;  %v1505_v25 = vadd.f32 %v1491_v20, %v1481_v43 }
 0x49f   : > { %1514 = vst.msk [vmem:[#allocation3 + $0x8] sm:$0xff] %vm1512_vm10, %v1505_v25 }
 0x4a0   : > { %v4010_v27 = vpop.permute.xlu2 %1531 }
 0x4a1   : > { %1561 = vperm.xlu0 %2751, %v2928_v13  }
 0x4a3   : > { %v4007_v44 = vpop.eup %2929 }
 0x4a4   : > { %1502 = vadd.xlane.f32.xlu1 %v4007_v44 }
 0x4a8   : > { %v4024_v58 = vpop.permute.xlu2 %1551 }
 0x4a9   : > { %2758 = vrot.lane.b32.xlu0 %v2757_v57, %s3084_s30  ;;  %v4080_v57 = vld [vmem:[#allocation2] sm:$0xff] }
 0x4aa   : > { %v1497_v11 = vpop.xlane.xlu1 %1496  ;;  %2769 = vset.pattern.permute.xlu0 %v3083_v9 }
 0x4ab   : > { %v1508_v29 = vadd.f32 %v1497_v11, %v1484_v1 }
 0x4ad   : > { %1517 = vst.msk [vmem:[#allocation3 + $0x20] sm:$0xff] %vm1512_vm10, %v1508_v29 }
 0x4b0   : > { %v4026_v28 = vpop.permute.xlu2 %1566 }
 0x4b8   : > { %v1725_v47 = vpop.permute.xlu2 %1724 }
 0x4b9   : > { %v1756_v18 = vadd.f32 %v4029_v10, %v1725_v47 }
 0x4bb   : > { %v1772_v15 = vmul.f32 0.2, %v1756_v18  ;;  %vm1764_vm15 = vcmp.ge.f32.partialorder %v1756_v18, 0.0 }
 0x4bd   : > { %1541 = vperm.xlu1 %2749, %v2922_v48   ;;  %v1780_v37 = vsel %vm1764_vm15, %v1756_v18, %v1772_v15  ;;  %v2975_v48 = vld [vmem:[%s3202_s16 + $0x10] sm:$0xff] }
 0x4be   : > { %v4043_v40 = vadd.f32 %v4581_v36, %v1780_v37  ;;  %v2983_v37 = vld [vmem:[%s3192_s9 + $0x50] sm:$0xff] }
 0x4c5   : > { %1556 = vperm.xlu1 %2749, %v2924_v3   ;;  %v2979_v3 = vld [vmem:[%s3192_s9 + $0x70] sm:$0xff] }
 0x4cd   : > { %2753 = vrot.lane.b32.xlu1 %v2752_v14, %s3084_s30  ;;  %v2982_v14 = vld [vmem:[%s3192_s9 + $0x58] sm:$0xff] }
 0x4ce   : > { %2763 = vset.pattern.permute.xlu1 %v3083_v9  ;;  %v4053_v9 = vld [vmem:[%s3192_s9 + $0x20] sm:$0xff] }
 0x4cf   : > { %v2764_v36 = vpack.i.bf16 %v4050_v45, %v4053_v9 }
 0x4d1   : > { %2765 = vrot.lane.b32.xlu2 %v2764_v36, %s3084_s30 }
 0x4d3   : > { %1804 = vmax.xlane.f32.xlu0 %v4043_v40 }
 0x4d5   : > { %1728 = vperm.xlu1 %2763, %v3727_v30   ;;  %v2978_v30 = vld [vmem:[%s3192_s9 + $0x78] sm:$0xff] }
 0x4d6   : > { %v2770_v62 = vpack.i.bf16 %v2979_v3, %v2978_v30 }
 0x4d9   : > { %2771 = vrot.lane.b32.xlu2 %v2770_v62, %s3084_s30 }
 0x4e1   : > { %2776 = vrot.lane.b32.xlu2 %v2775_v54, %s3084_s30 }
 0x4e7   : > { %1732 = vperm.xlu0 %2769, %v2975_v48   ;;  %v2780_v48 = vpack.i.bf16 %v2983_v37, %v2982_v14 }
 0x4ef   : > { %2781 = vrot.lane.b32.xlu0 %v2780_v48, %s3084_s30 }
 0x4f0   : > { %v1501_v6 = vpop.xlane.xlu0 %1500 }
 0x4f1   : > { %v1510_v39 = vadd.f32 %v1501_v6, %v1486_v51 }
 0x4f3   : > { %1519 = vst.msk [vmem:[#allocation3 + $0x30] sm:$0xff] %vm1512_vm10, %v1510_v39 }
 0x4f7   : > { %2791 = vrot.lane.b32.xlu0 %v2770_v62, %s3085_s8  ;;  %v4122_v62 = vld [vmem:[#allocation2 + $0x8] sm:$0xff] }
 0x503   : > { %v4066_v50 = vpop.permute.xlu0 %1536 }
 0x50b   : > { %v4068_v49 = vpop.permute.xlu0 %1546 }
 0x513   : > { %v4072_v20 = vpop.permute.xlu0 %1561 }
 0x517   : > { %v1503_v0 = vpop.xlane.xlu1 %1502 }
 0x518   : > { %v1511_v26 = vadd.f32 %v1503_v0, %v1487_v31  ;;  %v2984_v31 = vld [vmem:[%s3192_s9 + $0x48] sm:$0xff]  ;;  %v2985_v0 = vld [vmem:[%s3192_s9 + $0x40] sm:$0xff] }
 0x519   : > { %v2785_v59 = vpack.i.bf16 %v2985_v0, %v2984_v31 }
 0x51a   : > { %1520 = vst.msk [vmem:[#allocation3 + $0x38] sm:$0xff] %vm1512_vm10, %v1511_v26  ;;  %v2986_v26 = vld [vmem:[%s3192_s9 + $0x38] sm:$0xff]  ;;  %vm2150_vm10 = vcmask 261312  }
 0x51b   : > { %v4076_v22 = vpop.permute.xlu0 %2758 }
 0x52f   : > { %v4070_v43 = vpop.permute.xlu1 %1541 }
 0x537   : > { %v4074_v25 = vpop.permute.xlu1 %1556 }
 0x53f   : > { %v4078_v13 = vpop.permute.xlu1 %2753 }
 0x546   : > { %v1805_v46 = vpop.xlane.xlu0 %1804 }
 0x547   : > { %v4083_v1 = vmax.f32 %v4080_v57, %v1805_v46  ;;  %v1729_v11 = vpop.permute.xlu1 %1728 }
 0x548   : > { %v1757_v29 = vadd.f32 %v4029_v10, %v1729_v11 }
 0x549   : > { %2159 = vst.msk [vmem:[#allocation2] sm:$0xff] %vm1956_vm0, %v4083_v1 }
 0x54a   : > { %v1773_v47 = vmul.f32 0.2, %v1757_v29  ;;  %vm1765_vm1 = vcmp.ge.f32.partialorder %v1757_v29, 0.0 }
 0x54c   : > { %v1781_v18 = vsel %vm1765_vm1, %v1757_v29, %v1773_v47 }
 0x54d   : > { %v4089_v15 = vadd.f32 %v4580_v16, %v1781_v18  ;;  %v4100_v16 = vpop.permute.xlu2 %2765 }
 0x54f   : > { %1806 = vmax.xlane.f32.xlu1 %v4089_v15 }
 0x555   : > { %v2772_v30 = vpop.permute.xlu2 %2771 }
 0x556   : > { %v2773_v3 = vunpack.i.l.bf16 %v2772_v30  ;;  %v2774_v60 = vunpack.i.h.bf16 %v2772_v30 }
 0x558   : > { %1625 = vmatpush.msra.mxu2 %v2773_v3 }
 0x559   : > { %v1733_v12 = vpop.permute.xlu0 %1732 }
 0x55a   : > { %v1758_v51 = vadd.f32 %v4029_v10, %v1733_v12  ;;  %1626 = vmatpush.msra.mxu2 %v2774_v60 }
 0x55c   : > { %vm1766_vm2 = vcmp.ge.f32.partialorder %v1758_v51, 0.0  ;;  %v1774_v6 = vmul.f32 0.2, %v1758_v51 }
 0x55e   : > { %v1782_v39 = vsel %vm1766_vm2, %v1758_v51, %v1774_v6 }
 0x55f   : > { %v4097_v36 = vadd.f32 %v4579_v38, %v1782_v39  ;;  %v2777_v38 = vpop.permute.xlu2 %2776 }
 0x560   : > { %v2778_v35 = vunpack.i.l.bf16 %v2777_v38 }
 0x561   : > { %1808 = vmax.xlane.f32.xlu2 %v4097_v36 }
 0x562   : > { %1627 = vmatpush.msra.mxu2 %v2778_v35 }
 0x568   : > { %1736 = vperm.xlu1 %2763, %v3723_v4   ;;  %v2779_v4 = vunpack.i.h.bf16 %v2777_v38 }
 0x56a   : > { %1628 = vmatpush.msra.mxu2 %v2779_v4 }
 0x570   : > { %1744 = vperm.xlu1 %2763, %v3738_v2   ;;  %v2987_v2 = vld [vmem:[%s3192_s9 + $0x30] sm:$0xff]  ;;  %s3086_s9 = smov 16  }
 0x571   : > { %v2795_v46 = vpack.i.bf16 %v2987_v2, %v2986_v26 }
 0x578   : > { %2786 = vrot.lane.b32.xlu1 %v2785_v59, %s3084_s30 }
 0x579   : > { %1740 = vperm.xlu2 %2762, %v3814_v21   ;;  %v2825_v21 = vpack.i.bf16 %v4016_v19, %v4013_v33  ;;  %v4132_v19 = vld [vmem:[#allocation2 + $0x10] sm:$0xff] }
 0x580   : > { %2796 = vrot.lane.b32.xlu1 %v2795_v46, %s3084_s30 }
 0x581   : > { %1748 = vperm.xlu2 %2762, %v3823_v63  }
 0x588   : > { %2806 = vrot.lane.b32.xlu1 %v2780_v48, %s3085_s8 }
 0x589   : > { %1752 = vperm.xlu2 %2762, %v3819_v42  }
 0x591   : > { %2801 = vrot.lane.b32.xlu2 %v2775_v54, %s3085_s8  ;;  %v2782_v54 = vpop.permute.xlu0 %2781 }
 0x592   : > { %v2783_v29 = vunpack.i.l.bf16 %v2782_v54  ;;  %v2784_v33 = vunpack.i.h.bf16 %v2782_v54 }
 0x594   : > { %1629 = vmatpush.msra.mxu2 %v2783_v29 }
 0x596   : > { %1630 = vmatpush.msra.mxu2 %v2784_v33 }
 0x599   : > { %2811 = vrot.lane.b32.xlu2 %v2785_v59, %s3085_s8  ;;  %v2792_v26 = vpop.permute.xlu0 %2791 }
 0x59a   : > { %v2793_v2 = vunpack.i.l.bf16 %v2792_v26 }
 0x59c   : > { %2069 = vmatpush.msra.mxu3 %v2793_v2 }
 0x5a1   : > { %2816 = vrot.lane.b32.xlu2 %v2795_v46, %s3085_s8 }
 0x5a9   : > { %1854 = vperm.xlu2 %2762, %v4083_v1  }
 0x5b1   : > { %2826 = vrot.lane.b32.xlu2 %v2825_v21, %s3085_s8 }
 0x5c2   : > { %v1807_v63 = vpop.xlane.xlu1 %1806 }
 0x5c3   : > { %v4125_v11 = vmax.f32 %v4122_v62, %v1807_v63 }
 0x5c5   : > { %v1829_v42 = vsub.f32 %v4122_v62, %v4125_v11  ;;  %2160 = vst.msk [vmem:[#allocation2 + $0x8] sm:$0xff] %vm1956_vm0, %v4125_v11  ;;  %1859 = vperm.xlu2 %2762, %v4125_v11  }
 0x5d4   : > { %v1809_v47 = vpop.xlane.xlu2 %1808 }
 0x5d5   : > { %v4135_v18 = vmax.f32 %v4132_v19, %v1809_v47 }
 0x5d7   : > { %v1830_v14 = vsub.f32 %v4132_v19, %v4135_v18  ;;  %2161 = vst.msk [vmem:[#allocation2 + $0x10] sm:$0xff] %vm1956_vm0, %v4135_v18  ;;  %v1828_v19 = vsub.f32 %v4080_v57, %v4083_v1 }
 0x5da   : > { %v1737_v37 = vpop.permute.xlu1 %1736 }
 0x5db   : > { %v1759_v48 = vadd.f32 %v4029_v10, %v1737_v37 }
 0x5dc   : > { %v1741_v12 = vpop.permute.xlu2 %1740 }
 0x5dd   : > { %vm1767_vm3 = vcmp.ge.f32.partialorder %v1759_v48, 0.0  ;;  %v1775_v51 = vmul.f32 0.2, %v1759_v48  ;;  %v1760_v6 = vadd.f32 %v4029_v10, %v1741_v12 }
 0x5df   : > { %vm1768_vm5 = vcmp.ge.f32.partialorder %v1760_v6, 0.0  ;;  %v1776_v39 = vmul.f32 0.2, %v1760_v6  ;;  %v1783_v30 = vsel %vm1767_vm3, %v1759_v48, %v1775_v51 }
 0x5e0   : > { %v4144_v3 = vadd.f32 %v4582_v34, %v1783_v30  ;;  %v2794_v34 = vunpack.i.h.bf16 %v2792_v26 }
 0x5e1   : > { %v1784_v60 = vsel %vm1768_vm5, %v1760_v6, %v1776_v39 }
 0x5e2   : > { %v1745_v38 = vpop.permute.xlu1 %1744  ;;  %1810 = vmax.xlane.f32.xlu0 %v4144_v3  ;;  %v4148_v31 = vadd.f32 %v4584_v7, %v1784_v60  ;;  %2070 = vmatpush.msra.mxu3 %v2794_v34  ;;  %v2760_v34 = vunpack.i.l.bf16 %v4076_v22 }
 0x5e3   : > { %v1761_v0 = vadd.f32 %v4029_v10, %v1745_v38 }
 0x5e4   : > { %1812 = vmax.xlane.f32.xlu1 %v4148_v31  ;;  %v1749_v59 = vpop.permute.xlu2 %1748 }
 0x5e5   : > { %vm1769_vm6 = vcmp.ge.f32.partialorder %v1761_v0, 0.0  ;;  %v1777_v35 = vmul.f32 0.2, %v1761_v0  ;;  %v1762_v4 = vadd.f32 %v4029_v10, %v1749_v59 }
 0x5e7   : > { %vm1770_vm7 = vcmp.ge.f32.partialorder %v1762_v4, 0.0  ;;  %v1778_v46 = vmul.f32 0.2, %v1762_v4  ;;  %v1785_v21 = vsel %vm1769_vm6, %v1761_v0, %v1777_v35  ;;  %v2767_v0 = vunpack.i.l.bf16 %v4100_v16 }
 0x5e8   : > { %v4154_v63 = vadd.f32 %v4583_v41, %v1785_v21  ;;  %v2761_v35 = vunpack.i.h.bf16 %v4076_v22 }
 0x5e9   : > { %v1786_v7 = vsel %vm1770_vm7, %v1762_v4, %v1778_v46 }
 0x5ea   : > { %v2787_v54 = vpop.permute.xlu1 %2786  ;;  %1814 = vmax.xlane.f32.xlu0 %v4154_v63  ;;  %v4158_v29 = vadd.f32 %v4586_v24, %v1786_v7 }
 0x5eb   : > { %v2788_v33 = vunpack.i.l.bf16 %v2787_v54  ;;  %v2789_v47 = vunpack.i.h.bf16 %v2787_v54 }
 0x5ec   : > { %1816 = vmax.xlane.f32.xlu1 %v4158_v29  ;;  %v1753_v37 = vpop.permute.xlu2 %1752 }
 0x5ed   : > { %v1763_v48 = vadd.f32 %v4029_v10, %v1753_v37  ;;  %1631 = vmatpush.msra.mxu2 %v2788_v33  ;;  %v2768_v10 = vunpack.i.h.bf16 %v4100_v16  ;;  %v2756_v16 = vunpack.i.h.bf16 %v4078_v13 }
 0x5ef   : > { %vm1771_vm8 = vcmp.ge.f32.partialorder %v1763_v48, 0.0  ;;  %v1779_v41 = vmul.f32 0.2, %v1763_v48  ;;  %1632 = vmatpush.msra.mxu2 %v2789_v47 }
 0x5f1   : > { %v1787_v12 = vsel %vm1771_vm8, %v1763_v48, %v1779_v41  ;;  %v4206_v48 = vld [vmem:[#allocation2 + $0x30] sm:$0xff] }
 0x5f2   : > { %v2797_v51 = vpop.permute.xlu1 %2796  ;;  %v4163_v6 = vadd.f32 %v4585_v8, %v1787_v12  ;;  %v2820_v8 = vpack.i.bf16 %v4053_v9, %v4050_v45  ;;  %v2755_v45 = vunpack.i.l.bf16 %v4078_v13  ;;  %v2830_v9 = vpack.i.bf16 %v4036_v61, %v4033_v17  ;;  %v4187_v61 = vld [vmem:[#allocation2 + $0x18] sm:$0xff] }
 0x5f3   : > { %v2798_v39 = vunpack.i.l.bf16 %v2797_v51  ;;  %v2799_v24 = vunpack.i.h.bf16 %v2797_v51 }
 0x5f4   : > { %1818 = vmax.xlane.f32.xlu2 %v4163_v6  ;;  %v2802_v30 = vpop.permute.xlu2 %2801 }
 0x5f5   : > { %1633 = vmatpush.msra.mxu2 %v2798_v39  ;;  %v2803_v60 = vunpack.i.l.bf16 %v2802_v30  ;;  %v2804_v38 = vunpack.i.h.bf16 %v2802_v30 }
 0x5f7   : > { %1634 = vmatpush.msra.mxu2 %v2799_v24  ;;  %2071 = vmatpush.msra.mxu3 %v2803_v60  ;;  %v4218_v24 = vld [vmem:[#allocation2 + $0x38] sm:$0xff] }
 0x5f9   : > { %1635 = vmatpush.msra.mxu2 %v2768_v10  ;;  %2072 = vmatpush.msra.mxu3 %v2804_v38 }
 0x5fa   : > { %v2807_v59 = vpop.permute.xlu1 %2806 }
 0x5fb   : > { %1636 = vmatpush.msra.mxu2 %v2767_v0  ;;  %v2808_v4 = vunpack.i.l.bf16 %v2807_v59  ;;  %v2809_v26 = vunpack.i.h.bf16 %v2807_v59 }
 0x5fc   : > { %v2812_v2 = vpop.permute.xlu2 %2811 }
 0x5fd   : > { %1637 = vmatpush.msra.mxu2 %v2761_v35  ;;  %2073 = vmatpush.msra.mxu3 %v2808_v4  ;;  %v2813_v46 = vunpack.i.l.bf16 %v2812_v2  ;;  %v2814_v21 = vunpack.i.h.bf16 %v2812_v2 }
 0x5fe   : > { %2821 = vrot.lane.b32.xlu0 %v2820_v8, %s3085_s8 }
 0x5ff   : > { %1638 = vmatpush.msra.mxu2 %v2760_v34  ;;  %2074 = vmatpush.msra.mxu3 %v2809_v26 }
 0x601   : > { %1639 = vmatpush.msra.mxu2 %v2756_v16  ;;  %2075 = vmatpush.msra.mxu3 %v2813_v46 }
 0x603   : > { %1640 = vmatpush.msra.mxu2 %v2755_v45  ;;  %2076 = vmatpush.msra.mxu3 %v2814_v21 }
 0x604   : > { %v2817_v7 = vpop.permute.xlu2 %2816  ;;  %1641 = vmatmul.f32.vlgmr.msra.gmra.mxu2 %v3922_v32 }
 0x605   : > { %2831 = vrot.lane.b32.xlu1 %v2830_v9, %s3085_s8  ;;  %v2818_v22 = vunpack.i.l.bf16 %v2817_v7  ;;  %v2819_v54 = vunpack.i.h.bf16 %v2817_v7 }
 0x606   : > { %1864 = vperm.xlu0 %2769, %v4135_v18   ;;  %v1836_v18 = vmul.f32 1.442695, %v1828_v19 }
 0x607   : > { %2077 = vmatpush.msra.mxu3 %v2818_v22 }
 0x609   : > { %2078 = vmatpush.msra.mxu3 %v2819_v54 }
 0x60c   : > { %1644 = vmatmul.f32.gmra.mxu2 %v3960_v55  ;;  %v1855_v32 = vpop.permute.xlu2 %1854  ;;  %v4192_v55 = vld [vmem:[#allocation2 + $0x20] sm:$0xff] }
 0x60d   : > { %v1892_v10 = vsub.f32 %v4043_v40, %v1855_v32 }
 0x60f   : > { %v1900_v35 = vmul.f32 1.442695, %v1892_v10 }
 0x611   : > { %2931 = vpow2.f32 %v1900_v35 }
 0x614   : > { %1647 = vmatmul.f32.gmra.mxu2 %v3952_v56  ;;  %v2827_v17 = vpop.permute.xlu2 %2826 }
 0x615   : > { %v2828_v4 = vunpack.i.l.bf16 %v2827_v17  ;;  %v2829_v34 = vunpack.i.h.bf16 %v2827_v17 }
 0x617   : > { %v4230_v45 = vpop.eup %2931 }
 0x61c   : > { %1650 = vmatmul.f32.gmra.mxu2 %v3943_v52 }
 0x61f   : > { %v1860_v37 = vpop.permute.xlu2 %1859 }
 0x620   : > { %v1893_v26 = vsub.f32 %v4089_v15, %v1860_v37 }
 0x622   : > { %v1902_v21 = vmul.f32 1.442695, %v1893_v26 }
 0x624   : > { %1653 = vmatmul.f32.gmra.mxu2 %v3968_v5  ;;  %2933 = vpow2.f32 %v1902_v21 }
 0x62a   : > { %v4234_v22 = vpop.eup %2933 }
 0x62c   : > { %1656 = vmatmul.f32.gmra.mxu2 %v3957_v23 }
 0x634   : > { %1659 = vmatmul.f32.gmra.mxu2 %v3991_v53  ;;  %v1801_v53 = vld [vmem:[#allocation2 + $0x28] sm:$0xff] }
 0x63c   : > { %1662 = vmatmul.f32.gmra.mxu2 %v4007_v44 }
 0x655   : > { %v1811_v13 = vpop.xlane.xlu0 %1810 }
 0x656   : > { %v4190_v33 = vmax.f32 %v4187_v61, %v1811_v13 }
 0x657   : > { %v1813_v56 = vpop.xlane.xlu1 %1812 }
 0x658   : > { %v1831_v52 = vsub.f32 %v4187_v61, %v4190_v33  ;;  %2162 = vst.msk [vmem:[#allocation2 + $0x18] sm:$0xff] %vm1956_vm0, %v4190_v33  ;;  %v4199_v23 = vmax.f32 %v4192_v55, %v1813_v56  ;;  %1869 = vperm.xlu0 %2769, %v4190_v33  }
 0x65a   : > { %v1832_v5 = vsub.f32 %v4192_v55, %v4199_v23  ;;  %2163 = vst.msk [vmem:[#allocation2 + $0x20] sm:$0xff] %vm1956_vm0, %v4199_v23 }
 0x65c   : > { %v1844_v57 = vmul.f32 1.442695, %v1832_v5 }
 0x65d   : > { %v1815_v44 = vpop.xlane.xlu0 %1814 }
 0x65e   : > { %v1825_v47 = vmax.f32 %v1801_v53, %v1815_v44 }
 0x65f   : > { %v1817_v41 = vpop.xlane.xlu1 %1816 }
 0x660   : > { %v1833_v12 = vsub.f32 %v1801_v53, %v1825_v47  ;;  %2164 = vst.msk [vmem:[#allocation2 + $0x28] sm:$0xff] %vm1956_vm0, %v1825_v47  ;;  %v4210_v51 = vmax.f32 %v4206_v48, %v1817_v41  ;;  %1874 = vperm.xlu0 %2769, %v4199_v23   ;;  %v1838_v41 = vmul.f32 1.442695, %v1829_v42 }
 0x662   : > { %v1834_v39 = vsub.f32 %v4206_v48, %v4210_v51  ;;  %2165 = vst.msk [vmem:[#allocation2 + $0x30] sm:$0xff] %vm1956_vm0, %v4210_v51  ;;  %1884 = vperm.xlu1 %2763, %v4210_v51   ;;  %v1846_v56 = vmul.f32 1.442695, %v1833_v12  ;;  %v1842_v12 = vmul.f32 1.442695, %v1831_v52 }
 0x664   : > { %v1848_v1 = vmul.f32 1.442695, %v1834_v39 }
 0x667   : > { %v1819_v30 = vpop.xlane.xlu2 %1818 }
 0x668   : > { %v4221_v60 = vmax.f32 %v4218_v24, %v1819_v30  ;;  %1879 = vperm.xlu0 %2769, %v1825_v47  }
 0x66a   : > { %v1835_v38 = vsub.f32 %v4218_v24, %v4221_v60  ;;  %2166 = vst.msk [vmem:[#allocation2 + $0x38] sm:$0xff] %vm1956_vm0, %v4221_v60 }
 0x66c   : > { %v1850_v33 = vmul.f32 1.442695, %v1835_v38 }
 0x670   : > { %1889 = vperm.xlu0 %2769, %v4221_v60   ;;  %v2822_v0 = vpop.permute.xlu0 %2821 }
 0x671   : > { %v2823_v8 = vunpack.i.l.bf16 %v2822_v0  ;;  %v2824_v59 = vunpack.i.h.bf16 %v2822_v0 }
 0x673   : > { %2079 = vmatpush.msra.mxu3 %v2823_v8 }
 0x675   : > { %2080 = vmatpush.msra.mxu3 %v2824_v59 }
 0x677   : > { %2081 = vmatpush.msra.mxu3 %v2828_v4  ;;  %v2832_v2 = vpop.permute.xlu1 %2831 }
 0x678   : > { %v2833_v46 = vunpack.i.l.bf16 %v2832_v2  ;;  %v2834_v16 = vunpack.i.h.bf16 %v2832_v2  ;;  %v1865_v40 = vpop.permute.xlu0 %1864 }
 0x679   : > { %2082 = vmatpush.msra.mxu3 %v2829_v34  ;;  %v1894_v9 = vsub.f32 %v4097_v36, %v1865_v40  ;;  %v1840_v36 = vmul.f32 1.442695, %v1830_v14 }
 0x67b   : > { %2083 = vmatpush.msra.mxu3 %v2833_v46  ;;  %v1904_v7 = vmul.f32 1.442695, %v1894_v9  ;;  %v1521_v46 = vld [vmem:[#allocation4] sm:$0xff] }
 0x67d   : > { %2084 = vmatpush.msra.mxu3 %v2834_v16  ;;  %2935 = vpow2.f32 %v1904_v7  ;;  %v1524_v16 = vld [vmem:[#allocation4 + $0x18] sm:$0xff]  ;;  %v1522_v7 = vld [vmem:[#allocation4 + $0x8] sm:$0xff] }
 0x67e   : > { %2085 = vmatmul.f32.vlgmr.msra.gmra.mxu3 %v4230_v45  ;;  %2937 = vpow2.f32 %v1840_v36  ;;  %v1572_v21 = vmul.f32 %v4068_v49, %v1524_v16  ;;  %v1523_v49 = vld [vmem:[#allocation4 + $0x10] sm:$0xff] }
 0x67f   : > { %2939 = vpow2.f32 %v1846_v56 }
 0x680   : > { %2941 = vpow2.f32 %v1836_v18 }
 0x681   : > { %2943 = vpow2.f32 %v1838_v41 }
 0x682   : > { %2945 = vpow2.f32 %v1842_v12  ;;  %v1527_v12 = vld [vmem:[#allocation4 + $0x30] sm:$0xff] }
 0x683   : > { %v4238_v54 = vpop.eup %2935  ;;  %2947 = vpow2.f32 %v1844_v57 }
 0x684   : > { %v4247_v53 = vpop.eup %2937  ;;  %2949 = vpow2.f32 %v1848_v1 }
 0x685   : > { %v4251_v47 = vpop.eup %2939 }
 0x686   : > { %2088 = vmatmul.f32.gmra.mxu3 %v4234_v22  ;;  %v4264_v30 = vpop.eup %2941 }
 0x687   : > { %v1642_v15 = vpop.f32.mrf.mxu2  ;;  %v4274_v62 = vpop.eup %2943 }
 0x688   : > { %1674 = vrot.lane.b32.xlu1 %v1642_v15, %s3086_s9  ;;  %v4276_v11 = vpop.eup %2945  ;;  %v1570_v15 = vmul.f32 %v4066_v50, %v1522_v7  ;;  %v1525_v50 = vld [vmem:[#allocation4 + $0x20] sm:$0xff] }
 0x689   : > { %v4284_v52 = vpop.eup %2947 }
 0x68a   : > { %v4286_v23 = vpop.eup %2949 }
 0x68e   : > { %2091 = vmatmul.f32.gmra.mxu3 %v4238_v54 }
 0x68f   : > { %v1645_v32 = vpop.f32.mrf.mxu2 }
 0x690   : > { %1676 = vrot.lane.b32.xlu0 %v1645_v32, %s3086_s9 }
 0x697   : > { %v1648_v17 = vpop.f32.mrf.mxu2 }
 0x698   : > { %1678 = vrot.lane.b32.xlu1 %v1648_v17, %s3086_s9 }
 0x69f   : > { %v1651_v13 = vpop.f32.mrf.mxu2 }
 0x6a0   : > { %1680 = vrot.lane.b32.xlu2 %v1651_v13, %s3086_s9 }
 0x6a7   : > { %v1654_v44 = vpop.f32.mrf.mxu2 }
 0x6a8   : > { %1985 = vperm.xlu2 %2762, %v4247_v53   ;;  %1682 = vrot.lane.b32.xlu0 %v1654_v44, %s3086_s9 }
 0x6af   : > { %v1657_v37 = vpop.f32.mrf.mxu2 }
 0x6b0   : > { %2000 = vperm.xlu2 %2762, %v4251_v47   ;;  %1684 = vrot.lane.b32.xlu1 %v1657_v37, %s3086_s9 }
 0x6b7   : > { %v1660_v14 = vpop.f32.mrf.mxu2 }
 0x6b8   : > { %1686 = vrot.lane.b32.xlu0 %v1660_v14, %s3086_s9 }
 0x6bf   : > { %v1663_v10 = vpop.f32.mrf.mxu2 }
 0x6c0   : > { %1975 = vperm.xlu0 %2769, %v4264_v30   ;;  %1688 = vrot.lane.b32.xlu1 %v1663_v10, %s3086_s9  ;;  %v1575_v10 = vmul.f32 %v4072_v20, %v1527_v12 }
 0x6c8   : > { %1990 = vperm.xlu0 %2769, %v4276_v11   ;;  %1980 = vperm.xlu1 %2763, %v4274_v62  }
 0x6ca   : > { %v1870_v42 = vpop.permute.xlu0 %1869 }
 0x6cb   : > { %v1895_v61 = vsub.f32 %v4144_v3, %v1870_v42 }
 0x6cd   : > { %v1906_v55 = vmul.f32 1.442695, %v1895_v61 }
 0x6cf   : > { %2951 = vpow2.f32 %v1906_v55 }
 0x6d0   : > { %2005 = vperm.xlu0 %2769, %v4286_v23   ;;  %1995 = vperm.xlu1 %2763, %v4284_v52   ;;  %2953 = vpow2.f32 %v1850_v33 }
 0x6d2   : > { %v1875_v5 = vpop.permute.xlu0 %1874 }
 0x6d3   : > { %v1896_v48 = vsub.f32 %v4148_v31, %v1875_v5  ;;  %v1916_v5 = vld [vmem:[#allocation3] sm:$0xff] }
 0x6d4   : > { %v1885_v38 = vpop.permute.xlu1 %1884 }
 0x6d5   : > { %v2952_v51 = vpop.eup %2951  ;;  %v1908_v3 = vmul.f32 1.442695, %v1896_v48  ;;  %v1898_v59 = vsub.f32 %v4158_v29, %v1885_v38  ;;  %v1569_v29 = vmul.f32 %v4010_v27, %v1521_v46  ;;  %v1924_v48 = vmul.f32 %v4264_v30, %v1916_v5 }
 0x6d6   : > { %2094 = vmatmul.f32.gmra.mxu3 %v2952_v51  ;;  %v4291_v39 = vpop.eup %2953 }
 0x6d7   : > { %2955 = vpow2.f32 %v1908_v3  ;;  %v1912_v35 = vmul.f32 1.442695, %v1898_v59  ;;  %v1920_v59 = vld [vmem:[#allocation3 + $0x20] sm:$0xff] }
 0x6d8   : > { %2010 = vperm.xlu1 %2763, %v4291_v39   ;;  %v1928_v30 = vmul.f32 %v4284_v52, %v1920_v59 }
 0x6d9   : > { %1932 = vadd.xlane.f32.xlu2 %v4230_v45 }
 0x6da   : > { %v1880_v24 = vpop.permute.xlu0 %1879 }
 0x6db   : > { %v1897_v60 = vsub.f32 %v4154_v63, %v1880_v24  ;;  %v1919_v24 = vld [vmem:[#allocation3 + $0x18] sm:$0xff] }
 0x6dd   : > { %v2956_v0 = vpop.eup %2955  ;;  %v1910_v8 = vmul.f32 1.442695, %v1897_v60  ;;  %v1927_v60 = vmul.f32 %v4276_v11, %v1919_v24  ;;  %v1923_v11 = vld [vmem:[#allocation3 + $0x38] sm:$0xff] }
 0x6de   : > { %2097 = vmatmul.f32.gmra.mxu3 %v2956_v0 }
 0x6df   : > { %2957 = vpow2.f32 %v1910_v8 }
 0x6e0   : > { %2959 = vpow2.f32 %v1912_v35 }
 0x6e1   : > { %1938 = vadd.xlane.f32.xlu2 %v2952_v51 }
 0x6e2   : > { %v1890_v31 = vpop.permute.xlu0 %1889 }
 0x6e3   : > { %v1899_v4 = vsub.f32 %v4163_v6, %v1890_v31 }
 0x6e5   : > { %v2958_v26 = vpop.eup %2957  ;;  %v1914_v2 = vmul.f32 1.442695, %v1899_v4 }
 0x6e6   : > { %2100 = vmatmul.f32.gmra.mxu3 %v2958_v26  ;;  %v2960_v34 = vpop.eup %2959 }
 0x6e7   : > { %2961 = vpow2.f32 %v1914_v2 }
 0x6e9   : > { %1940 = vadd.xlane.f32.xlu2 %v2956_v0 }
 0x6ed   : > { %v2962_v63 = vpop.eup %2961 }
 0x6ee   : > { %2103 = vmatmul.f32.gmra.mxu3 %v2960_v34 }
 0x6f1   : > { %1946 = vadd.xlane.f32.xlu2 %v2962_v63 }
 0x6f6   : > { %2106 = vmatmul.f32.gmra.mxu3 %v2962_v63 }
 0x6fa   : > { %v1675_v40 = vpop.permute.xlu1 %1674  ;;  %v1681_v6 = vpop.permute.xlu2 %1680  ;;  %1934 = vadd.xlane.f32.xlu0 %v4234_v22  ;;  %v1571_v22 = vmul.f32 %v4070_v43, %v1523_v49  ;;  %v1526_v43 = vld [vmem:[#allocation4 + $0x28] sm:$0xff] }
 0x6fb   : > { %v1698_v45 = vadd.f32 %v1675_v40, %v1569_v29  ;;  %v1701_v9 = vadd.f32 %v1681_v6, %v1572_v21  ;;  %v1574_v18 = vmul.f32 %v4074_v25, %v1526_v43  ;;  %v1917_v40 = vld [vmem:[#allocation3 + $0x8] sm:$0xff] }
 0x6fd   : > { %1707 = vst.msk [vmem:[#allocation4] sm:$0xff] %vm1706_vm9, %v1698_v45  ;;  %v1925_v45 = vmul.f32 %v4274_v62, %v1917_v40 }
 0x6fe   : > { %1710 = vst.msk [vmem:[#allocation4 + $0x18] sm:$0xff] %vm1706_vm9, %v1701_v9 }
 0x701   : > { %v2086_v32 = vpop.f32.mrf.mxu3 }
 0x702   : > { %v1677_v17 = vpop.permute.xlu0 %1676  ;;  %1942 = vadd.xlane.f32.xlu0 %v2958_v26  ;;  %1936 = vadd.xlane.f32.xlu1 %v4238_v54  ;;  %v1573_v54 = vmul.f32 %v4024_v58, %v1525_v50  ;;  %v1528_v58 = vld [vmem:[#allocation4 + $0x38] sm:$0xff]  ;;  %v1986_v25 = vpop.permute.xlu2 %1985  ;;  %v1922_v50 = vld [vmem:[#allocation3 + $0x30] sm:$0xff] }
 0x703   : > { %v1699_v27 = vadd.f32 %v1677_v17, %v1570_v15  ;;  %v1576_v42 = vmul.f32 %v4026_v28, %v1528_v58  ;;  %v1921_v17 = vld [vmem:[#allocation3 + $0x28] sm:$0xff] }
 0x704   : > { %v1929_v49 = vmul.f32 %v4251_v47, %v1921_v17  ;;  %v1965_v47 = vld [vmem:[#allocation4] sm:$0xff] }
 0x705   : > { %1708 = vst.msk [vmem:[#allocation4 + $0x8] sm:$0xff] %vm1706_vm9, %v1699_v27  ;;  %v1918_v27 = vld [vmem:[#allocation3 + $0x10] sm:$0xff] }
 0x709   : > { %v2089_v36 = vpop.f32.mrf.mxu3 }
 0x70a   : > { %v1679_v13 = vpop.permute.xlu1 %1678  ;;  %1944 = vadd.xlane.f32.xlu1 %v2960_v34  ;;  %v4319_v55 = vpop.permute.xlu2 %2000  ;;  %v1931_v34 = vmul.f32 %v4291_v39, %v1923_v11 }
 0x70b   : > { %v1700_v56 = vadd.f32 %v1679_v13, %v1571_v22  ;;  %v1926_v22 = vmul.f32 %v4247_v53, %v1918_v27 }
 0x70d   : > { %1709 = vst.msk [vmem:[#allocation4 + $0x10] sm:$0xff] %vm1706_vm9, %v1700_v56 }
 0x711   : > { %v2092_v44 = vpop.f32.mrf.mxu3 }
 0x712   : > { %2122 = vrot.lane.b32.xlu2 %v2092_v44, %s3087_s10 }
 0x714   : > { %v1967_v29 = vld [vmem:[#allocation4 + $0x10] sm:$0xff] }
 0x715   : > { %v2015_v52 = vmul.f32 %v1986_v25, %v1967_v29 }
 0x716   : > { %2118 = vrot.lane.b32.xlu0 %v2086_v32, %s3087_s10 }
 0x71a   : > { %v1683_v37 = vpop.permute.xlu0 %1682 }
 0x71b   : > { %v1702_v19 = vadd.f32 %v1683_v37, %v1573_v54  ;;  %v1930_v54 = vmul.f32 %v4286_v23, %v1922_v50 }
 0x71d   : > { %1711 = vst.msk [vmem:[#allocation4 + $0x20] sm:$0xff] %vm1706_vm9, %v1702_v19 }
 0x722   : > { %v1685_v14 = vpop.permute.xlu1 %1684 }
 0x723   : > { %v1703_v41 = vadd.f32 %v1685_v14, %v1574_v18  ;;  %2120 = vrot.lane.b32.xlu1 %v2089_v36, %s3087_s10  ;;  %v1966_v14 = vld [vmem:[#allocation4 + $0x8] sm:$0xff] }
 0x724   : > { %v1969_v5 = vld [vmem:[#allocation4 + $0x20] sm:$0xff] }
 0x725   : > { %1712 = vst.msk [vmem:[#allocation4 + $0x28] sm:$0xff] %vm1706_vm9, %v1703_v41 }
 0x72a   : > { %v1687_v57 = vpop.permute.xlu0 %1686 }
 0x72b   : > { %v1704_v1 = vadd.f32 %v1687_v57, %v1575_v10  ;;  %v1968_v57 = vld [vmem:[#allocation4 + $0x18] sm:$0xff] }
 0x72d   : > { %1713 = vst.msk [vmem:[#allocation4 + $0x30] sm:$0xff] %vm1706_vm9, %v1704_v1 }
 0x732   : > { %v1689_v61 = vpop.permute.xlu1 %1688  ;;  %v1976_v20 = vpop.permute.xlu0 %1975 }
 0x733   : > { %v1705_v33 = vadd.f32 %v1689_v61, %v1576_v42  ;;  %v2013_v53 = vmul.f32 %v1976_v20, %v1965_v47  ;;  %v1970_v20 = vld [vmem:[#allocation4 + $0x28] sm:$0xff] }
 0x734   : > { %v1971_v1 = vld [vmem:[#allocation4 + $0x30] sm:$0xff]  ;;  %v2018_v24 = vmul.f32 %v4319_v55, %v1970_v20 }
 0x735   : > { %1714 = vst.msk [vmem:[#allocation4 + $0x38] sm:$0xff] %vm1706_vm9, %v1705_v33 }
 0x73a   : > { %v1981_v0 = vpop.permute.xlu1 %1980  ;;  %v1991_v31 = vpop.permute.xlu0 %1990 }
 0x73b   : > { %v2014_v41 = vmul.f32 %v1981_v0, %v1966_v14  ;;  %v2016_v58 = vmul.f32 %v1991_v31, %v1968_v57 }
 0x742   : > { %v1996_v2 = vpop.permute.xlu1 %1995  ;;  %v2006_v46 = vpop.permute.xlu0 %2005 }
 0x743   : > { %v2019_v23 = vmul.f32 %v2006_v46, %v1971_v1 }
 0x74a   : > { %v2011_v9 = vpop.permute.xlu1 %2010 }
 0x74c   : > { %v1933_v51 = vpop.xlane.xlu2 %1932 }
 0x74d   : > { %v1948_v3 = vadd.f32 %v1933_v51, %v1924_v48  ;;  %v2017_v48 = vmul.f32 %v1996_v2, %v1969_v5 }
 0x74f   : > { %1957 = vst.msk [vmem:[#allocation3] sm:$0xff] %vm1956_vm0, %v1948_v3 }
 0x754   : > { %v1939_v38 = vpop.xlane.xlu2 %1938 }
 0x755   : > { %v1951_v28 = vadd.f32 %v1939_v38, %v1927_v60 }
 0x757   : > { %1960 = vst.msk [vmem:[#allocation3 + $0x18] sm:$0xff] %vm1956_vm0, %v1951_v28  ;;  %v1972_v28 = vld [vmem:[#allocation4 + $0x38] sm:$0xff] }
 0x758   : > { %v2020_v0 = vmul.f32 %v2011_v9, %v1972_v28 }
 0x759   : > { %v2095_v8 = vpop.f32.mrf.mxu3 }
 0x75a   : > { %2124 = vrot.lane.b32.xlu0 %v2095_v8, %s3087_s10 }
 0x75c   : > { %v1941_v35 = vpop.xlane.xlu2 %1940 }
 0x75d   : > { %v1952_v4 = vadd.f32 %v1941_v35, %v1928_v30 }
 0x75f   : > { %1961 = vst.msk [vmem:[#allocation3 + $0x20] sm:$0xff] %vm1956_vm0, %v1952_v4 }
 0x761   : > { %v2098_v26 = vpop.f32.mrf.mxu3 }
 0x762   : > { %2126 = vrot.lane.b32.xlu1 %v2098_v26, %s3087_s10 }
 0x764   : > { %v1947_v63 = vpop.xlane.xlu2 %1946 }
 0x765   : > { %v1955_v16 = vadd.f32 %v1947_v63, %v1931_v34 }
 0x767   : > { %1964 = vst.msk [vmem:[#allocation3 + $0x38] sm:$0xff] %vm1956_vm0, %v1955_v16 }
 0x769   : > { %v2101_v21 = vpop.f32.mrf.mxu3 }
 0x76a   : > { %2128 = vrot.lane.b32.xlu0 %v2101_v21, %s3087_s10 }
 0x76c   : > { %v2123_v6 = vpop.permute.xlu2 %2122 }
 0x76d   : > { %v2144_v7 = vadd.f32 %v2123_v6, %v2015_v52  ;;  %v1935_v15 = vpop.xlane.xlu0 %1934 }
 0x76e   : > { %v1949_v32 = vadd.f32 %v1935_v15, %v1925_v45 }
 0x76f   : > { %2153 = vst.msk [vmem:[#allocation4 + $0x10] sm:$0xff] %vm2150_vm10, %v2144_v7 }
 0x770   : > { %1958 = vst.msk [vmem:[#allocation3 + $0x8] sm:$0xff] %vm1956_vm0, %v1949_v32 }
 0x771   : > { %v2104_v39 = vpop.f32.mrf.mxu3 }
 0x772   : > { %2130 = vrot.lane.b32.xlu2 %v2104_v39, %s3087_s10 }
 0x775   : > { %v1943_v36 = vpop.xlane.xlu0 %1942  ;;  %v1937_v13 = vpop.xlane.xlu1 %1936 }
 0x776   : > { %v1953_v62 = vadd.f32 %v1943_v36, %v1929_v49  ;;  %v1950_v56 = vadd.f32 %v1937_v13, %v1926_v22 }
 0x778   : > { %1962 = vst.msk [vmem:[#allocation3 + $0x28] sm:$0xff] %vm1956_vm0, %v1953_v62 }
 0x779   : > { %1959 = vst.msk [vmem:[#allocation3 + $0x10] sm:$0xff] %vm1956_vm0, %v1950_v56  ;;  %v2107_v44 = vpop.f32.mrf.mxu3 }
 0x77a   : > { %2132 = vrot.lane.b32.xlu1 %v2107_v44, %s3087_s10 }
 0x77d   : > { %v1945_v37 = vpop.xlane.xlu1 %1944 }
 0x77e   : > { %v1954_v19 = vadd.f32 %v1945_v37, %v1930_v54 }
 0x780   : > { %1963 = vst.msk [vmem:[#allocation3 + $0x30] sm:$0xff] %vm1956_vm0, %v1954_v19 }
 0x788   : > { %v2119_v43 = vpop.permute.xlu0 %2118 }
 0x789   : > { %v2142_v18 = vadd.f32 %v2119_v43, %v2013_v53 }
 0x78b   : > { %2151 = vst.msk [vmem:[#allocation4] sm:$0xff] %vm2150_vm10, %v2142_v18 }
 0x795   : > { %v2121_v12 = vpop.permute.xlu1 %2120 }
 0x796   : > { %v2143_v10 = vadd.f32 %v2121_v12, %v2014_v41 }
 0x798   : > { %2152 = vst.msk [vmem:[#allocation4 + $0x8] sm:$0xff] %vm2150_vm10, %v2143_v10 }
 0x7cc   : > { %v2131_v42 = vpop.permute.xlu2 %2130  ;;  %v2125_v61 = vpop.permute.xlu0 %2124 }
 0x7cd   : > { %v2148_v33 = vadd.f32 %v2131_v42, %v2019_v23  ;;  %v2145_v25 = vadd.f32 %v2125_v61, %v2016_v58 }
 0x7cf   : > { %2157 = vst.msk [vmem:[#allocation4 + $0x30] sm:$0xff] %vm2150_vm10, %v2148_v33 }
 0x7d0   : > { %2154 = vst.msk [vmem:[#allocation4 + $0x18] sm:$0xff] %vm2150_vm10, %v2145_v25 }
 0x7d4   : > { %v2127_v51 = vpop.permute.xlu1 %2126 }
 0x7d5   : > { %v2146_v3 = vadd.f32 %v2127_v51, %v2017_v48 }
 0x7d7   : > { %2155 = vst.msk [vmem:[#allocation4 + $0x20] sm:$0xff] %vm2150_vm10, %v2146_v3 }
 0x7dc   : > { %v2129_v60 = vpop.permute.xlu0 %2128 }
 0x7dd   : > { %v2147_v38 = vadd.f32 %v2129_v60, %v2018_v24 }
 0x7df   : > { %2156 = vst.msk [vmem:[#allocation4 + $0x28] sm:$0xff] %vm2150_vm10, %v2147_v38 }
 0x7eb   : > { %2170 = sbr.rel (%p2597_p0) target bundleno = 2251 (0x8cb), region = 89 }
 0x7ec   : > { %v2133_v8 = vpop.permute.xlu1 %2132 }
 0x7ed   : > { %v2149_v59 = vadd.f32 %v2133_v8, %v2020_v0 }
 0x7ef   : > { %2158 = vst.msk [vmem:[#allocation4 + $0x38] sm:$0xff] %vm2150_vm10, %v2149_v59 }
 0x7f0   : > { %v2173_v31 = vld [vmem:[#allocation3 + $0x10] sm:$0xff]  ;;  %v2171_v30 = vld [vmem:[#allocation3] sm:$0xff]  ;;  %v3088_v35 = vmov 0   ;;  %v2174_v4 = vld [vmem:[#allocation3 + $0x18] sm:$0xff]  ;;  %v3089_v45 = vmov 1   ;;  %v3090_v9 = vmov 2  }
 0x7f1   : > { %2989 = vset.pattern.permute.xlu1 %v3088_v35  ;;  %3004 = vrcp.f32 %v2173_v31  ;;  %2988 = vset.pattern.permute.xlu0 %v3088_v35  ;;  %v2175_v55 = vld [vmem:[#allocation3 + $0x20] sm:$0xff]  ;;  %v2172_v26 = vld [vmem:[#allocation3 + $0x8] sm:$0xff]  ;;  %v2178_v46 = vld [vmem:[#allocation3 + $0x38] sm:$0xff]  ;;  %v3091_v7 = vmov 3  }
 0x7f2   : > { %2990 = vset.pattern.permute.xlu2 %v3088_v35  ;;  %3006 = vrcp.f32 %v2171_v30  ;;  %v2176_v2 = vld [vmem:[#allocation3 + $0x28] sm:$0xff]  ;;  %v2177_v29 = vld [vmem:[#allocation3 + $0x30] sm:$0xff]  ;;  %v4352_v15 = vld [vmem:[#allocation4 + $0x20] sm:$0xff] }
 0x7f3   : > { %3008 = vrcp.f32 %v2175_v55  ;;  %v3000_v39 = vld [vmem:[%s4521_s4] ss:$0 sm:$0xff]  ;;  %v4360_v49 = vld [vmem:[#allocation4 + $0x28] sm:$0xff]  ;;  %v4367_v44 = vld [vmem:[#allocation4 + $0x10] sm:$0xff] }
 0x7f4   : > { %3010 = vrcp.f32 %v2174_v4  ;;  %v4365_v56 = vld [vmem:[#allocation4] sm:$0xff]  ;;  %v4380_v41 = vld [vmem:[#allocation4 + $0x18] sm:$0xff]  ;;  %v4387_v1 = vld [vmem:[#allocation4 + $0x8] sm:$0xff] }
 0x7f5   : > { %3012 = vrcp.f32 %v2172_v26  ;;  %v4372_v54 = vld [vmem:[%s4521_s4] ss:$0 sm:$0xff]  ;;  %v4402_v24 = vld [vmem:[#allocation4 + $0x30] sm:$0xff] }
 0x7f6   : > { %3014 = vrcp.f32 %v2176_v2  ;;  %v4395_v51 = vld [vmem:[#allocation4 + $0x38] sm:$0xff]  ;;  %v4411_v8 = vld [vmem:[%s4521_s4] ss:$0 sm:$0xff] }
 0x7f7   : > { %v3005_v11 = vpop.eup %3004  ;;  %3016 = vrcp.f32 %v2178_v46 }
 0x7f8   : > { %2207 = vperm.xlu1 %2989, %v3005_v11   ;;  %v3007_v34 = vpop.eup %3006  ;;  %3018 = vrcp.f32 %v2177_v29 }
 0x7f9   : > { %v3009_v63 = vpop.eup %3008  ;;  %2197 = vperm.xlu0 %2988, %v3007_v34  }
 0x7fa   : > { %2217 = vperm.xlu2 %2990, %v3009_v63   ;;  %v3011_v16 = vpop.eup %3010 }
 0x7fb   : > { %v3013_v21 = vpop.eup %3012 }
 0x7fc   : > { %v3015_v52 = vpop.eup %3014 }
 0x7fd   : > { %v3017_v40 = vpop.eup %3016 }
 0x7fe   : > { %v3019_v6 = vpop.eup %3018 }
 0x800   : > { %2212 = vperm.xlu1 %2989, %v3011_v16  }
 0x801   : > { %2202 = vperm.xlu0 %2988, %v3013_v21  }
 0x802   : > { %2222 = vperm.xlu2 %2990, %v3015_v52  }
 0x808   : > { %2232 = vperm.xlu1 %2989, %v3017_v40  }
 0x809   : > { %2227 = vperm.xlu0 %2988, %v3019_v6  }
 0x80a   : > { %2991 = vset.pattern.permute.xlu2 %v3089_v45 }
 0x80b   : > { %2272 = vperm.xlu2 %2991, %v3007_v34  }
 0x810   : > { %2993 = vset.pattern.permute.xlu1 %v3089_v45 }
 0x811   : > { %2280 = vperm.xlu1 %2993, %v3005_v11   ;;  %2992 = vset.pattern.permute.xlu0 %v3089_v45 }
 0x812   : > { %2276 = vperm.xlu0 %2992, %v3013_v21  }
 0x813   : > { %2284 = vperm.xlu2 %2991, %v3011_v16  }
 0x819   : > { %2288 = vperm.xlu1 %2993, %v3009_v63  }
 0x81a   : > { %2296 = vperm.xlu0 %2992, %v3019_v6  }
 0x81b   : > { %2292 = vperm.xlu2 %2991, %v3015_v52  }
 0x821   : > { %2300 = vperm.xlu1 %2993, %v3017_v40  }
 0x822   : > { %2995 = vset.pattern.permute.xlu0 %v3090_v9 }
 0x823   : > { %2994 = vset.pattern.permute.xlu2 %v3090_v9  ;;  %2344 = vperm.xlu0 %2995, %v3013_v21  }
 0x824   : > { %2340 = vperm.xlu2 %2994, %v3007_v34  }
 0x829   : > { %2996 = vset.pattern.permute.xlu1 %v3090_v9 }
 0x82a   : > { %2348 = vperm.xlu1 %2996, %v3005_v11  }
 0x82b   : > { %2364 = vperm.xlu0 %2995, %v3019_v6  }
 0x82c   : > { %2352 = vperm.xlu2 %2994, %v3011_v16  }
 0x832   : > { %2356 = vperm.xlu1 %2996, %v3009_v63  }
 0x833   : > { %2998 = vset.pattern.permute.xlu0 %v3091_v7 }
 0x834   : > { %2360 = vperm.xlu2 %2994, %v3015_v52   ;;  %2412 = vperm.xlu0 %2998, %v3013_v21  }
 0x83a   : > { %2368 = vperm.xlu1 %2996, %v3017_v40  }
 0x83c   : > { %2997 = vset.pattern.permute.xlu2 %v3091_v7  ;;  %2432 = vperm.xlu0 %2998, %v3019_v6  }
 0x83d   : > { %2408 = vperm.xlu2 %2997, %v3007_v34  }
 0x842   : > { %2999 = vset.pattern.permute.xlu1 %v3091_v7 }
 0x843   : > { %2416 = vperm.xlu1 %2999, %v3005_v11  }
 0x845   : > { %2420 = vperm.xlu2 %2997, %v3011_v16  }
 0x84b   : > { %2424 = vperm.xlu1 %2999, %v3009_v63  }
 0x84d   : > { %2428 = vperm.xlu2 %2997, %v3015_v52  }
 0x853   : > { %2436 = vperm.xlu1 %2999, %v3017_v40  }
 0x854   : > { %v2218_v32 = vpop.permute.xlu2 %2217 }
 0x855   : > { %v2239_v17 = vmul.f32 %v2218_v32, %v4352_v15 }
 0x857   : > { %v2251_v27 = vadd.f32 %v3000_v39, %v2239_v17 }
 0x859   : > { %2259 = vst.msk [vmem:[%s3207_s7 + $0x20] sm:$0xff] %vm802_vm4, %v2251_v27 }
 0x85c   : > { %v2223_v22 = vpop.permute.xlu2 %2222 }
 0x85d   : > { %v2240_v36 = vmul.f32 %v2223_v22, %v4360_v49 }
 0x85f   : > { %v2252_v13 = vadd.f32 %v3000_v39, %v2240_v36 }
 0x861   : > { %2260 = vst.msk [vmem:[%s3207_s7 + $0x28] sm:$0xff] %vm802_vm4, %v2252_v13  ;;  %v3003_v13 = vld [vmem:[%s4521_s4] ss:$0 sm:$0xff] }
 0x865   : > { %v2273_v62 = vpop.permute.xlu2 %2272 }
 0x866   : > { %v2303_v37 = vmul.f32 %v2273_v62, %v4365_v56 }
 0x868   : > { %v2315_v18 = vadd.f32 %v4372_v54, %v2303_v37 }
 0x86a   : > { %v2208_v50 = vpop.permute.xlu1 %2207 }
 0x86b   : > { %v2237_v19 = vmul.f32 %v2208_v50, %v4367_v44  ;;  %v2198_v47 = vpop.permute.xlu0 %2197 }
 0x86c   : > { %v2235_v43 = vmul.f32 %v2198_v47, %v4365_v56 }
 0x86d   : > { %v2249_v53 = vadd.f32 %v3000_v39, %v2237_v19  ;;  %v2285_v14 = vpop.permute.xlu2 %2284 }
 0x86e   : > { %v2247_v12 = vadd.f32 %v3000_v39, %v2235_v43  ;;  %v2306_v10 = vmul.f32 %v2285_v14, %v4380_v41 }
 0x86f   : > { %2257 = vst.msk [vmem:[%s3207_s7 + $0x10] sm:$0xff] %vm802_vm4, %v2249_v53 }
 0x870   : > { %2255 = vst.msk [vmem:[%s3207_s7] sm:$0xff] %vm802_vm4, %v2247_v12  ;;  %v2318_v42 = vadd.f32 %v4372_v54, %v2306_v10 }
 0x871   : > { %2323 = vst.msk [vmem:[%s3207_s7] sm:$0xff] %vm1262_vm14, %v2315_v18 }
 0x872   : > { %v2213_v57 = vpop.permute.xlu1 %2212 }
 0x873   : > { %v2238_v58 = vmul.f32 %v2213_v57, %v4380_v41  ;;  %v2203_v23 = vpop.permute.xlu0 %2202 }
 0x874   : > { %v2236_v33 = vmul.f32 %v2203_v23, %v4387_v1 }
 0x875   : > { %v2250_v61 = vadd.f32 %v3000_v39, %v2238_v58  ;;  %v2293_v25 = vpop.permute.xlu2 %2292 }
 0x876   : > { %v2248_v5 = vadd.f32 %v3000_v39, %v2236_v33  ;;  %v2308_v48 = vmul.f32 %v2293_v25, %v4360_v49 }
 0x877   : > { %2258 = vst.msk [vmem:[%s3207_s7 + $0x18] sm:$0xff] %vm802_vm4, %v2250_v61 }
 0x878   : > { %2326 = vst.msk [vmem:[%s3207_s7 + $0x18] sm:$0xff] %vm1262_vm14, %v2318_v42  ;;  %v2320_v3 = vadd.f32 %v4372_v54, %v2308_v48 }
 0x879   : > { %2256 = vst.msk [vmem:[%s3207_s7 + $0x8] sm:$0xff] %vm802_vm4, %v2248_v5 }
 0x87a   : > { %v2233_v20 = vpop.permute.xlu1 %2232  ;;  %2328 = vst.msk [vmem:[%s3207_s7 + $0x28] sm:$0xff] %vm1262_vm14, %v2320_v3 }
 0x87b   : > { %v2242_v60 = vmul.f32 %v2233_v20, %v4395_v51  ;;  %v2228_v38 = vpop.permute.xlu0 %2227 }
 0x87c   : > { %v2241_v0 = vmul.f32 %v2228_v38, %v4402_v24 }
 0x87d   : > { %v2254_v28 = vadd.f32 %v3000_v39, %v2242_v60 }
 0x87e   : > { %v2253_v59 = vadd.f32 %v3000_v39, %v2241_v0  ;;  %v2341_v31 = vpop.permute.xlu2 %2340 }
 0x87f   : > { %2262 = vst.msk [vmem:[%s3207_s7 + $0x38] sm:$0xff] %vm802_vm4, %v2254_v28  ;;  %v2371_v30 = vmul.f32 %v2341_v31, %v4365_v56 }
 0x880   : > { %2261 = vst.msk [vmem:[%s3207_s7 + $0x30] sm:$0xff] %vm802_vm4, %v2253_v59 }
 0x881   : > { %v2383_v35 = vadd.f32 %v4411_v8, %v2371_v30 }
 0x883   : > { %v2281_v55 = vpop.permute.xlu1 %2280  ;;  %2391 = vst.msk [vmem:[%s3207_s7] sm:$0xff] %vm1706_vm9, %v2383_v35 }
 0x884   : > { %v2305_v4 = vmul.f32 %v2281_v55, %v4367_v44  ;;  %v2277_v26 = vpop.permute.xlu0 %2276 }
 0x885   : > { %v2304_v2 = vmul.f32 %v2277_v26, %v4387_v1 }
 0x886   : > { %v2317_v11 = vadd.f32 %v4372_v54, %v2305_v4  ;;  %v2353_v34 = vpop.permute.xlu2 %2352 }
 0x887   : > { %v2316_v63 = vadd.f32 %v4372_v54, %v2304_v2  ;;  %v2374_v46 = vmul.f32 %v2353_v34, %v4380_v41 }
 0x888   : > { %2325 = vst.msk [vmem:[%s3207_s7 + $0x10] sm:$0xff] %vm1262_vm14, %v2317_v11 }
 0x889   : > { %2324 = vst.msk [vmem:[%s3207_s7 + $0x8] sm:$0xff] %vm1262_vm14, %v2316_v63  ;;  %v2386_v16 = vadd.f32 %v4411_v8, %v2374_v46 }
 0x88b   : > { %v2289_v29 = vpop.permute.xlu1 %2288  ;;  %2394 = vst.msk [vmem:[%s3207_s7 + $0x18] sm:$0xff] %vm1706_vm9, %v2386_v16 }
 0x88c   : > { %v2307_v21 = vmul.f32 %v2289_v29, %v4352_v15  ;;  %v2297_v52 = vpop.permute.xlu0 %2296 }
 0x88d   : > { %v2309_v6 = vmul.f32 %v2297_v52, %v4402_v24 }
 0x88e   : > { %v2319_v40 = vadd.f32 %v4372_v54, %v2307_v21  ;;  %v2361_v45 = vpop.permute.xlu2 %2360 }
 0x88f   : > { %v2321_v9 = vadd.f32 %v4372_v54, %v2309_v6  ;;  %v2376_v7 = vmul.f32 %v2361_v45, %v4360_v49 }
 0x890   : > { %2327 = vst.msk [vmem:[%s3207_s7 + $0x20] sm:$0xff] %vm1262_vm14, %v2319_v40 }
 0x891   : > { %2329 = vst.msk [vmem:[%s3207_s7 + $0x30] sm:$0xff] %vm1262_vm14, %v2321_v9  ;;  %v2388_v32 = vadd.f32 %v4411_v8, %v2376_v7 }
 0x893   : > { %v2301_v39 = vpop.permute.xlu1 %2300  ;;  %2396 = vst.msk [vmem:[%s3207_s7 + $0x28] sm:$0xff] %vm1706_vm9, %v2388_v32 }
 0x894   : > { %v2310_v17 = vmul.f32 %v2301_v39, %v4395_v51 }
 0x895   : > { %v2345_v22 = vpop.permute.xlu0 %2344 }
 0x896   : > { %v2322_v27 = vadd.f32 %v4372_v54, %v2310_v17  ;;  %v2372_v36 = vmul.f32 %v2345_v22, %v4387_v1 }
 0x897   : > { %v2409_v62 = vpop.permute.xlu2 %2408 }
 0x898   : > { %2330 = vst.msk [vmem:[%s3207_s7 + $0x38] sm:$0xff] %vm1262_vm14, %v2322_v27  ;;  %v2384_v50 = vadd.f32 %v4411_v8, %v2372_v36  ;;  %v2439_v37 = vmul.f32 %v2409_v62, %v4365_v56 }
 0x89a   : > { %2392 = vst.msk [vmem:[%s3207_s7 + $0x8] sm:$0xff] %vm1706_vm9, %v2384_v50  ;;  %v2451_v54 = vadd.f32 %v3003_v13, %v2439_v37 }
 0x89c   : > { %v2349_v19 = vpop.permute.xlu1 %2348  ;;  %2459 = vst.msk [vmem:[%s3207_s7] sm:$0xff] %vm2150_vm10, %v2451_v54 }
 0x89d   : > { %v2373_v47 = vmul.f32 %v2349_v19, %v4367_v44  ;;  %v2365_v53 = vpop.permute.xlu0 %2364 }
 0x89e   : > { %v2377_v18 = vmul.f32 %v2365_v53, %v4402_v24 }
 0x89f   : > { %v2385_v43 = vadd.f32 %v4411_v8, %v2373_v47  ;;  %v2421_v14 = vpop.permute.xlu2 %2420 }
 0x8a0   : > { %v2389_v56 = vadd.f32 %v4411_v8, %v2377_v18  ;;  %v2442_v12 = vmul.f32 %v2421_v14, %v4380_v41 }
 0x8a1   : > { %2393 = vst.msk [vmem:[%s3207_s7 + $0x10] sm:$0xff] %vm1706_vm9, %v2385_v43 }
 0x8a2   : > { %2397 = vst.msk [vmem:[%s3207_s7 + $0x30] sm:$0xff] %vm1706_vm9, %v2389_v56  ;;  %v2454_v10 = vadd.f32 %v3003_v13, %v2442_v12 }
 0x8a4   : > { %v2357_v57 = vpop.permute.xlu1 %2356  ;;  %2462 = vst.msk [vmem:[%s3207_s7 + $0x18] sm:$0xff] %vm2150_vm10, %v2454_v10 }
 0x8a5   : > { %v2375_v58 = vmul.f32 %v2357_v57, %v4352_v15 }
 0x8a6   : > { %v2413_v42 = vpop.permute.xlu0 %2412 }
 0x8a7   : > { %v2387_v23 = vadd.f32 %v4411_v8, %v2375_v58  ;;  %v2429_v61 = vpop.permute.xlu2 %2428  ;;  %v2440_v33 = vmul.f32 %v2413_v42, %v4387_v1 }
 0x8a8   : > { %v2444_v41 = vmul.f32 %v2429_v61, %v4360_v49 }
 0x8a9   : > { %2395 = vst.msk [vmem:[%s3207_s7 + $0x20] sm:$0xff] %vm1706_vm9, %v2387_v23  ;;  %v2452_v25 = vadd.f32 %v3003_v13, %v2440_v33 }
 0x8aa   : > { %v2456_v5 = vadd.f32 %v3003_v13, %v2444_v41 }
 0x8ab   : > { %2460 = vst.msk [vmem:[%s3207_s7 + $0x8] sm:$0xff] %vm2150_vm10, %v2452_v25 }
 0x8ac   : > { %v2369_v48 = vpop.permute.xlu1 %2368  ;;  %2464 = vst.msk [vmem:[%s3207_s7 + $0x28] sm:$0xff] %vm2150_vm10, %v2456_v5 }
 0x8ad   : > { %v2378_v3 = vmul.f32 %v2369_v48, %v4395_v51 }
 0x8ae   : > { %v2433_v60 = vpop.permute.xlu0 %2432 }
 0x8af   : > { %v2390_v20 = vadd.f32 %v4411_v8, %v2378_v3  ;;  %v2445_v1 = vmul.f32 %v2433_v60, %v4402_v24 }
 0x8b1   : > { %2398 = vst.msk [vmem:[%s3207_s7 + $0x38] sm:$0xff] %vm1706_vm9, %v2390_v20  ;;  %v2457_v49 = vadd.f32 %v3003_v13, %v2445_v1 }
 0x8b3   : > { %2465 = vst.msk [vmem:[%s3207_s7 + $0x30] sm:$0xff] %vm2150_vm10, %v2457_v49 }
 0x8b5   : > { %v2417_v38 = vpop.permute.xlu1 %2416 }
 0x8b6   : > { %v2441_v28 = vmul.f32 %v2417_v38, %v4367_v44 }
 0x8b8   : > { %v2453_v0 = vadd.f32 %v3003_v13, %v2441_v28 }
 0x8ba   : > { %2461 = vst.msk [vmem:[%s3207_s7 + $0x10] sm:$0xff] %vm2150_vm10, %v2453_v0 }
 0x8bd   : > { %v2425_v59 = vpop.permute.xlu1 %2424 }
 0x8be   : > { %v2443_v31 = vmul.f32 %v2425_v59, %v4352_v15 }
 0x8c0   : > { %v2455_v30 = vadd.f32 %v3003_v13, %v2443_v31 }
 0x8c2   : > { %2463 = vst.msk [vmem:[%s3207_s7 + $0x20] sm:$0xff] %vm2150_vm10, %v2455_v30 }
 0x8c5   : > { %v2437_v8 = vpop.permute.xlu1 %2436 }
 0x8c6   : > { %v2446_v24 = vmul.f32 %v2437_v8, %v4395_v51 }
 0x8c8   : > { %v2458_v35 = vadd.f32 %v3003_v13, %v2446_v24 }
 0x8ca   : > { %2466 = vst.msk [vmem:[%s3207_s7 + $0x38] sm:$0xff] %vm2150_vm10, %v2458_v35 }
 0x8cb PF: > { %s15_s24 = sadd.s32 1, %s3074_s24   ;;  %s4587_s18 = smov %s3054_s19 }
 0x8cc   : > { %p12_p1 = scmp.ge.s32.totalorder %s15_s24, 10   ;;  %s4588_s19 = smov %s3173_s6 }
 0x8cd   : > { %s4589_s20 = smov %s3066_s22  ;;  %s4590_s21 = smov %s3070_s23 }
 0x8ce   : > { %s4591_s22 = smov %s4594_s25  ;;  %s4592_s23 = smov %s4598_s26 }
 0x8cf   :  { %14 = sbr.rel (!%p12_p1) target bundleno = 4 (0x4), region = 133 }

</bundles_post_ra>
